<compile_context>
chip_gen: v7x
topology: tpu7x:2x2x1
jax: 0.10.0
libtpu: 0.0.40
codegen_flags: <defaults>
</compile_context>

<pallas_src>
import jax
import jax.numpy as jnp
from jax import lax
from jax.experimental import pallas as pl
from jax.experimental.pallas import tpu as pltpu

CHAR_HIDDEN_SIZE = 100      # char_hidden_size in the PyTorch module
WORD_EMB_SIZE = 300         # word_emb_size in the PyTorch module
H_PAD = 128                 # hidden padded to one lane tile
WORDS_PER_BLOCK = 8         # words processed per grid step (sublane batch)


def _bigru_words_kernel(x_ref,                 # (L*NB, IN)   time-major chunk
                        wih_ref, bih_ref,      # (IN, 6*HP), (1, 6*HP)
                        whh_f_ref, bhh_f_ref,  # (HP, 3*HP), (1, 3*HP)
                        whh_b_ref, bhh_b_ref,  # (HP, 3*HP), (1, 3*HP)
                        h0_ref,                # (NB, 2*HP)  [h0_f | h0_b]
                        hout_ref,              # (NB, 2*HP)  output
                        xp_ref):               # scratch (L*NB, 6*HP)
    NB, HP2 = h0_ref.shape
    HP = HP2 // 2
    L = x_ref.shape[0] // NB

    # (3) One fused MXU pass: input projections for every timestep and BOTH
    # directions.  Lane layout (each gate zero-padded to its own 128-lane tile):
    #   [ r_f | z_f | n_f | r_b | z_b | n_b ]   -> 6*HP = 768 lanes.
    xp_ref[...] = (
        jnp.dot(x_ref[...], wih_ref[...], preferred_element_type=jnp.float32)
        + bih_ref[...]
    )

    # Hoisted out of the unrolled loop: recurrent weights (VMEM-resident,
    # streamed by the MXU) and the pre-broadcast recurrent biases (avoids a
    # broadcast_in_dim per iteration).
    whh_f = whh_f_ref[...]
    whh_b = whh_b_ref[...]
    bhh_f = jnp.broadcast_to(bhh_f_ref[...], (NB, 3 * HP))
    bhh_b = jnp.broadcast_to(bhh_b_ref[...], (NB, 3 * HP))

    h_f = h0_ref[:, 0:HP]
    h_b = h0_ref[:, HP:2 * HP]

    # (2) Fused + fully unrolled recurrence: the forward and backward chains
    # are independent, so interleaving them gives the scheduler two dependency
    # chains of MXU/EUP/VPU work to overlap every step.
    for i in range(L):
        tf = i
        tb = L - 1 - i                                   # (4) static reversed index
        gx_f = xp_ref[tf * NB:(tf + 1) * NB, 0:3 * HP]            # (NB, 3*HP)
        gx_b = xp_ref[tb * NB:(tb + 1) * NB, 3 * HP:6 * HP]       # (NB, 3*HP)

        gh_f = jnp.dot(h_f, whh_f, preferred_element_type=jnp.float32) + bhh_f
        gh_b = jnp.dot(h_b, whh_b, preferred_element_type=jnp.float32) + bhh_b

        # (1) Gate slices are exact 128-lane vreg columns (H padded to 128):
        # pure vreg slicing, no cross-lane movement on the critical path.
        r_f = jax.nn.sigmoid(gx_f[:, 0:HP] + gh_f[:, 0:HP])
        z_f = jax.nn.sigmoid(gx_f[:, HP:2 * HP] + gh_f[:, HP:2 * HP])
        n_f = jnp.tanh(gx_f[:, 2 * HP:3 * HP] + r_f * gh_f[:, 2 * HP:3 * HP])
        h_f = (1.0 - z_f) * n_f + z_f * h_f

        r_b = jax.nn.sigmoid(gx_b[:, 0:HP] + gh_b[:, 0:HP])
        z_b = jax.nn.sigmoid(gx_b[:, HP:2 * HP] + gh_b[:, HP:2 * HP])
        n_b = jnp.tanh(gx_b[:, 2 * HP:3 * HP] + r_b * gh_b[:, 2 * HP:3 * HP])
        h_b = (1.0 - z_b) * n_b + z_b * h_b

    # (6) Lane-dense 256-wide output block: full-lane stores, no masked vst.
    hout_ref[...] = jnp.concatenate([h_f, h_b], axis=1)


# ---------------------------------------------------------------------------
# Host-side parameter packing (zero-padded, lane-tile-aligned layouts).
# ---------------------------------------------------------------------------

def _pad_gate_cols(w, H, HP):
    """(rows, 3H) with gates [r|z|n] -> (rows, 3*HP); each gate in its own
    128-lane tile, padded lanes zero."""
    rows = w.shape[0]
    out = jnp.zeros((rows, 3 * HP), w.dtype)
    for g in range(3):
        out = out.at[:, g * HP:g * HP + H].set(w[:, g * H:(g + 1) * H])
    return out


def init_params(key, in_size=WORD_EMB_SIZE, hidden=CHAR_HIDDEN_SIZE, hp=H_PAD):
    """Synthetic init mimicking nn.GRU's U(-1/sqrt(H), 1/sqrt(H)); builds both
    the padded kernel-side tensors and the unpadded reference tensors."""
    ks = jax.random.split(key, 9)
    bound = 1.0 / float(hidden) ** 0.5

    def u(k, shape):
        return jax.random.uniform(k, shape, jnp.float32, -bound, bound)

    # Unpadded, pre-transposed torch-equivalent params (gate order [r|z|n]).
    wih_f = u(ks[0], (in_size, 3 * hidden))
    whh_f = u(ks[1], (hidden, 3 * hidden))
    bih_f = u(ks[2], (3 * hidden,))
    bhh_f = u(ks[3], (3 * hidden,))
    wih_b = u(ks[4], (in_size, 3 * hidden))
    whh_b = u(ks[5], (hidden, 3 * hidden))
    bih_b = u(ks[6], (3 * hidden,))
    bhh_b = u(ks[7], (3 * hidden,))
    # self.h = torch.randn(2, 1, hidden)  -> squeeze the batch dim
    h0 = jax.random.normal(ks[8], (2, hidden), jnp.float32)

    def pad_hh(w):
        out = jnp.zeros((hp, 3 * hp), jnp.float32)
        return out.at[:hidden, :].set(_pad_gate_cols(w, hidden, hp))

    wih = jnp.concatenate([_pad_gate_cols(wih_f, hidden, hp),
                           _pad_gate_cols(wih_b, hidden, hp)], axis=1)
    bih = jnp.concatenate([_pad_gate_cols(bih_f[None, :], hidden, hp),
                           _pad_gate_cols(bih_b[None, :], hidden, hp)], axis=1)
    h0_row = jnp.zeros((1, 2 * hp), jnp.float32)
    h0_row = h0_row.at[0, 0:hidden].set(h0[0]).at[0, hp:hp + hidden].set(h0[1])

    # NOTE: on v6e/v7x, wih (the dominant weight DMA) and x can be stored bf16
    # (MXU operands only, f32 accumulate); kept f32 here so the recurrence and
    # the correctness check are exact on all generations including v5e.
    return {
        "in_size": in_size, "hidden": hidden, "hp": hp,
        "wih": wih, "bih": bih,
        "whh_f": pad_hh(whh_f),
        "bhh_f": _pad_gate_cols(bhh_f[None, :], hidden, hp),
        "whh_b": pad_hh(whh_b),
        "bhh_b": _pad_gate_cols(bhh_b[None, :], hidden, hp),
        "h0_row": h0_row,
        "ref": dict(wih_f=wih_f, whh_f=whh_f, bih_f=bih_f, bhh_f=bhh_f,
                    wih_b=wih_b, whh_b=whh_b, bih_b=bih_b, bhh_b=bhh_b, h0=h0),
    }


# ---------------------------------------------------------------------------
# Wrappers
# ---------------------------------------------------------------------------

def char_embedding_forward_words(x_nli, params, *, words_per_block=WORDS_PER_BLOCK):
    """x_nli: (N, L, in_size) f32 — N independent words of length L.
    Returns (N, 2*hidden): per-word concat(h_forward, h_backward) == h.view(-1)."""
    N, L, IN = x_nli.shape
    assert IN == params["in_size"]
    H, HP = params["hidden"], params["hp"]
    NB = words_per_block
    C = -(-N // NB)                 # ceil-div: number of word chunks (grid)
    Np = C * NB

    # (5) Batch words: pad to a whole number of chunks, lay x out chunk-major /
    # time-major-within-chunk so each grid step gets contiguous rows and each
    # timestep is a contiguous, sublane-aligned slab of NB rows.
    x = jnp.pad(x_nli, ((0, Np - N), (0, 0), (0, 0)))
    x = x.reshape(C, NB, L, IN).transpose(0, 2, 1, 3).reshape(C * L * NB, IN)
    h0 = jnp.broadcast_to(params["h0_row"], (Np, 2 * HP))

    def full(shape):                # whole-array block, loaded once (constant map)
        return pl.BlockSpec(shape, lambda c: (0,) * len(shape))

    out = pl.pallas_call(
        _bigru_words_kernel,
        out_shape=jax.ShapeDtypeStruct((Np, 2 * HP), jnp.float32),
        grid_spec=pltpu.PrefetchScalarGridSpec(
            num_scalar_prefetch=0,
            grid=(C,),
            in_specs=[
                pl.BlockSpec((L * NB, IN), lambda c: (c, 0)),   # x, per chunk
                full((IN, 6 * HP)),                             # wih (fwd|bwd fused)
                full((1, 6 * HP)),                              # bih
                full((HP, 3 * HP)),                             # whh_f
                full((1, 3 * HP)),                              # bhh_f
                full((HP, 3 * HP)),                             # whh_b
                full((1, 3 * HP)),                              # bhh_b
                pl.BlockSpec((NB, 2 * HP), lambda c: (c, 0)),   # h0 per chunk
            ],
            out_specs=pl.BlockSpec((NB, 2 * HP), lambda c: (c, 0)),
            scratch_shapes=[pltpu.VMEM((L * NB, 6 * HP), jnp.float32)],
        ),
        compiler_params=pltpu.CompilerParams(
            dimension_semantics=("parallel",)),   # chunks shard across TCs (v7x)
    )(x, params["wih"], params["bih"],
      params["whh_f"], params["bhh_f"], params["whh_b"], params["bhh_b"], h0)

    out = out[:N]
    return jnp.concatenate([out[:, 0:H], out[:, HP:HP + H]], axis=1)


def char_embedding_forward(x_lbi, params):
    """Original module API: x (L, 1, in_size) -> (2*hidden,) == h.view(-1)."""
    L, b, IN = x_lbi.shape
    assert b == 1
    return char_embedding_forward_words(x_lbi.transpose(1, 0, 2), params)[0]


# ---------------------------------------------------------------------------
# Pure-JAX reference (unpadded math) for the correctness check.
# ---------------------------------------------------------------------------

def _reference_forward(x_nli, params):
    H = params["hidden"]
    p = params["ref"]

    def one_word(x):                        # x: (L, IN)
        def run(wih, whh, bih, bhh, h0, reverse):
            xp = x @ wih + bih              # (L, 3H)
            if reverse:
                xp = xp[::-1]

            def step(h, gx):
                gh = h @ whh + bhh
                r = jax.nn.sigmoid(gx[:H] + gh[:H])
                z = jax.nn.sigmoid(gx[H:2 * H] + gh[H:2 * H])
                n = jnp.tanh(gx[2 * H:] + r * gh[2 * H:])
                return (1.0 - z) * n + z * h, None

            h, _ = lax.scan(step, h0, xp)
            return h

        h_f = run(p["wih_f"], p["whh_f"], p["bih_f"], p["bhh_f"], p["h0"][0], False)
        h_b = run(p["wih_b"], p["whh_b"], p["bih_b"], p["bhh_b"], p["h0"][1], True)
        return jnp.concatenate([h_f, h_b])  # == h.view(-1) per word

    return jax.vmap(one_word)(x_nli)


if __name__ == "__main__":
    key = jax.random.PRNGKey(0)
    k_par, k_x = jax.random.split(key)

    L = 8            # chars per word
    N = 16           # words per call (2 grid chunks of 8)
    IN = WORD_EMB_SIZE

    params = init_params(k_par, in_size=IN, hidden=CHAR_HIDDEN_SIZE)
    x = jax.random.normal(k_x, (N, L, IN), jnp.float32)

    out = jax.block_until_ready(char_embedding_forward_words(x, params))
    assert out.shape == (N, 2 * CHAR_HIDDEN_SIZE), out.shape

    ref = jax.block_until_ready(_reference_forward(x, params))
    err = float(jnp.max(jnp.abs(out - ref)))
    assert jnp.allclose(out, ref, atol=1e-4, rtol=1e-4), err

    # Original single-word (batch=1) module semantics.
    x1 = x[0][:, None, :]                              # (L, 1, IN)
    out1 = jax.block_until_ready(char_embedding_forward(x1, params))
    assert out1.shape == (2 * CHAR_HIDDEN_SIZE,), out1.shape
    assert jnp.allclose(out1, ref[0], atol=1e-4, rtol=1e-4)

    print("KERNEL_OK")
</pallas_src>

<mosaic_0001>
module attributes {stable_mosaic.version = 11 : i64} {
  func.func @_bigru_words_kernel(%arg0: i32, %arg1: memref<64x300xf32, #tpu.memory_space<vmem>>, %arg2: memref<300x768xf32, #tpu.memory_space<vmem>>, %arg3: memref<1x768xf32, #tpu.memory_space<vmem>>, %arg4: memref<128x384xf32, #tpu.memory_space<vmem>>, %arg5: memref<1x384xf32, #tpu.memory_space<vmem>>, %arg6: memref<128x384xf32, #tpu.memory_space<vmem>>, %arg7: memref<1x384xf32, #tpu.memory_space<vmem>>, %arg8: memref<8x256xf32, #tpu.memory_space<vmem>>, %arg9: memref<8x256xf32, #tpu.memory_space<vmem>>, %arg10: memref<64x768xf32, #tpu.memory_space<vmem>>) attributes {dimension_semantics = [#tpu.dimension_semantics<parallel>], iteration_bounds = array<i64: 2>, scalar_prefetch = 0 : i64, scratch_operands = 1 : i64, tpu.core_type = #tpu.core_type<tc>, window_params = [{transform_indices = @transform_0, window_bounds = array<i64: 64, 300>}, {pipeline_mode = #tpu.pipeline_mode<synchronous>, transform_indices = @transform_1, window_bounds = array<i64: 300, 768>}, {pipeline_mode = #tpu.pipeline_mode<synchronous>, transform_indices = @transform_2, window_bounds = array<i64: 1, 768>}, {pipeline_mode = #tpu.pipeline_mode<synchronous>, transform_indices = @transform_3, window_bounds = array<i64: 128, 384>}, {pipeline_mode = #tpu.pipeline_mode<synchronous>, transform_indices = @transform_4, window_bounds = array<i64: 1, 384>}, {pipeline_mode = #tpu.pipeline_mode<synchronous>, transform_indices = @transform_5, window_bounds = array<i64: 128, 384>}, {pipeline_mode = #tpu.pipeline_mode<synchronous>, transform_indices = @transform_6, window_bounds = array<i64: 1, 384>}, {transform_indices = @transform_7, window_bounds = array<i64: 8, 256>}, {transform_indices = @transform_8, window_bounds = array<i64: 8, 256>}]} {
    %c0 = arith.constant 0 : index
    %c0_0 = arith.constant 0 : index
    %0 = vector.load %arg1[%c0, %c0_0] : memref<64x300xf32, #tpu.memory_space<vmem>>, vector<64x300xf32>
    %c0_1 = arith.constant 0 : index
    %c0_2 = arith.constant 0 : index
    %1 = vector.load %arg2[%c0_1, %c0_2] : memref<300x768xf32, #tpu.memory_space<vmem>>, vector<300x768xf32>
    %cst = arith.constant dense<0.000000e+00> : vector<64x768xf32>
    %2 = tpu.matmul %0, %1, %cst {dimension_numbers = #tpu.dot_dimension_numbers<[1], [0], [0], [1], [0, 0, 1, 1], [], []>} : vector<64x300xf32>, vector<300x768xf32>, vector<64x768xf32> -> vector<64x768xf32>
    %c0_3 = arith.constant 0 : index
    %c0_4 = arith.constant 0 : index
    %3 = vector.load %arg3[%c0_3, %c0_4] : memref<1x768xf32, #tpu.memory_space<vmem>>, vector<1x768xf32>
    %4 = vector.broadcast %3 : vector<1x768xf32> to vector<64x768xf32>
    %5 = arith.addf %2, %4 : vector<64x768xf32>
    %c0_5 = arith.constant 0 : index
    %c0_6 = arith.constant 0 : index
    %6 = vector.load %arg10[%c0_5, %c0_6] : memref<64x768xf32, #tpu.memory_space<vmem>>, vector<64x768xf32>
    tpu.vector_store %arg10[%c0_5, %c0_6], %5 {strides = array<i32>} : memref<64x768xf32, #tpu.memory_space<vmem>>, vector<64x768xf32>,
    %c0_7 = arith.constant 0 : index
    %c0_8 = arith.constant 0 : index
    %7 = vector.load %arg4[%c0_7, %c0_8] : memref<128x384xf32, #tpu.memory_space<vmem>>, vector<128x384xf32>
    %c0_9 = arith.constant 0 : index
    %c0_10 = arith.constant 0 : index
    %8 = vector.load %arg6[%c0_9, %c0_10] : memref<128x384xf32, #tpu.memory_space<vmem>>, vector<128x384xf32>
    %c0_11 = arith.constant 0 : index
    %c0_12 = arith.constant 0 : index
    %9 = vector.load %arg5[%c0_11, %c0_12] : memref<1x384xf32, #tpu.memory_space<vmem>>, vector<1x384xf32>
    %10 = vector.shape_cast %9 : vector<1x384xf32> to vector<1x384xf32>
    %11 = vector.broadcast %10 : vector<1x384xf32> to vector<8x384xf32>
    %c0_13 = arith.constant 0 : index
    %c0_14 = arith.constant 0 : index
    %12 = vector.load %arg7[%c0_13, %c0_14] : memref<1x384xf32, #tpu.memory_space<vmem>>, vector<1x384xf32>
    %13 = vector.shape_cast %12 : vector<1x384xf32> to vector<1x384xf32>
    %14 = vector.broadcast %13 : vector<1x384xf32> to vector<8x384xf32>
    %c0_15 = arith.constant 0 : index
    %c0_16 = arith.constant 0 : index
    %15 = vector.load %arg8[%c0_15, %c0_16] : memref<8x256xf32, #tpu.memory_space<vmem>>, vector<8x128xf32>
    %c0_17 = arith.constant 0 : index
    %c128 = arith.constant 128 : index
    %16 = vector.load %arg8[%c0_17, %c128] : memref<8x256xf32, #tpu.memory_space<vmem>>, vector<8x128xf32>
    %c0_18 = arith.constant 0 : index
    %c0_19 = arith.constant 0 : index
    %17 = vector.load %arg10[%c0_18, %c0_19] : memref<64x768xf32, #tpu.memory_space<vmem>>, vector<8x384xf32>
    %c56 = arith.constant 56 : index
    %c384 = arith.constant 384 : index
    %18 = vector.load %arg10[%c56, %c384] : memref<64x768xf32, #tpu.memory_space<vmem>>, vector<8x384xf32>
    %cst_20 = arith.constant dense<0.000000e+00> : vector<8x384xf32>
    %19 = tpu.matmul %15, %7, %cst_20 {dimension_numbers = #tpu.dot_dimension_numbers<[1], [0], [0], [1], [0, 0, 1, 1], [], []>} : vector<8x128xf32>, vector<128x384xf32>, vector<8x384xf32> -> vector<8x384xf32>
    %20 = arith.addf %19, %11 : vector<8x384xf32>
    %cst_21 = arith.constant dense<0.000000e+00> : vector<8x384xf32>
    %21 = tpu.matmul %16, %8, %cst_21 {dimension_numbers = #tpu.dot_dimension_numbers<[1], [0], [0], [1], [0, 0, 1, 1], [], []>} : vector<8x128xf32>, vector<128x384xf32>, vector<8x384xf32> -> vector<8x384xf32>
    %22 = arith.addf %21, %14 : vector<8x384xf32>
    %23 = vector.extract_strided_slice %17 {offsets = [0, 0], sizes = [8, 128], strides = [1, 1]} : vector<8x384xf32> to vector<8x128xf32>
    %24 = vector.extract_strided_slice %20 {offsets = [0, 0], sizes = [8, 128], strides = [1, 1]} : vector<8x384xf32> to vector<8x128xf32>
    %25 = arith.addf %23, %24 : vector<8x128xf32>
    %26 = arith.negf %25 : vector<8x128xf32>
    %27 = math.exp %26 : vector<8x128xf32>
    %cst_22 = arith.constant 1.000000e+00 : f32
    %28 = vector.broadcast %cst_22 : f32 to vector<8x128xf32>
    %29 = arith.addf %28, %27 : vector<8x128xf32>
    %30 = arith.divf %28, %29 : vector<8x128xf32>
    %31 = vector.extract_strided_slice %17 {offsets = [0, 128], sizes = [8, 128], strides = [1, 1]} : vector<8x384xf32> to vector<8x128xf32>
    %32 = vector.extract_strided_slice %20 {offsets = [0, 128], sizes = [8, 128], strides = [1, 1]} : vector<8x384xf32> to vector<8x128xf32>
    %33 = arith.addf %31, %32 : vector<8x128xf32>
    %34 = arith.negf %33 : vector<8x128xf32>
    %35 = math.exp %34 : vector<8x128xf32>
    %cst_23 = arith.constant 1.000000e+00 : f32
    %36 = vector.broadcast %cst_23 : f32 to vector<8x128xf32>
    %37 = arith.addf %36, %35 : vector<8x128xf32>
    %38 = arith.divf %36, %37 : vector<8x128xf32>
    %39 = vector.extract_strided_slice %17 {offsets = [0, 256], sizes = [8, 128], strides = [1, 1]} : vector<8x384xf32> to vector<8x128xf32>
    %40 = vector.extract_strided_slice %20 {offsets = [0, 256], sizes = [8, 128], strides = [1, 1]} : vector<8x384xf32> to vector<8x128xf32>
    %41 = arith.mulf %30, %40 : vector<8x128xf32>
    %42 = arith.addf %39, %41 : vector<8x128xf32>
    %43 = math.tanh %42 : vector<8x128xf32>
    %cst_24 = arith.constant 1.000000e+00 : f32
    %44 = vector.broadcast %cst_24 : f32 to vector<8x128xf32>
    %45 = arith.subf %44, %38 : vector<8x128xf32>
    %46 = arith.mulf %45, %43 : vector<8x128xf32>
    %47 = arith.mulf %38, %15 : vector<8x128xf32>
    %48 = arith.addf %46, %47 : vector<8x128xf32>
    %49 = vector.extract_strided_slice %18 {offsets = [0, 0], sizes = [8, 128], strides = [1, 1]} : vector<8x384xf32> to vector<8x128xf32>
    %50 = vector.extract_strided_slice %22 {offsets = [0, 0], sizes = [8, 128], strides = [1, 1]} : vector<8x384xf32> to vector<8x128xf32>
    %51 = arith.addf %49, %50 : vector<8x128xf32>
    %52 = arith.negf %51 : vector<8x128xf32>
    %53 = math.exp %52 : vector<8x128xf32>
    %cst_25 = arith.constant 1.000000e+00 : f32
    %54 = vector.broadcast %cst_25 : f32 to vector<8x128xf32>
    %55 = arith.addf %54, %53 : vector<8x128xf32>
    %56 = arith.divf %54, %55 : vector<8x128xf32>
    %57 = vector.extract_strided_slice %18 {offsets = [0, 128], sizes = [8, 128], strides = [1, 1]} : vector<8x384xf32> to vector<8x128xf32>
    %58 = vector.extract_strided_slice %22 {offsets = [0, 128], sizes = [8, 128], strides = [1, 1]} : vector<8x384xf32> to vector<8x128xf32>
    %59 = arith.addf %57, %58 : vector<8x128xf32>
    %60 = arith.negf %59 : vector<8x128xf32>
    %61 = math.exp %60 : vector<8x128xf32>
    %cst_26 = arith.constant 1.000000e+00 : f32
    %62 = vector.broadcast %cst_26 : f32 to vector<8x128xf32>
    %63 = arith.addf %62, %61 : vector<8x128xf32>
    %64 = arith.divf %62, %63 : vector<8x128xf32>
    %65 = vector.extract_strided_slice %18 {offsets = [0, 256], sizes = [8, 128], strides = [1, 1]} : vector<8x384xf32> to vector<8x128xf32>
    %66 = vector.extract_strided_slice %22 {offsets = [0, 256], sizes = [8, 128], strides = [1, 1]} : vector<8x384xf32> to vector<8x128xf32>
    %67 = arith.mulf %56, %66 : vector<8x128xf32>
    %68 = arith.addf %65, %67 : vector<8x128xf32>
    %69 = math.tanh %68 : vector<8x128xf32>
    %cst_27 = arith.constant 1.000000e+00 : f32
    %70 = vector.broadcast %cst_27 : f32 to vector<8x128xf32>
    %71 = arith.subf %70, %64 : vector<8x128xf32>
    %72 = arith.mulf %71, %69 : vector<8x128xf32>
    %73 = arith.mulf %64, %16 : vector<8x128xf32>
    %74 = arith.addf %72, %73 : vector<8x128xf32>
    %c8 = arith.constant 8 : index
    %c0_28 = arith.constant 0 : index
    %75 = vector.load %arg10[%c8, %c0_28] : memref<64x768xf32, #tpu.memory_space<vmem>>, vector<8x384xf32>
    %c48 = arith.constant 48 : index
    %c384_29 = arith.constant 384 : index
    %76 = vector.load %arg10[%c48, %c384_29] : memref<64x768xf32, #tpu.memory_space<vmem>>, vector<8x384xf32>
    %cst_30 = arith.constant dense<0.000000e+00> : vector<8x384xf32>
    %77 = tpu.matmul %48, %7, %cst_30 {dimension_numbers = #tpu.dot_dimension_numbers<[1], [0], [0], [1], [0, 0, 1, 1], [], []>} : vector<8x128xf32>, vector<128x384xf32>, vector<8x384xf32> -> vector<8x384xf32>
    %78 = arith.addf %77, %11 : vector<8x384xf32>
    %cst_31 = arith.constant dense<0.000000e+00> : vector<8x384xf32>
    %79 = tpu.matmul %74, %8, %cst_31 {dimension_numbers = #tpu.dot_dimension_numbers<[1], [0], [0], [1], [0, 0, 1, 1], [], []>} : vector<8x128xf32>, vector<128x384xf32>, vector<8x384xf32> -> vector<8x384xf32>
    %80 = arith.addf %79, %14 : vector<8x384xf32>
    %81 = vector.extract_strided_slice %75 {offsets = [0, 0], sizes = [8, 128], strides = [1, 1]} : vector<8x384xf32> to vector<8x128xf32>
    %82 = vector.extract_strided_slice %78 {offsets = [0, 0], sizes = [8, 128], strides = [1, 1]} : vector<8x384xf32> to vector<8x128xf32>
    %83 = arith.addf %81, %82 : vector<8x128xf32>
    %84 = arith.negf %83 : vector<8x128xf32>
    %85 = math.exp %84 : vector<8x128xf32>
    %cst_32 = arith.constant 1.000000e+00 : f32
    %86 = vector.broadcast %cst_32 : f32 to vector<8x128xf32>
    %87 = arith.addf %86, %85 : vector<8x128xf32>
    %88 = arith.divf %86, %87 : vector<8x128xf32>
    %89 = vector.extract_strided_slice %75 {offsets = [0, 128], sizes = [8, 128], strides = [1, 1]} : vector<8x384xf32> to vector<8x128xf32>
    %90 = vector.extract_strided_slice %78 {offsets = [0, 128], sizes = [8, 128], strides = [1, 1]} : vector<8x384xf32> to vector<8x128xf32>
    %91 = arith.addf %89, %90 : vector<8x128xf32>
    %92 = arith.negf %91 : vector<8x128xf32>
    %93 = math.exp %92 : vector<8x128xf32>
    %cst_33 = arith.constant 1.000000e+00 : f32
    %94 = vector.broadcast %cst_33 : f32 to vector<8x128xf32>
    %95 = arith.addf %94, %93 : vector<8x128xf32>
    %96 = arith.divf %94, %95 : vector<8x128xf32>
    %97 = vector.extract_strided_slice %75 {offsets = [0, 256], sizes = [8, 128], strides = [1, 1]} : vector<8x384xf32> to vector<8x128xf32>
    %98 = vector.extract_strided_slice %78 {offsets = [0, 256], sizes = [8, 128], strides = [1, 1]} : vector<8x384xf32> to vector<8x128xf32>
    %99 = arith.mulf %88, %98 : vector<8x128xf32>
    %100 = arith.addf %97, %99 : vector<8x128xf32>
    %101 = math.tanh %100 : vector<8x128xf32>
    %cst_34 = arith.constant 1.000000e+00 : f32
    %102 = vector.broadcast %cst_34 : f32 to vector<8x128xf32>
    %103 = arith.subf %102, %96 : vector<8x128xf32>
    %104 = arith.mulf %103, %101 : vector<8x128xf32>
    %105 = arith.mulf %96, %48 : vector<8x128xf32>
    %106 = arith.addf %104, %105 : vector<8x128xf32>
    %107 = vector.extract_strided_slice %76 {offsets = [0, 0], sizes = [8, 128], strides = [1, 1]} : vector<8x384xf32> to vector<8x128xf32>
    %108 = vector.extract_strided_slice %80 {offsets = [0, 0], sizes = [8, 128], strides = [1, 1]} : vector<8x384xf32> to vector<8x128xf32>
    %109 = arith.addf %107, %108 : vector<8x128xf32>
    %110 = arith.negf %109 : vector<8x128xf32>
    %111 = math.exp %110 : vector<8x128xf32>
    %cst_35 = arith.constant 1.000000e+00 : f32
    %112 = vector.broadcast %cst_35 : f32 to vector<8x128xf32>
    %113 = arith.addf %112, %111 : vector<8x128xf32>
    %114 = arith.divf %112, %113 : vector<8x128xf32>
    %115 = vector.extract_strided_slice %76 {offsets = [0, 128], sizes = [8, 128], strides = [1, 1]} : vector<8x384xf32> to vector<8x128xf32>
    %116 = vector.extract_strided_slice %80 {offsets = [0, 128], sizes = [8, 128], strides = [1, 1]} : vector<8x384xf32> to vector<8x128xf32>
    %117 = arith.addf %115, %116 : vector<8x128xf32>
    %118 = arith.negf %117 : vector<8x128xf32>
    %119 = math.exp %118 : vector<8x128xf32>
    %cst_36 = arith.constant 1.000000e+00 : f32
    %120 = vector.broadcast %cst_36 : f32 to vector<8x128xf32>
    %121 = arith.addf %120, %119 : vector<8x128xf32>
    %122 = arith.divf %120, %121 : vector<8x128xf32>
    %123 = vector.extract_strided_slice %76 {offsets = [0, 256], sizes = [8, 128], strides = [1, 1]} : vector<8x384xf32> to vector<8x128xf32>
    %124 = vector.extract_strided_slice %80 {offsets = [0, 256], sizes = [8, 128], strides = [1, 1]} : vector<8x384xf32> to vector<8x128xf32>
    %125 = arith.mulf %114, %124 : vector<8x128xf32>
    %126 = arith.addf %123, %125 : vector<8x128xf32>
    %127 = math.tanh %126 : vector<8x128xf32>
    %cst_37 = arith.constant 1.000000e+00 : f32
    %128 = vector.broadcast %cst_37 : f32 to vector<8x128xf32>
    %129 = arith.subf %128, %122 : vector<8x128xf32>
    %130 = arith.mulf %129, %127 : vector<8x128xf32>
    %131 = arith.mulf %122, %74 : vector<8x128xf32>
    %132 = arith.addf %130, %131 : vector<8x128xf32>
    %c16 = arith.constant 16 : index
    %c0_38 = arith.constant 0 : index
    %133 = vector.load %arg10[%c16, %c0_38] : memref<64x768xf32, #tpu.memory_space<vmem>>, vector<8x384xf32>
    %c40 = arith.constant 40 : index
    %c384_39 = arith.constant 384 : index
    %134 = vector.load %arg10[%c40, %c384_39] : memref<64x768xf32, #tpu.memory_space<vmem>>, vector<8x384xf32>
    %cst_40 = arith.constant dense<0.000000e+00> : vector<8x384xf32>
    %135 = tpu.matmul %106, %7, %cst_40 {dimension_numbers = #tpu.dot_dimension_numbers<[1], [0], [0], [1], [0, 0, 1, 1], [], []>} : vector<8x128xf32>, vector<128x384xf32>, vector<8x384xf32> -> vector<8x384xf32>
    %136 = arith.addf %135, %11 : vector<8x384xf32>
    %cst_41 = arith.constant dense<0.000000e+00> : vector<8x384xf32>
    %137 = tpu.matmul %132, %8, %cst_41 {dimension_numbers = #tpu.dot_dimension_numbers<[1], [0], [0], [1], [0, 0, 1, 1], [], []>} : vector<8x128xf32>, vector<128x384xf32>, vector<8x384xf32> -> vector<8x384xf32>
    %138 = arith.addf %137, %14 : vector<8x384xf32>
    %139 = vector.extract_strided_slice %133 {offsets = [0, 0], sizes = [8, 128], strides = [1, 1]} : vector<8x384xf32> to vector<8x128xf32>
    %140 = vector.extract_strided_slice %136 {offsets = [0, 0], sizes = [8, 128], strides = [1, 1]} : vector<8x384xf32> to vector<8x128xf32>
    %141 = arith.addf %139, %140 : vector<8x128xf32>
    %142 = arith.negf %141 : vector<8x128xf32>
    %143 = math.exp %142 : vector<8x128xf32>
    %cst_42 = arith.constant 1.000000e+00 : f32
    %144 = vector.broadcast %cst_42 : f32 to vector<8x128xf32>
    %145 = arith.addf %144, %143 : vector<8x128xf32>
    %146 = arith.divf %144, %145 : vector<8x128xf32>
    %147 = vector.extract_strided_slice %133 {offsets = [0, 128], sizes = [8, 128], strides = [1, 1]} : vector<8x384xf32> to vector<8x128xf32>
    %148 = vector.extract_strided_slice %136 {offsets = [0, 128], sizes = [8, 128], strides = [1, 1]} : vector<8x384xf32> to vector<8x128xf32>
    %149 = arith.addf %147, %148 : vector<8x128xf32>
    %150 = arith.negf %149 : vector<8x128xf32>
    %151 = math.exp %150 : vector<8x128xf32>
    %cst_43 = arith.constant 1.000000e+00 : f32
    %152 = vector.broadcast %cst_43 : f32 to vector<8x128xf32>
    %153 = arith.addf %152, %151 : vector<8x128xf32>
    %154 = arith.divf %152, %153 : vector<8x128xf32>
    %155 = vector.extract_strided_slice %133 {offsets = [0, 256], sizes = [8, 128], strides = [1, 1]} : vector<8x384xf32> to vector<8x128xf32>
    %156 = vector.extract_strided_slice %136 {offsets = [0, 256], sizes = [8, 128], strides = [1, 1]} : vector<8x384xf32> to vector<8x128xf32>
    %157 = arith.mulf %146, %156 : vector<8x128xf32>
    %158 = arith.addf %155, %157 : vector<8x128xf32>
    %159 = math.tanh %158 : vector<8x128xf32>
    %cst_44 = arith.constant 1.000000e+00 : f32
    %160 = vector.broadcast %cst_44 : f32 to vector<8x128xf32>
    %161 = arith.subf %160, %154 : vector<8x128xf32>
    %162 = arith.mulf %161, %159 : vector<8x128xf32>
    %163 = arith.mulf %154, %106 : vector<8x128xf32>
    %164 = arith.addf %162, %163 : vector<8x128xf32>
    %165 = vector.extract_strided_slice %134 {offsets = [0, 0], sizes = [8, 128], strides = [1, 1]} : vector<8x384xf32> to vector<8x128xf32>
    %166 = vector.extract_strided_slice %138 {offsets = [0, 0], sizes = [8, 128], strides = [1, 1]} : vector<8x384xf32> to vector<8x128xf32>
    %167 = arith.addf %165, %166 : vector<8x128xf32>
    %168 = arith.negf %167 : vector<8x128xf32>
    %169 = math.exp %168 : vector<8x128xf32>
    %cst_45 = arith.constant 1.000000e+00 : f32
    %170 = vector.broadcast %cst_45 : f32 to vector<8x128xf32>
    %171 = arith.addf %170, %169 : vector<8x128xf32>
    %172 = arith.divf %170, %171 : vector<8x128xf32>
    %173 = vector.extract_strided_slice %134 {offsets = [0, 128], sizes = [8, 128], strides = [1, 1]} : vector<8x384xf32> to vector<8x128xf32>
    %174 = vector.extract_strided_slice %138 {offsets = [0, 128], sizes = [8, 128], strides = [1, 1]} : vector<8x384xf32> to vector<8x128xf32>
    %175 = arith.addf %173, %174 : vector<8x128xf32>
    %176 = arith.negf %175 : vector<8x128xf32>
    %177 = math.exp %176 : vector<8x128xf32>
    %cst_46 = arith.constant 1.000000e+00 : f32
    %178 = vector.broadcast %cst_46 : f32 to vector<8x128xf32>
    %179 = arith.addf %178, %177 : vector<8x128xf32>
    %180 = arith.divf %178, %179 : vector<8x128xf32>
    %181 = vector.extract_strided_slice %134 {offsets = [0, 256], sizes = [8, 128], strides = [1, 1]} : vector<8x384xf32> to vector<8x128xf32>
    %182 = vector.extract_strided_slice %138 {offsets = [0, 256], sizes = [8, 128], strides = [1, 1]} : vector<8x384xf32> to vector<8x128xf32>
    %183 = arith.mulf %172, %182 : vector<8x128xf32>
    %184 = arith.addf %181, %183 : vector<8x128xf32>
    %185 = math.tanh %184 : vector<8x128xf32>
    %cst_47 = arith.constant 1.000000e+00 : f32
    %186 = vector.broadcast %cst_47 : f32 to vector<8x128xf32>
    %187 = arith.subf %186, %180 : vector<8x128xf32>
    %188 = arith.mulf %187, %185 : vector<8x128xf32>
    %189 = arith.mulf %180, %132 : vector<8x128xf32>
    %190 = arith.addf %188, %189 : vector<8x128xf32>
    %c24 = arith.constant 24 : index
    %c0_48 = arith.constant 0 : index
    %191 = vector.load %arg10[%c24, %c0_48] : memref<64x768xf32, #tpu.memory_space<vmem>>, vector<8x384xf32>
    %c32 = arith.constant 32 : index
    %c384_49 = arith.constant 384 : index
    %192 = vector.load %arg10[%c32, %c384_49] : memref<64x768xf32, #tpu.memory_space<vmem>>, vector<8x384xf32>
    %cst_50 = arith.constant dense<0.000000e+00> : vector<8x384xf32>
    %193 = tpu.matmul %164, %7, %cst_50 {dimension_numbers = #tpu.dot_dimension_numbers<[1], [0], [0], [1], [0, 0, 1, 1], [], []>} : vector<8x128xf32>, vector<128x384xf32>, vector<8x384xf32> -> vector<8x384xf32>
    %194 = arith.addf %193, %11 : vector<8x384xf32>
    %cst_51 = arith.constant dense<0.000000e+00> : vector<8x384xf32>
    %195 = tpu.matmul %190, %8, %cst_51 {dimension_numbers = #tpu.dot_dimension_numbers<[1], [0], [0], [1], [0, 0, 1, 1], [], []>} : vector<8x128xf32>, vector<128x384xf32>, vector<8x384xf32> -> vector<8x384xf32>
    %196 = arith.addf %195, %14 : vector<8x384xf32>
    %197 = vector.extract_strided_slice %191 {offsets = [0, 0], sizes = [8, 128], strides = [1, 1]} : vector<8x384xf32> to vector<8x128xf32>
    %198 = vector.extract_strided_slice %194 {offsets = [0, 0], sizes = [8, 128], strides = [1, 1]} : vector<8x384xf32> to vector<8x128xf32>
    %199 = arith.addf %197, %198 : vector<8x128xf32>
    %200 = arith.negf %199 : vector<8x128xf32>
    %201 = math.exp %200 : vector<8x128xf32>
    %cst_52 = arith.constant 1.000000e+00 : f32
    %202 = vector.broadcast %cst_52 : f32 to vector<8x128xf32>
    %203 = arith.addf %202, %201 : vector<8x128xf32>
    %204 = arith.divf %202, %203 : vector<8x128xf32>
    %205 = vector.extract_strided_slice %191 {offsets = [0, 128], sizes = [8, 128], strides = [1, 1]} : vector<8x384xf32> to vector<8x128xf32>
    %206 = vector.extract_strided_slice %194 {offsets = [0, 128], sizes = [8, 128], strides = [1, 1]} : vector<8x384xf32> to vector<8x128xf32>
    %207 = arith.addf %205, %206 : vector<8x128xf32>
    %208 = arith.negf %207 : vector<8x128xf32>
    %209 = math.exp %208 : vector<8x128xf32>
    %cst_53 = arith.constant 1.000000e+00 : f32
    %210 = vector.broadcast %cst_53 : f32 to vector<8x128xf32>
    %211 = arith.addf %210, %209 : vector<8x128xf32>
    %212 = arith.divf %210, %211 : vector<8x128xf32>
    %213 = vector.extract_strided_slice %191 {offsets = [0, 256], sizes = [8, 128], strides = [1, 1]} : vector<8x384xf32> to vector<8x128xf32>
    %214 = vector.extract_strided_slice %194 {offsets = [0, 256], sizes = [8, 128], strides = [1, 1]} : vector<8x384xf32> to vector<8x128xf32>
    %215 = arith.mulf %204, %214 : vector<8x128xf32>
    %216 = arith.addf %213, %215 : vector<8x128xf32>
    %217 = math.tanh %216 : vector<8x128xf32>
    %cst_54 = arith.constant 1.000000e+00 : f32
    %218 = vector.broadcast %cst_54 : f32 to vector<8x128xf32>
    %219 = arith.subf %218, %212 : vector<8x128xf32>
    %220 = arith.mulf %219, %217 : vector<8x128xf32>
    %221 = arith.mulf %212, %164 : vector<8x128xf32>
    %222 = arith.addf %220, %221 : vector<8x128xf32>
    %223 = vector.extract_strided_slice %192 {offsets = [0, 0], sizes = [8, 128], strides = [1, 1]} : vector<8x384xf32> to vector<8x128xf32>
    %224 = vector.extract_strided_slice %196 {offsets = [0, 0], sizes = [8, 128], strides = [1, 1]} : vector<8x384xf32> to vector<8x128xf32>
    %225 = arith.addf %223, %224 : vector<8x128xf32>
    %226 = arith.negf %225 : vector<8x128xf32>
    %227 = math.exp %226 : vector<8x128xf32>
    %cst_55 = arith.constant 1.000000e+00 : f32
    %228 = vector.broadcast %cst_55 : f32 to vector<8x128xf32>
    %229 = arith.addf %228, %227 : vector<8x128xf32>
    %230 = arith.divf %228, %229 : vector<8x128xf32>
    %231 = vector.extract_strided_slice %192 {offsets = [0, 128], sizes = [8, 128], strides = [1, 1]} : vector<8x384xf32> to vector<8x128xf32>
    %232 = vector.extract_strided_slice %196 {offsets = [0, 128], sizes = [8, 128], strides = [1, 1]} : vector<8x384xf32> to vector<8x128xf32>
    %233 = arith.addf %231, %232 : vector<8x128xf32>
    %234 = arith.negf %233 : vector<8x128xf32>
    %235 = math.exp %234 : vector<8x128xf32>
    %cst_56 = arith.constant 1.000000e+00 : f32
    %236 = vector.broadcast %cst_56 : f32 to vector<8x128xf32>
    %237 = arith.addf %236, %235 : vector<8x128xf32>
    %238 = arith.divf %236, %237 : vector<8x128xf32>
    %239 = vector.extract_strided_slice %192 {offsets = [0, 256], sizes = [8, 128], strides = [1, 1]} : vector<8x384xf32> to vector<8x128xf32>
    %240 = vector.extract_strided_slice %196 {offsets = [0, 256], sizes = [8, 128], strides = [1, 1]} : vector<8x384xf32> to vector<8x128xf32>
    %241 = arith.mulf %230, %240 : vector<8x128xf32>
    %242 = arith.addf %239, %241 : vector<8x128xf32>
    %243 = math.tanh %242 : vector<8x128xf32>
    %cst_57 = arith.constant 1.000000e+00 : f32
    %244 = vector.broadcast %cst_57 : f32 to vector<8x128xf32>
    %245 = arith.subf %244, %238 : vector<8x128xf32>
    %246 = arith.mulf %245, %243 : vector<8x128xf32>
    %247 = arith.mulf %238, %190 : vector<8x128xf32>
    %248 = arith.addf %246, %247 : vector<8x128xf32>
    %c32_58 = arith.constant 32 : index
    %c0_59 = arith.constant 0 : index
    %249 = vector.load %arg10[%c32_58, %c0_59] : memref<64x768xf32, #tpu.memory_space<vmem>>, vector<8x384xf32>
    %c24_60 = arith.constant 24 : index
    %c384_61 = arith.constant 384 : index
    %250 = vector.load %arg10[%c24_60, %c384_61] : memref<64x768xf32, #tpu.memory_space<vmem>>, vector<8x384xf32>
    %cst_62 = arith.constant dense<0.000000e+00> : vector<8x384xf32>
    %251 = tpu.matmul %222, %7, %cst_62 {dimension_numbers = #tpu.dot_dimension_numbers<[1], [0], [0], [1], [0, 0, 1, 1], [], []>} : vector<8x128xf32>, vector<128x384xf32>, vector<8x384xf32> -> vector<8x384xf32>
    %252 = arith.addf %251, %11 : vector<8x384xf32>
    %cst_63 = arith.constant dense<0.000000e+00> : vector<8x384xf32>
    %253 = tpu.matmul %248, %8, %cst_63 {dimension_numbers = #tpu.dot_dimension_numbers<[1], [0], [0], [1], [0, 0, 1, 1], [], []>} : vector<8x128xf32>, vector<128x384xf32>, vector<8x384xf32> -> vector<8x384xf32>
    %254 = arith.addf %253, %14 : vector<8x384xf32>
    %255 = vector.extract_strided_slice %249 {offsets = [0, 0], sizes = [8, 128], strides = [1, 1]} : vector<8x384xf32> to vector<8x128xf32>
    %256 = vector.extract_strided_slice %252 {offsets = [0, 0], sizes = [8, 128], strides = [1, 1]} : vector<8x384xf32> to vector<8x128xf32>
    %257 = arith.addf %255, %256 : vector<8x128xf32>
    %258 = arith.negf %257 : vector<8x128xf32>
    %259 = math.exp %258 : vector<8x128xf32>
    %cst_64 = arith.constant 1.000000e+00 : f32
    %260 = vector.broadcast %cst_64 : f32 to vector<8x128xf32>
    %261 = arith.addf %260, %259 : vector<8x128xf32>
    %262 = arith.divf %260, %261 : vector<8x128xf32>
    %263 = vector.extract_strided_slice %249 {offsets = [0, 128], sizes = [8, 128], strides = [1, 1]} : vector<8x384xf32> to vector<8x128xf32>
    %264 = vector.extract_strided_slice %252 {offsets = [0, 128], sizes = [8, 128], strides = [1, 1]} : vector<8x384xf32> to vector<8x128xf32>
    %265 = arith.addf %263, %264 : vector<8x128xf32>
    %266 = arith.negf %265 : vector<8x128xf32>
    %267 = math.exp %266 : vector<8x128xf32>
    %cst_65 = arith.constant 1.000000e+00 : f32
    %268 = vector.broadcast %cst_65 : f32 to vector<8x128xf32>
    %269 = arith.addf %268, %267 : vector<8x128xf32>
    %270 = arith.divf %268, %269 : vector<8x128xf32>
    %271 = vector.extract_strided_slice %249 {offsets = [0, 256], sizes = [8, 128], strides = [1, 1]} : vector<8x384xf32> to vector<8x128xf32>
    %272 = vector.extract_strided_slice %252 {offsets = [0, 256], sizes = [8, 128], strides = [1, 1]} : vector<8x384xf32> to vector<8x128xf32>
    %273 = arith.mulf %262, %272 : vector<8x128xf32>
    %274 = arith.addf %271, %273 : vector<8x128xf32>
    %275 = math.tanh %274 : vector<8x128xf32>
    %cst_66 = arith.constant 1.000000e+00 : f32
    %276 = vector.broadcast %cst_66 : f32 to vector<8x128xf32>
    %277 = arith.subf %276, %270 : vector<8x128xf32>
    %278 = arith.mulf %277, %275 : vector<8x128xf32>
    %279 = arith.mulf %270, %222 : vector<8x128xf32>
    %280 = arith.addf %278, %279 : vector<8x128xf32>
    %281 = vector.extract_strided_slice %250 {offsets = [0, 0], sizes = [8, 128], strides = [1, 1]} : vector<8x384xf32> to vector<8x128xf32>
    %282 = vector.extract_strided_slice %254 {offsets = [0, 0], sizes = [8, 128], strides = [1, 1]} : vector<8x384xf32> to vector<8x128xf32>
    %283 = arith.addf %281, %282 : vector<8x128xf32>
    %284 = arith.negf %283 : vector<8x128xf32>
    %285 = math.exp %284 : vector<8x128xf32>
    %cst_67 = arith.constant 1.000000e+00 : f32
    %286 = vector.broadcast %cst_67 : f32 to vector<8x128xf32>
    %287 = arith.addf %286, %285 : vector<8x128xf32>
    %288 = arith.divf %286, %287 : vector<8x128xf32>
    %289 = vector.extract_strided_slice %250 {offsets = [0, 128], sizes = [8, 128], strides = [1, 1]} : vector<8x384xf32> to vector<8x128xf32>
    %290 = vector.extract_strided_slice %254 {offsets = [0, 128], sizes = [8, 128], strides = [1, 1]} : vector<8x384xf32> to vector<8x128xf32>
    %291 = arith.addf %289, %290 : vector<8x128xf32>
    %292 = arith.negf %291 : vector<8x128xf32>
    %293 = math.exp %292 : vector<8x128xf32>
    %cst_68 = arith.constant 1.000000e+00 : f32
    %294 = vector.broadcast %cst_68 : f32 to vector<8x128xf32>
    %295 = arith.addf %294, %293 : vector<8x128xf32>
    %296 = arith.divf %294, %295 : vector<8x128xf32>
    %297 = vector.extract_strided_slice %250 {offsets = [0, 256], sizes = [8, 128], strides = [1, 1]} : vector<8x384xf32> to vector<8x128xf32>
    %298 = vector.extract_strided_slice %254 {offsets = [0, 256], sizes = [8, 128], strides = [1, 1]} : vector<8x384xf32> to vector<8x128xf32>
    %299 = arith.mulf %288, %298 : vector<8x128xf32>
    %300 = arith.addf %297, %299 : vector<8x128xf32>
    %301 = math.tanh %300 : vector<8x128xf32>
    %cst_69 = arith.constant 1.000000e+00 : f32
    %302 = vector.broadcast %cst_69 : f32 to vector<8x128xf32>
    %303 = arith.subf %302, %296 : vector<8x128xf32>
    %304 = arith.mulf %303, %301 : vector<8x128xf32>
    %305 = arith.mulf %296, %248 : vector<8x128xf32>
    %306 = arith.addf %304, %305 : vector<8x128xf32>
    %c40_70 = arith.constant 40 : index
    %c0_71 = arith.constant 0 : index
    %307 = vector.load %arg10[%c40_70, %c0_71] : memref<64x768xf32, #tpu.memory_space<vmem>>, vector<8x384xf32>
    %c16_72 = arith.constant 16 : index
    %c384_73 = arith.constant 384 : index
    %308 = vector.load %arg10[%c16_72, %c384_73] : memref<64x768xf32, #tpu.memory_space<vmem>>, vector<8x384xf32>
    %cst_74 = arith.constant dense<0.000000e+00> : vector<8x384xf32>
    %309 = tpu.matmul %280, %7, %cst_74 {dimension_numbers = #tpu.dot_dimension_numbers<[1], [0], [0], [1], [0, 0, 1, 1], [], []>} : vector<8x128xf32>, vector<128x384xf32>, vector<8x384xf32> -> vector<8x384xf32>
    %310 = arith.addf %309, %11 : vector<8x384xf32>
    %cst_75 = arith.constant dense<0.000000e+00> : vector<8x384xf32>
    %311 = tpu.matmul %306, %8, %cst_75 {dimension_numbers = #tpu.dot_dimension_numbers<[1], [0], [0], [1], [0, 0, 1, 1], [], []>} : vector<8x128xf32>, vector<128x384xf32>, vector<8x384xf32> -> vector<8x384xf32>
    %312 = arith.addf %311, %14 : vector<8x384xf32>
    %313 = vector.extract_strided_slice %307 {offsets = [0, 0], sizes = [8, 128], strides = [1, 1]} : vector<8x384xf32> to vector<8x128xf32>
    %314 = vector.extract_strided_slice %310 {offsets = [0, 0], sizes = [8, 128], strides = [1, 1]} : vector<8x384xf32> to vector<8x128xf32>
    %315 = arith.addf %313, %314 : vector<8x128xf32>
    %316 = arith.negf %315 : vector<8x128xf32>
    %317 = math.exp %316 : vector<8x128xf32>
    %cst_76 = arith.constant 1.000000e+00 : f32
    %318 = vector.broadcast %cst_76 : f32 to vector<8x128xf32>
    %319 = arith.addf %318, %317 : vector<8x128xf32>
    %320 = arith.divf %318, %319 : vector<8x128xf32>
    %321 = vector.extract_strided_slice %307 {offsets = [0, 128], sizes = [8, 128], strides = [1, 1]} : vector<8x384xf32> to vector<8x128xf32>
    %322 = vector.extract_strided_slice %310 {offsets = [0, 128], sizes = [8, 128], strides = [1, 1]} : vector<8x384xf32> to vector<8x128xf32>
    %323 = arith.addf %321, %322 : vector<8x128xf32>
    %324 = arith.negf %323 : vector<8x128xf32>
    %325 = math.exp %324 : vector<8x128xf32>
    %cst_77 = arith.constant 1.000000e+00 : f32
    %326 = vector.broadcast %cst_77 : f32 to vector<8x128xf32>
    %327 = arith.addf %326, %325 : vector<8x128xf32>
    %328 = arith.divf %326, %327 : vector<8x128xf32>
    %329 = vector.extract_strided_slice %307 {offsets = [0, 256], sizes = [8, 128], strides = [1, 1]} : vector<8x384xf32> to vector<8x128xf32>
    %330 = vector.extract_strided_slice %310 {offsets = [0, 256], sizes = [8, 128], strides = [1, 1]} : vector<8x384xf32> to vector<8x128xf32>
    %331 = arith.mulf %320, %330 : vector<8x128xf32>
    %332 = arith.addf %329, %331 : vector<8x128xf32>
    %333 = math.tanh %332 : vector<8x128xf32>
    %cst_78 = arith.constant 1.000000e+00 : f32
    %334 = vector.broadcast %cst_78 : f32 to vector<8x128xf32>
    %335 = arith.subf %334, %328 : vector<8x128xf32>
    %336 = arith.mulf %335, %333 : vector<8x128xf32>
    %337 = arith.mulf %328, %280 : vector<8x128xf32>
    %338 = arith.addf %336, %337 : vector<8x128xf32>
    %339 = vector.extract_strided_slice %308 {offsets = [0, 0], sizes = [8, 128], strides = [1, 1]} : vector<8x384xf32> to vector<8x128xf32>
    %340 = vector.extract_strided_slice %312 {offsets = [0, 0], sizes = [8, 128], strides = [1, 1]} : vector<8x384xf32> to vector<8x128xf32>
    %341 = arith.addf %339, %340 : vector<8x128xf32>
    %342 = arith.negf %341 : vector<8x128xf32>
    %343 = math.exp %342 : vector<8x128xf32>
    %cst_79 = arith.constant 1.000000e+00 : f32
    %344 = vector.broadcast %cst_79 : f32 to vector<8x128xf32>
    %345 = arith.addf %344, %343 : vector<8x128xf32>
    %346 = arith.divf %344, %345 : vector<8x128xf32>
    %347 = vector.extract_strided_slice %308 {offsets = [0, 128], sizes = [8, 128], strides = [1, 1]} : vector<8x384xf32> to vector<8x128xf32>
    %348 = vector.extract_strided_slice %312 {offsets = [0, 128], sizes = [8, 128], strides = [1, 1]} : vector<8x384xf32> to vector<8x128xf32>
    %349 = arith.addf %347, %348 : vector<8x128xf32>
    %350 = arith.negf %349 : vector<8x128xf32>
    %351 = math.exp %350 : vector<8x128xf32>
    %cst_80 = arith.constant 1.000000e+00 : f32
    %352 = vector.broadcast %cst_80 : f32 to vector<8x128xf32>
    %353 = arith.addf %352, %351 : vector<8x128xf32>
    %354 = arith.divf %352, %353 : vector<8x128xf32>
    %355 = vector.extract_strided_slice %308 {offsets = [0, 256], sizes = [8, 128], strides = [1, 1]} : vector<8x384xf32> to vector<8x128xf32>
    %356 = vector.extract_strided_slice %312 {offsets = [0, 256], sizes = [8, 128], strides = [1, 1]} : vector<8x384xf32> to vector<8x128xf32>
    %357 = arith.mulf %346, %356 : vector<8x128xf32>
    %358 = arith.addf %355, %357 : vector<8x128xf32>
    %359 = math.tanh %358 : vector<8x128xf32>
    %cst_81 = arith.constant 1.000000e+00 : f32
    %360 = vector.broadcast %cst_81 : f32 to vector<8x128xf32>
    %361 = arith.subf %360, %354 : vector<8x128xf32>
    %362 = arith.mulf %361, %359 : vector<8x128xf32>
    %363 = arith.mulf %354, %306 : vector<8x128xf32>
    %364 = arith.addf %362, %363 : vector<8x128xf32>
    %c48_82 = arith.constant 48 : index
    %c0_83 = arith.constant 0 : index
    %365 = vector.load %arg10[%c48_82, %c0_83] : memref<64x768xf32, #tpu.memory_space<vmem>>, vector<8x384xf32>
    %c8_84 = arith.constant 8 : index
    %c384_85 = arith.constant 384 : index
    %366 = vector.load %arg10[%c8_84, %c384_85] : memref<64x768xf32, #tpu.memory_space<vmem>>, vector<8x384xf32>
    %cst_86 = arith.constant dense<0.000000e+00> : vector<8x384xf32>
    %367 = tpu.matmul %338, %7, %cst_86 {dimension_numbers = #tpu.dot_dimension_numbers<[1], [0], [0], [1], [0, 0, 1, 1], [], []>} : vector<8x128xf32>, vector<128x384xf32>, vector<8x384xf32> -> vector<8x384xf32>
    %368 = arith.addf %367, %11 : vector<8x384xf32>
    %cst_87 = arith.constant dense<0.000000e+00> : vector<8x384xf32>
    %369 = tpu.matmul %364, %8, %cst_87 {dimension_numbers = #tpu.dot_dimension_numbers<[1], [0], [0], [1], [0, 0, 1, 1], [], []>} : vector<8x128xf32>, vector<128x384xf32>, vector<8x384xf32> -> vector<8x384xf32>
    %370 = arith.addf %369, %14 : vector<8x384xf32>
    %371 = vector.extract_strided_slice %365 {offsets = [0, 0], sizes = [8, 128], strides = [1, 1]} : vector<8x384xf32> to vector<8x128xf32>
    %372 = vector.extract_strided_slice %368 {offsets = [0, 0], sizes = [8, 128], strides = [1, 1]} : vector<8x384xf32> to vector<8x128xf32>
    %373 = arith.addf %371, %372 : vector<8x128xf32>
    %374 = arith.negf %373 : vector<8x128xf32>
    %375 = math.exp %374 : vector<8x128xf32>
    %cst_88 = arith.constant 1.000000e+00 : f32
    %376 = vector.broadcast %cst_88 : f32 to vector<8x128xf32>
    %377 = arith.addf %376, %375 : vector<8x128xf32>
    %378 = arith.divf %376, %377 : vector<8x128xf32>
    %379 = vector.extract_strided_slice %365 {offsets = [0, 128], sizes = [8, 128], strides = [1, 1]} : vector<8x384xf32> to vector<8x128xf32>
    %380 = vector.extract_strided_slice %368 {offsets = [0, 128], sizes = [8, 128], strides = [1, 1]} : vector<8x384xf32> to vector<8x128xf32>
    %381 = arith.addf %379, %380 : vector<8x128xf32>
    %382 = arith.negf %381 : vector<8x128xf32>
    %383 = math.exp %382 : vector<8x128xf32>
    %cst_89 = arith.constant 1.000000e+00 : f32
    %384 = vector.broadcast %cst_89 : f32 to vector<8x128xf32>
    %385 = arith.addf %384, %383 : vector<8x128xf32>
    %386 = arith.divf %384, %385 : vector<8x128xf32>
    %387 = vector.extract_strided_slice %365 {offsets = [0, 256], sizes = [8, 128], strides = [1, 1]} : vector<8x384xf32> to vector<8x128xf32>
    %388 = vector.extract_strided_slice %368 {offsets = [0, 256], sizes = [8, 128], strides = [1, 1]} : vector<8x384xf32> to vector<8x128xf32>
    %389 = arith.mulf %378, %388 : vector<8x128xf32>
    %390 = arith.addf %387, %389 : vector<8x128xf32>
    %391 = math.tanh %390 : vector<8x128xf32>
    %cst_90 = arith.constant 1.000000e+00 : f32
    %392 = vector.broadcast %cst_90 : f32 to vector<8x128xf32>
    %393 = arith.subf %392, %386 : vector<8x128xf32>
    %394 = arith.mulf %393, %391 : vector<8x128xf32>
    %395 = arith.mulf %386, %338 : vector<8x128xf32>
    %396 = arith.addf %394, %395 : vector<8x128xf32>
    %397 = vector.extract_strided_slice %366 {offsets = [0, 0], sizes = [8, 128], strides = [1, 1]} : vector<8x384xf32> to vector<8x128xf32>
    %398 = vector.extract_strided_slice %370 {offsets = [0, 0], sizes = [8, 128], strides = [1, 1]} : vector<8x384xf32> to vector<8x128xf32>
    %399 = arith.addf %397, %398 : vector<8x128xf32>
    %400 = arith.negf %399 : vector<8x128xf32>
    %401 = math.exp %400 : vector<8x128xf32>
    %cst_91 = arith.constant 1.000000e+00 : f32
    %402 = vector.broadcast %cst_91 : f32 to vector<8x128xf32>
    %403 = arith.addf %402, %401 : vector<8x128xf32>
    %404 = arith.divf %402, %403 : vector<8x128xf32>
    %405 = vector.extract_strided_slice %366 {offsets = [0, 128], sizes = [8, 128], strides = [1, 1]} : vector<8x384xf32> to vector<8x128xf32>
    %406 = vector.extract_strided_slice %370 {offsets = [0, 128], sizes = [8, 128], strides = [1, 1]} : vector<8x384xf32> to vector<8x128xf32>
    %407 = arith.addf %405, %406 : vector<8x128xf32>
    %408 = arith.negf %407 : vector<8x128xf32>
    %409 = math.exp %408 : vector<8x128xf32>
    %cst_92 = arith.constant 1.000000e+00 : f32
    %410 = vector.broadcast %cst_92 : f32 to vector<8x128xf32>
    %411 = arith.addf %410, %409 : vector<8x128xf32>
    %412 = arith.divf %410, %411 : vector<8x128xf32>
    %413 = vector.extract_strided_slice %366 {offsets = [0, 256], sizes = [8, 128], strides = [1, 1]} : vector<8x384xf32> to vector<8x128xf32>
    %414 = vector.extract_strided_slice %370 {offsets = [0, 256], sizes = [8, 128], strides = [1, 1]} : vector<8x384xf32> to vector<8x128xf32>
    %415 = arith.mulf %404, %414 : vector<8x128xf32>
    %416 = arith.addf %413, %415 : vector<8x128xf32>
    %417 = math.tanh %416 : vector<8x128xf32>
    %cst_93 = arith.constant 1.000000e+00 : f32
    %418 = vector.broadcast %cst_93 : f32 to vector<8x128xf32>
    %419 = arith.subf %418, %412 : vector<8x128xf32>
    %420 = arith.mulf %419, %417 : vector<8x128xf32>
    %421 = arith.mulf %412, %364 : vector<8x128xf32>
    %422 = arith.addf %420, %421 : vector<8x128xf32>
    %c56_94 = arith.constant 56 : index
    %c0_95 = arith.constant 0 : index
    %423 = vector.load %arg10[%c56_94, %c0_95] : memref<64x768xf32, #tpu.memory_space<vmem>>, vector<8x384xf32>
    %c0_96 = arith.constant 0 : index
    %c384_97 = arith.constant 384 : index
    %424 = vector.load %arg10[%c0_96, %c384_97] : memref<64x768xf32, #tpu.memory_space<vmem>>, vector<8x384xf32>
    %cst_98 = arith.constant dense<0.000000e+00> : vector<8x384xf32>
    %425 = tpu.matmul %396, %7, %cst_98 {dimension_numbers = #tpu.dot_dimension_numbers<[1], [0], [0], [1], [0, 0, 1, 1], [], []>} : vector<8x128xf32>, vector<128x384xf32>, vector<8x384xf32> -> vector<8x384xf32>
    %426 = arith.addf %425, %11 : vector<8x384xf32>
    %cst_99 = arith.constant dense<0.000000e+00> : vector<8x384xf32>
    %427 = tpu.matmul %422, %8, %cst_99 {dimension_numbers = #tpu.dot_dimension_numbers<[1], [0], [0], [1], [0, 0, 1, 1], [], []>} : vector<8x128xf32>, vector<128x384xf32>, vector<8x384xf32> -> vector<8x384xf32>
    %428 = arith.addf %427, %14 : vector<8x384xf32>
    %429 = vector.extract_strided_slice %423 {offsets = [0, 0], sizes = [8, 128], strides = [1, 1]} : vector<8x384xf32> to vector<8x128xf32>
    %430 = vector.extract_strided_slice %426 {offsets = [0, 0], sizes = [8, 128], strides = [1, 1]} : vector<8x384xf32> to vector<8x128xf32>
    %431 = arith.addf %429, %430 : vector<8x128xf32>
    %432 = arith.negf %431 : vector<8x128xf32>
    %433 = math.exp %432 : vector<8x128xf32>
    %cst_100 = arith.constant 1.000000e+00 : f32
    %434 = vector.broadcast %cst_100 : f32 to vector<8x128xf32>
    %435 = arith.addf %434, %433 : vector<8x128xf32>
    %436 = arith.divf %434, %435 : vector<8x128xf32>
    %437 = vector.extract_strided_slice %423 {offsets = [0, 128], sizes = [8, 128], strides = [1, 1]} : vector<8x384xf32> to vector<8x128xf32>
    %438 = vector.extract_strided_slice %426 {offsets = [0, 128], sizes = [8, 128], strides = [1, 1]} : vector<8x384xf32> to vector<8x128xf32>
    %439 = arith.addf %437, %438 : vector<8x128xf32>
    %440 = arith.negf %439 : vector<8x128xf32>
    %441 = math.exp %440 : vector<8x128xf32>
    %cst_101 = arith.constant 1.000000e+00 : f32
    %442 = vector.broadcast %cst_101 : f32 to vector<8x128xf32>
    %443 = arith.addf %442, %441 : vector<8x128xf32>
    %444 = arith.divf %442, %443 : vector<8x128xf32>
    %445 = vector.extract_strided_slice %423 {offsets = [0, 256], sizes = [8, 128], strides = [1, 1]} : vector<8x384xf32> to vector<8x128xf32>
    %446 = vector.extract_strided_slice %426 {offsets = [0, 256], sizes = [8, 128], strides = [1, 1]} : vector<8x384xf32> to vector<8x128xf32>
    %447 = arith.mulf %436, %446 : vector<8x128xf32>
    %448 = arith.addf %445, %447 : vector<8x128xf32>
    %449 = math.tanh %448 : vector<8x128xf32>
    %cst_102 = arith.constant 1.000000e+00 : f32
    %450 = vector.broadcast %cst_102 : f32 to vector<8x128xf32>
    %451 = arith.subf %450, %444 : vector<8x128xf32>
    %452 = arith.mulf %451, %449 : vector<8x128xf32>
    %453 = arith.mulf %444, %396 : vector<8x128xf32>
    %454 = arith.addf %452, %453 : vector<8x128xf32>
    %455 = vector.extract_strided_slice %424 {offsets = [0, 0], sizes = [8, 128], strides = [1, 1]} : vector<8x384xf32> to vector<8x128xf32>
    %456 = vector.extract_strided_slice %428 {offsets = [0, 0], sizes = [8, 128], strides = [1, 1]} : vector<8x384xf32> to vector<8x128xf32>
    %457 = arith.addf %455, %456 : vector<8x128xf32>
    %458 = arith.negf %457 : vector<8x128xf32>
    %459 = math.exp %458 : vector<8x128xf32>
    %cst_103 = arith.constant 1.000000e+00 : f32
    %460 = vector.broadcast %cst_103 : f32 to vector<8x128xf32>
    %461 = arith.addf %460, %459 : vector<8x128xf32>
    %462 = arith.divf %460, %461 : vector<8x128xf32>
    %463 = vector.extract_strided_slice %424 {offsets = [0, 128], sizes = [8, 128], strides = [1, 1]} : vector<8x384xf32> to vector<8x128xf32>
    %464 = vector.extract_strided_slice %428 {offsets = [0, 128], sizes = [8, 128], strides = [1, 1]} : vector<8x384xf32> to vector<8x128xf32>
    %465 = arith.addf %463, %464 : vector<8x128xf32>
    %466 = arith.negf %465 : vector<8x128xf32>
    %467 = math.exp %466 : vector<8x128xf32>
    %cst_104 = arith.constant 1.000000e+00 : f32
    %468 = vector.broadcast %cst_104 : f32 to vector<8x128xf32>
    %469 = arith.addf %468, %467 : vector<8x128xf32>
    %470 = arith.divf %468, %469 : vector<8x128xf32>
    %471 = vector.extract_strided_slice %424 {offsets = [0, 256], sizes = [8, 128], strides = [1, 1]} : vector<8x384xf32> to vector<8x128xf32>
    %472 = vector.extract_strided_slice %428 {offsets = [0, 256], sizes = [8, 128], strides = [1, 1]} : vector<8x384xf32> to vector<8x128xf32>
    %473 = arith.mulf %462, %472 : vector<8x128xf32>
    %474 = arith.addf %471, %473 : vector<8x128xf32>
    %475 = math.tanh %474 : vector<8x128xf32>
    %cst_105 = arith.constant 1.000000e+00 : f32
    %476 = vector.broadcast %cst_105 : f32 to vector<8x128xf32>
    %477 = arith.subf %476, %470 : vector<8x128xf32>
    %478 = arith.mulf %477, %475 : vector<8x128xf32>
    %479 = arith.mulf %470, %422 : vector<8x128xf32>
    %480 = arith.addf %478, %479 : vector<8x128xf32>
    %481 = tpu.concatenate %454, %480 in 1 : vector<8x128xf32>, vector<8x128xf32> -> vector<8x256xf32>
    %c0_106 = arith.constant 0 : index
    %c0_107 = arith.constant 0 : index
    %482 = vector.load %arg9[%c0_106, %c0_107] : memref<8x256xf32, #tpu.memory_space<vmem>>, vector<8x256xf32>
    tpu.vector_store %arg9[%c0_106, %c0_107], %481 {strides = array<i32>} : memref<8x256xf32, #tpu.memory_space<vmem>>, vector<8x256xf32>,
    return
  }
  func.func @transform_0(%arg0: i32) -> (i32, i32) {
    %c0_i32 = arith.constant 0 : i32
    %c0_i32_0 = arith.constant 0 : i32
    return %arg0, %c0_i32 : i32, i32
  }
  func.func @transform_1(%arg0: i32) -> (i32, i32) {
    %c0_i32 = arith.constant 0 : i32
    %c0_i32_0 = arith.constant 0 : i32
    %c0_i32_1 = arith.constant 0 : i32
    return %c0_i32, %c0_i32_0 : i32, i32
  }
  func.func @transform_2(%arg0: i32) -> (i32, i32) {
    %c0_i32 = arith.constant 0 : i32
    %c0_i32_0 = arith.constant 0 : i32
    %c0_i32_1 = arith.constant 0 : i32
    return %c0_i32, %c0_i32_0 : i32, i32
  }
  func.func @transform_3(%arg0: i32) -> (i32, i32) {
    %c0_i32 = arith.constant 0 : i32
    %c0_i32_0 = arith.constant 0 : i32
    %c0_i32_1 = arith.constant 0 : i32
    return %c0_i32, %c0_i32_0 : i32, i32
  }
  func.func @transform_4(%arg0: i32) -> (i32, i32) {
    %c0_i32 = arith.constant 0 : i32
    %c0_i32_0 = arith.constant 0 : i32
    %c0_i32_1 = arith.constant 0 : i32
    return %c0_i32, %c0_i32_0 : i32, i32
  }
  func.func @transform_5(%arg0: i32) -> (i32, i32) {
    %c0_i32 = arith.constant 0 : i32
    %c0_i32_0 = arith.constant 0 : i32
    %c0_i32_1 = arith.constant 0 : i32
    return %c0_i32, %c0_i32_0 : i32, i32
  }
  func.func @transform_6(%arg0: i32) -> (i32, i32) {
    %c0_i32 = arith.constant 0 : i32
    %c0_i32_0 = arith.constant 0 : i32
    %c0_i32_1 = arith.constant 0 : i32
    return %c0_i32, %c0_i32_0 : i32, i32
  }
  func.func @transform_7(%arg0: i32) -> (i32, i32) {
    %c0_i32 = arith.constant 0 : i32
    %c0_i32_0 = arith.constant 0 : i32
    return %arg0, %c0_i32 : i32, i32
  }
  func.func @transform_8(%arg0: i32) -> (i32, i32) {
    %c0_i32 = arith.constant 0 : i32
    %c0_i32_0 = arith.constant 0 : i32
    return %arg0, %c0_i32 : i32, i32
  }
}

</mosaic_0001>

<bundles_post_ra>
// kernel: tpu_custom_call.1
= control target key start
LH: loop header
LB: loop body
LE: loop exit
PB: predicated region body
PF: predicated region fallthrough
CT: control target
= control target key end

     0   :  { %13 = vsyncpa [#allocation4], 0  ;;  %s8445_s0 = inlined_call_operand.vmem [shape: f32[128,300], index: 0, kind: input, shape index: {}]   ;;  %s8446_s1 = inlined_call_operand.hbm [shape: f32[300,768], index: 1, kind: input, shape index: {}]   ;;  %s8447_s2 = inlined_call_operand.vmem [shape: f32[1,768], index: 2, kind: input, shape index: {}]   ;;  %s8448_s3 = inlined_call_operand.vmem [shape: f32[128,384], index: 3, kind: input, shape index: {}]   ;;  %s8449_s4 = inlined_call_operand.vmem [shape: f32[1,384], index: 4, kind: input, shape index: {}]   ;;  %s8450_s5 = inlined_call_operand.hbm [shape: f32[128,384], index: 5, kind: input, shape index: {}]   ;;  %s8451_s6 = inlined_call_operand.vmem [shape: f32[1,384], index: 6, kind: input, shape index: {}]   ;;  %s8452_s7 = inlined_call_operand.vmem [shape: f32[16,256], index: 7, kind: input, shape index: {}]   ;;  %s8453_s8 = inlined_call_operand.hbm [shape: f32[16,256], index: 8, kind: output, shape index: {}]  }
   0x1   :  { %14 = vsyncpa [#allocation7], 0 }
   0x2   :  { %15 = vsyncpa [#allocation5], 0 }
   0x3   :  { %17 = vsyncpa [#allocation5 + $0x1], 0  ;;  %s6888_s27 = smov 0   ;;  %s6890_s28 = smov 0  }
   0x4   :  { %s6892_s29 = smov 0   ;;  %s6894_s30 = smov 0  }
   0x5 LB: > { %8516 = sst [smem:[#allocation12_spill]] %s6826_s29  ;;  %s6909_s9 = sadd.s32 4294967295, %s6830_s30   ;;  %s6830_s30 = sphi %s6894_s30, %s8720_s30   ;;  %s6826_s29 = sphi %s6892_s29, %s8717_s29   ;;  %s6822_s28 = sphi %s6890_s28, %s8719_s28   ;;  %s6818_s27 = sphi %s6888_s27, %s8718_s27  }
   0x6   : > { %s4295_s10 = sadd.s32 4294967294, %s6830_s30   ;;  %s6913_s11 = sadd.s32 1, %s6830_s30  }
   0x7   : > { %s208_s12 = sadd.s32 1, %s6826_s29  ;;  %s205_s13 = ssub.s32 %s6830_s30, %s6913_s11 }
   0x8   : > { %p218_p0 = scmp.ne.s32.totalorder %s6826_s29, %s6822_s28  ;;  %p206_p1 = scmp.eq.s32.totalorder %s205_s13, 0 }
   0x9   : > { %p219_p2 = scmp.eq.s32.totalorder %s6909_s9, 1  ;;  %p224_p3 = scmp.ne.s32.totalorder %s6822_s28, %s6818_s27 }
   0xa   : > { %p225_p4 = scmp.eq.s32.totalorder %s4295_s10, 1  ;;  %p4296_p7 = scmp.ge.s32.totalorder %s6830_s30, 1 }
   0xb   : > { %s6924_s14 = scalar_select %p206_p1, %s6826_s29, %s208_s12  }
   0xc   : > { %p6926_p5 = por %p219_p2, %p218_p0  ;;  %p6930_p6 = por %p225_p4, %p224_p3 }
   0xd   : > { %8517 = sst [smem:[#allocation13_spill]] %s6924_s14  ;;  %p232_p8 = scmp.lt.s32.totalorder %s6830_s30, 3 }
   0xe   : > { %s8518_s15 = scalar_select %p6926_p5, 1, 0 }
   0xf   : > { %s8519_s16 = scalar_select %p6930_p6, 1, 0 }
  0x10   : > { %p8454_p9 = scmp.eq.s32.totalorder %s6909_s9, 0  ;;  %p6937_p10 = pnand %p4296_p7, %p232_p8 }
  0x11   : > { %s6832_s18 = smov [#allocation3]   ;;  %s6833_s21 = smov [#allocation6]  }
  0x12   : > { %s8520_s17 = scalar_select %p6937_p10, 1, 0 }
  0x13   : > { %s244_s19 = sshll.u32 %s6832_s18, 4  ;;  %p6478_p11 = pneg %p6937_p10  ;;  %s245_s19 = int_to_ptr.vmem [resolvable:$true] %s244_s19 }
  0x14   : > { %s266_s22 = sshll.u32 %s6833_s21, 4  ;;  %s6704_s25 = scalar_lea.hbm %s8446_s1, 29184  ;;  %s6949_s22 = int_to_ptr.vmem [resolvable:$true] %s266_s22 }
  0x15   : > { %p6945_p12 = pnand %p8454_p9, %p6478_p11  ;;  %p6705_p13 = scmp.ne.s32.totalorder %s8446_s1, %s6704_s25 }
  0x16   : > { %p6711_p3 = scmp.lt.u32.totalorder %s6704_s25, %s8446_s1 }
  0x17   : > { %p6706_p0 = pneg %p6945_p12 }
  0x19   : > { %p6707_p1 = pnand %p6706_p0, %p6705_p13 }
  0x1b   : > { %p6708_p2 = pneg %p6707_p1 }
  0x1d   : > { %p6713_p4 = pnand %p6711_p3, %p6708_p2 }
  0x1f   : > { %6716 = shalt.err (!%p6713_p4)
}
  0x20   : > { %s6717_s18 = scalar_lea.vmem %s245_s19, 29184  ;;  %p6725_p9 = scmp.lt.s32.totalorder %s245_s19, %s245_s19 }
  0x21   : > { %p6718_p7 = scmp.ne.s32.totalorder %s245_s19, %s6717_s18  ;;  %p6726_p6 = scmp.lt.s32.totalorder %s6717_s18, %s6717_s18 }
  0x23   : > { %p6720_p8 = pnand %p6718_p7, %p6706_p0  ;;  %p6727_p5 = por %p6726_p6, %p6725_p9 }
  0x25   : > { %p6721_p11 = pneg %p6720_p8 }
  0x27   : > { %p6728_p10 = pnand %p6727_p5, %p6721_p11 }
  0x29   : > { %6731 = shalt.err (!%p6728_p10)
}
  0x2a   : > { %s6834_s21 = smov 768   ;;  %s6835_s23 = smov 48  }
  0x2b   : > { %6481 = dma.hbm_to_vmem [thread:$0]  (!%p6945_p12), %s8446_s1, 29184, %s245_s19, [#allocation4], %s6834_s21, %s6834_s21, %s6835_s23  }
  0x2c   : > { %s6732_s12 = scalar_lea.hbm %s8450_s5, 6144 }
  0x2d   : > { %p6733_p13 = scmp.ne.s32.totalorder %s8450_s5, %s6732_s12  ;;  %p6739_p9 = scmp.lt.u32.totalorder %s6732_s12, %s8450_s5 }
  0x2f   : > { %p6735_p5 = pnand %p6733_p13, %p6706_p0 }
  0x31   : > { %p6736_p6 = pneg %p6735_p5 }
  0x33   : > { %p6741_p10 = pnand %p6739_p9, %p6736_p6 }
  0x35   : > { %6744 = shalt.err (!%p6741_p10)
}
  0x36   : > { %s6745_s19 = scalar_lea.vmem %s6949_s22, 6144  ;;  %p6753_p4 = scmp.lt.s32.totalorder %s6949_s22, %s6949_s22 }
  0x37   : > { %p6746_p1 = scmp.ne.s32.totalorder %s6949_s22, %s6745_s19  ;;  %p6754_p7 = scmp.lt.s32.totalorder %s6745_s19, %s6745_s19 }
  0x39   : > { %p6748_p2 = pnand %p6746_p1, %p6706_p0  ;;  %p6755_p8 = por %p6754_p7, %p6753_p4 }
  0x3b   : > { %p6749_p3 = pneg %p6748_p2 }
  0x3d   : > { %p6756_p11 = pnand %p6755_p8, %p6749_p3 }
  0x3f   : > { %6759 = shalt.err (!%p6756_p11)
}
  0x40   : > { %s6836_s29 = smov 384   ;;  %s6837_s14 = smov 24  }
  0x41   : > { %6484 = dma.hbm_to_vmem [thread:$0]  (!%p6945_p12), %s8450_s5, 6144, %s6949_s22, [#allocation7], %s6836_s29, %s6836_s29, %s6837_s14  }
  0x42   : > { %p8522_p13 = scmp.ne.s32.totalorder %s8520_s17, 0 }
  0x44   : > { %303 = sbr.rel (%p8522_p13) target bundleno = 2409 (0x969), region = 52 }
  0x4b   : > { %p8523_p0 = scmp.eq.s32.totalorder %s6909_s9, 0 }
  0x4d   : > { %6805 = dma.done.wait (%p8523_p0), [#allocation4], 29184   ;;  %p8524_p5 = pmov %p8523_p0 }
  0x4e   : > { %p8525_p6 = pmov %p8523_p0 }
  0x4f   : > { %6807 = vsyncadd (%p8524_p5), [#allocation4], 4294938112 }
  0x50   : > { %6809 = dma.done.wait (%p8525_p6), [#allocation7], 6144   ;;  %p8526_p9 = pmov %p8523_p0 }
  0x51   : > { %v8458_v0 = vmov 0.0   ;;  %s4304_s20 = sshll.u32 %s6909_s9, 3  ;;  %vm668_vm0 = vcmask 1043456   ;;  %vm6839_vm1 = vmmov 1   ;;  %v384_v2 = vld [vmem:[#allocation3 + $0x8] sm:$0xff]  ;;  %v390_v3 = vld [vmem:[#allocation3 + $0x38] sm:$0xff] }
  0x52   : > { %6811 = vsyncadd (%p8526_p9), [#allocation7], 4294961152  ;;  %864 = vmatprep.mubr.f32.mxu1 %v8458_v0  ;;  %p348_p12 = scmp.lt.s32.totalorder %s4304_s20, 15  ;;  %v576_v4 = vld [vmem:[#allocation3 + $0x608] sm:$0xff]  ;;  %v5209_v5 = vpack.c.bf16 %v390_v3, %v384_v2  ;;  %v582_v6 = vld [vmem:[#allocation3 + $0x638] sm:$0xff]  ;;  %vm643_vm3 = vcmask 359424  }
  0x53   : > { %vm7010_vm2 = vmpackc.low %vm668_vm0, %vm6839_vm1  ;;  %v383_v7 = vld [vmem:[#allocation3] sm:$0xff]  ;;  %v389_v8 = vld [vmem:[#allocation3 + $0x30] sm:$0xff]  ;;  %v5273_v9 = vpack.c.bf16 %v582_v6, %v576_v4  ;;  %p354_p10 = scmp.lt.s32.totalorder %s6909_s9, 1  ;;  %vm6841_vm4 = vmmov 0   ;;  %s344_s23 = sand.u32 1, %s6822_s28  }
  0x54   : > { %s8722_s20 = smov (!%p348_p12, %s4304_s20), 15  ;;  %v5211_v10 = vpack.c.bf16 %v389_v8, %v383_v7  ;;  %v575_v11 = vld [vmem:[#allocation3 + $0x600] sm:$0xff]  ;;  %v581_v12 = vld [vmem:[#allocation3 + $0x630] sm:$0xff]  ;;  %v396_v13 = vld [vmem:[#allocation3 + $0x68] sm:$0xff]  ;;  %5210 = vmatprep.subr.bf16.mxu0 %v5209_v5  ;;  %s4376_s24 = sshll.u32 %s6909_s9, 8 }
  0x55   : > { %v5275_v14 = vpack.c.bf16 %v581_v12, %v575_v11  ;;  %v402_v15 = vld [vmem:[#allocation3 + $0x98] sm:$0xff]  ;;  %v588_v16 = vld [vmem:[#allocation3 + $0x668] sm:$0xff]  ;;  %5274 = vmatprep.subr.bf16.mxu1 %v5273_v9  ;;  %v395_v20 = vld [vmem:[#allocation3 + $0x60] sm:$0xff]  ;;  %s6467_s17 = smul.u32 24, %s8722_s20  ;;  %s4303_s20 = sshll.u32 %s344_s23, 4 }
  0x56   : > { %v594_v17 = vld [vmem:[#allocation3 + $0x698] sm:$0xff]  ;;  %5212 = vmatpush1.bf16.msra.mxu0 %v5211_v10  ;;  %v5213_v18 = vpack.c.bf16 %v402_v15, %v396_v13  ;;  %v401_v21 = vld [vmem:[#allocation3 + $0x90] sm:$0xff]  ;;  %v587_v22 = vld [vmem:[#allocation3 + $0x660] sm:$0xff]  ;;  %s7244_s26 = scalar_select %p354_p10, %s6909_s9, 1 }
  0x57   : > { %v5277_v19 = vpack.c.bf16 %v594_v17, %v588_v16  ;;  %5276 = vmatpush1.bf16.msra.mxu1 %v5275_v14  ;;  %v5215_v23 = vpack.c.bf16 %v401_v21, %v395_v20  ;;  %v593_v24 = vld [vmem:[#allocation3 + $0x690] sm:$0xff]  ;;  %v408_v25 = vld [vmem:[#allocation3 + $0xc8] sm:$0xff]  ;;  %v414_v26 = vld [vmem:[#allocation3 + $0xf8] sm:$0xff]  ;;  %s7020_s25 = scalar_lea.vmem %s8445_s0, %s6467_s17  ;;  %s346_s17 = scalar_lea.vmem [#allocation8], %s4303_s20 }
  0x58   : > { %5214 = vmatprep.subr.bf16.mxu0 %v5213_v18  ;;  %v5279_v27 = vpack.c.bf16 %v593_v24, %v587_v22  ;;  %v5217_v28 = vpack.c.bf16 %v414_v26, %v408_v25  ;;  %v600_v29 = vld [vmem:[#allocation3 + $0x6c8] sm:$0xff]  ;;  %v606_v30 = vld [vmem:[#allocation3 + $0x6f8] sm:$0xf]  ;;  %v407_v31 = vld [vmem:[#allocation3 + $0xc0] sm:$0xff]  ;;  %s4375_s19 = sshll.u32 %s7244_s26, 4  ;;  %s4202_s26 = sshll.u32 %s346_s17, 4  ;;  %s8403_s26 = int_to_ptr.vmem [resolvable:$true] %s4202_s26 }
  0x59   : > { %5278 = vmatprep.subr.bf16.mxu1 %v5277_v19  ;;  %v5281_v32 = vpack.c.bf16 %v606_v30, %v600_v29  ;;  %v413_v33 = vld [vmem:[#allocation3 + $0xf0] sm:$0xff]  ;;  %v599_v34 = vld [vmem:[#allocation3 + $0x6c0] sm:$0xff]  ;;  %v420_v37 = vld [vmem:[#allocation3 + $0x128] sm:$0xff]  ;;  %s7281_s22 = scalar_lea.vmem %s8452_s7, %s4375_s19  ;;  %s8401_s13 = scalar_lea.hbm %s8453_s8, %s4376_s24 }
  0x5a   : > { %v605_v35 = vld [vmem:[#allocation3 + $0x6f0] sm:$0xf]  ;;  %5216 = vmatpush1.bf16.msra.mxu0 %v5215_v23  ;;  %v5219_v36 = vpack.c.bf16 %v413_v33, %v407_v31  ;;  %v426_v38 = vld [vmem:[#allocation3 + $0x158] sm:$0xff]  ;;  %v392_v42 = vld [vmem:[#allocation3 + $0x48] sm:$0xff]  ;;  %s4188_s18 = scalar_lea.sflag [#allocation5], %s344_s23  ;;  %p8714_p2 = scmp.ne.s32.totalorder %s8518_s15, 0 }
  0x5b   : > { %v386_v39 = vld [vmem:[#allocation3 + $0x18] sm:$0xff]  ;;  %5280 = vmatpush1.bf16.msra.mxu1 %v5279_v27  ;;  %5218 = vmatprep.subr.bf16.mxu0 %v5217_v28  ;;  %v5284_v40 = vpack.c.bf16 %v605_v35, %v599_v34  ;;  %v5221_v41 = vpack.c.bf16 %v426_v38, %v420_v37  ;;  %v419_v43 = vld [vmem:[#allocation3 + $0x120] sm:$0xff]  ;;  %v425_v44 = vld [vmem:[#allocation3 + $0x150] sm:$0xff]  ;;  %s6842_s9 = smov [#allocation8]  }
  0x5c   : > { %5283 = vmatprep.subr.msk.bf16.mxu1 %vm7010_vm2, %v5281_v32  ;;  %v5287_v45 = vpack.c.bf16 %v392_v42, %v386_v39  ;;  %v385_v46 = vld [vmem:[#allocation3 + $0x10] sm:$0xff]  ;;  %v391_v47 = vld [vmem:[#allocation3 + $0x40] sm:$0xff]  ;;  %v432_v48 = vld [vmem:[#allocation3 + $0x188] sm:$0xff]  ;;  %v5223_v51 = vpack.c.bf16 %v425_v44, %v419_v43  ;;  %s6764_s19 = sshll.u32 %s6842_s9, 4  ;;  %s6765_s19 = int_to_ptr.vmem [resolvable:$false] %s6764_s19 }
  0x5d   : > { %v438_v49 = vld [vmem:[#allocation3 + $0x1b8] sm:$0xff]  ;;  %v7025_v52 = vld [vmem:[%s7020_s25 + $0x10] sm:$0xff]  ;;  %v404_v53 = vld [vmem:[#allocation3 + $0xa8] sm:$0xff]  ;;  %v5289_v54 = vpack.c.bf16 %v391_v47, %v385_v46  ;;  %s6766_s29 = scalar_lea.vmem %s6765_s19, 512  ;;  %p6767_p7 = scmp.lt.s32.totalorder %s8403_s26, %s6765_s19 }
  0x5e   : > { %v398_v50 = vld [vmem:[#allocation3 + $0x78] sm:$0xff]  ;;  %5220 = vmatpush1.bf16.msra.mxu0 %v5219_v36  ;;  %v5225_v55 = vpack.c.bf16 %v438_v49, %v432_v48  ;;  %v431_v56 = vld [vmem:[#allocation3 + $0x180] sm:$0xff]  ;;  %v437_v57 = vld [vmem:[#allocation3 + $0x1b0] sm:$0xff] }
  0x5f   : > { %5286 = vmatpush1.bf16.msk.msra.mxu1 %vm7010_vm2, %v5284_v40  ;;  %5222 = vmatprep.subr.bf16.mxu0 %v5221_v41  ;;  %v397_v58 = vld [vmem:[#allocation3 + $0x70] sm:$0xff]  ;;  %v5291_v59 = vpack.c.bf16 %v404_v53, %v398_v50  ;;  %v403_v60 = vld [vmem:[#allocation3 + $0xa0] sm:$0xff]  ;;  %v444_v61 = vld [vmem:[#allocation3 + $0x1e8] sm:$0xff]  ;;  %v5227_v3 = vpack.c.bf16 %v437_v57, %v431_v56 }
  0x60   : > { %5288 = vmatprep.subr.bf16.mxu1 %v5287_v45  ;;  %v450_v62 = vld [vmem:[#allocation3 + $0x218] sm:$0xff]  ;;  %v416_v2 = vld [vmem:[#allocation3 + $0x108] sm:$0xff]  ;;  %v5293_v4 = vpack.c.bf16 %v403_v60, %v397_v58  ;;  %v443_v6 = vld [vmem:[#allocation3 + $0x1e0] sm:$0xff] }
  0x61   : > { %v410_v63 = vld [vmem:[#allocation3 + $0xd8] sm:$0xff]  ;;  %v5229_v5 = vpack.c.bf16 %v450_v62, %v444_v61  ;;  %v449_v7 = vld [vmem:[#allocation3 + $0x210] sm:$0xff]  ;;  %v415_v10 = vld [vmem:[#allocation3 + $0x100] sm:$0xff] }
  0x62   : > { %5224 = vmatpush1.bf16.msra.mxu0 %v5223_v51  ;;  %4310 = vmatmul.mubr.msk.f32.vlgmr.msra.gmra.mrb[0].mxu1 %vm643_vm3, %v7025_v52  ;;  %v409_v8 = vld [vmem:[#allocation3 + $0xd0] sm:$0xff]  ;;  %v5295_v9 = vpack.c.bf16 %v416_v2, %v410_v63  ;;  %v456_v11 = vld [vmem:[#allocation3 + $0x248] sm:$0xff]  ;;  %v462_v12 = vld [vmem:[#allocation3 + $0x278] sm:$0xff]  ;;  %v5231_v15 = vpack.c.bf16 %v449_v7, %v443_v6 }
  0x63   : > { %5290 = vmatpush1.bf16.msra.mxu1 %v5289_v54  ;;  %5226 = vmatprep.subr.bf16.mxu0 %v5225_v55  ;;  %v422_v13 = vld [vmem:[#allocation3 + $0x138] sm:$0xff]  ;;  %v428_v14 = vld [vmem:[#allocation3 + $0x168] sm:$0xff]  ;;  %v5297_v16 = vpack.c.bf16 %v415_v10, %v409_v8  ;;  %v5233_v17 = vpack.c.bf16 %v462_v12, %v456_v11  ;;  %v455_v18 = vld [vmem:[#allocation3 + $0x240] sm:$0xff] }
  0x64   : > { %5292 = vmatprep.subr.bf16.mxu1 %v5291_v59  ;;  %870 = vmatprep.mubr.f32.mxu1 %v8458_v0  ;;  %v461_v19 = vld [vmem:[#allocation3 + $0x270] sm:$0xff]  ;;  %v5299_v21 = vpack.c.bf16 %v428_v14, %v422_v13  ;;  %v427_v22 = vld [vmem:[#allocation3 + $0x160] sm:$0xff]  ;;  %v468_v23 = vld [vmem:[#allocation3 + $0x2a8] sm:$0xff] }
  0x65   : > { %v421_v20 = vld [vmem:[#allocation3 + $0x130] sm:$0xff]  ;;  %v474_v24 = vld [vmem:[#allocation3 + $0x2d8] sm:$0xff]  ;;  %v440_v26 = vld [vmem:[#allocation3 + $0x1c8] sm:$0xff]  ;;  %v5235_v27 = vpack.c.bf16 %v461_v19, %v455_v18 }
  0x66   : > { %5228 = vmatpush1.bf16.msra.mxu0 %v5227_v3  ;;  %v434_v25 = vld [vmem:[#allocation3 + $0x198] sm:$0xff]  ;;  %v5301_v28 = vpack.c.bf16 %v427_v22, %v421_v20  ;;  %v5237_v29 = vpack.c.bf16 %v474_v24, %v468_v23  ;;  %v467_v30 = vld [vmem:[#allocation3 + $0x2a0] sm:$0xff]  ;;  %v473_v31 = vld [vmem:[#allocation3 + $0x2d0] sm:$0xff] }
  0x67   : > { %5294 = vmatpush1.bf16.msra.mxu1 %v5293_v4  ;;  %5230 = vmatprep.subr.bf16.mxu0 %v5229_v5  ;;  %v433_v32 = vld [vmem:[#allocation3 + $0x190] sm:$0xff]  ;;  %v5303_v33 = vpack.c.bf16 %v440_v26, %v434_v25  ;;  %v439_v34 = vld [vmem:[#allocation3 + $0x1c0] sm:$0xff]  ;;  %v480_v35 = vld [vmem:[#allocation3 + $0x308] sm:$0xff]  ;;  %v5239_v39 = vpack.c.bf16 %v473_v31, %v467_v30 }
  0x68   : > { %5296 = vmatprep.subr.bf16.mxu1 %v5295_v9  ;;  %v486_v36 = vld [vmem:[#allocation3 + $0x338] sm:$0xff]  ;;  %v452_v38 = vld [vmem:[#allocation3 + $0x228] sm:$0xff]  ;;  %v5305_v40 = vpack.c.bf16 %v439_v34, %v433_v32  ;;  %v479_v42 = vld [vmem:[#allocation3 + $0x300] sm:$0xff] }
  0x69   : > { %v446_v37 = vld [vmem:[#allocation3 + $0x1f8] sm:$0xff]  ;;  %v5241_v41 = vpack.c.bf16 %v486_v36, %v480_v35  ;;  %v485_v43 = vld [vmem:[#allocation3 + $0x330] sm:$0xff]  ;;  %v451_v46 = vld [vmem:[#allocation3 + $0x220] sm:$0xff] }
  0x6a   : > { %5232 = vmatpush1.bf16.msra.mxu0 %v5231_v15  ;;  %v445_v44 = vld [vmem:[#allocation3 + $0x1f0] sm:$0xff]  ;;  %v5307_v45 = vpack.c.bf16 %v452_v38, %v446_v37  ;;  %v492_v47 = vld [vmem:[#allocation3 + $0x368] sm:$0xff]  ;;  %v498_v48 = vld [vmem:[#allocation3 + $0x398] sm:$0xff]  ;;  %v5243_v51 = vpack.c.bf16 %v485_v43, %v479_v42 }
  0x6b   : > { %5298 = vmatpush1.bf16.msra.mxu1 %v5297_v16  ;;  %5234 = vmatprep.subr.bf16.mxu0 %v5233_v17  ;;  %v458_v49 = vld [vmem:[#allocation3 + $0x258] sm:$0xff]  ;;  %v464_v50 = vld [vmem:[#allocation3 + $0x288] sm:$0xff]  ;;  %v491_v53 = vld [vmem:[#allocation3 + $0x360] sm:$0xff]  ;;  %v5309_v54 = vpack.c.bf16 %v451_v46, %v445_v44  ;;  %v5245_v55 = vpack.c.bf16 %v498_v48, %v492_v47 }
  0x6c   : > { %5300 = vmatprep.subr.bf16.mxu1 %v5299_v21  ;;  %v497_v56 = vld [vmem:[#allocation3 + $0x390] sm:$0xff]  ;;  %v7033_v58 = vld [vmem:[%s7020_s25 + $0x28] sm:$0xff]  ;;  %v5311_v59 = vpack.c.bf16 %v464_v50, %v458_v49  ;;  %v463_v60 = vld [vmem:[#allocation3 + $0x280] sm:$0xff] }
  0x6d   : > { %v457_v57 = vld [vmem:[#allocation3 + $0x250] sm:$0xff]  ;;  %v504_v61 = vld [vmem:[#allocation3 + $0x3c8] sm:$0xff]  ;;  %v510_v62 = vld [vmem:[#allocation3 + $0x3f8] sm:$0xff]  ;;  %4311 = vmatmul.mubr.msk.f32.gmra.mrb[2].mxu1 %vm643_vm3, %v7033_v58  ;;  %v5247_v3 = vpack.c.bf16 %v497_v56, %v491_v53 }
  0x6e   : > { %5236 = vmatpush1.bf16.msra.mxu0 %v5235_v27  ;;  %v470_v63 = vld [vmem:[#allocation3 + $0x2b8] sm:$0xff]  ;;  %v476_v2 = vld [vmem:[#allocation3 + $0x2e8] sm:$0xff]  ;;  %876 = vmatprep.mubr.f32.mxu1 %v8458_v0  ;;  %v7039_v4 = vld [vmem:[%s7020_s25 + $0x40] sm:$0xff]  ;;  %v5313_v5 = vpack.c.bf16 %v463_v60, %v457_v57  ;;  %v5249_v6 = vpack.c.bf16 %v510_v62, %v504_v61 }
  0x6f   : > { %5302 = vmatpush1.bf16.msra.mxu1 %v5301_v28  ;;  %5238 = vmatprep.subr.bf16.mxu0 %v5237_v29  ;;  %v503_v7 = vld [vmem:[#allocation3 + $0x3c0] sm:$0xff]  ;;  %v509_v8 = vld [vmem:[#allocation3 + $0x3f0] sm:$0xff]  ;;  %v5315_v10 = vpack.c.bf16 %v476_v2, %v470_v63  ;;  %v516_v12 = vld [vmem:[#allocation3 + $0x428] sm:$0xff] }
  0x70   : > { %5304 = vmatprep.subr.bf16.mxu1 %v5303_v33  ;;  %v469_v9 = vld [vmem:[#allocation3 + $0x2b0] sm:$0xff]  ;;  %v475_v11 = vld [vmem:[#allocation3 + $0x2e0] sm:$0xff]  ;;  %v522_v13 = vld [vmem:[#allocation3 + $0x458] sm:$0xff]  ;;  %v5251_v17 = vpack.c.bf16 %v509_v8, %v503_v7 }
  0x71   : > { %4312 = vmatmul.mubr.msk.f32.gmra.mrb[4].mxu1 %vm643_vm3, %v7039_v4  ;;  %v482_v14 = vld [vmem:[#allocation3 + $0x318] sm:$0xff]  ;;  %v488_v15 = vld [vmem:[#allocation3 + $0x348] sm:$0xff]  ;;  %v5317_v18 = vpack.c.bf16 %v475_v11, %v469_v9  ;;  %v5253_v19 = vpack.c.bf16 %v522_v13, %v516_v12  ;;  %v515_v20 = vld [vmem:[#allocation3 + $0x420] sm:$0xff] }
  0x72   : > { %5240 = vmatpush1.bf16.msra.mxu0 %v5239_v39  ;;  %882 = vmatprep.mubr.f32.mxu1 %v8458_v0  ;;  %v7045_v16 = vld [vmem:[%s7020_s25 + $0x58] sm:$0xff]  ;;  %v521_v21 = vld [vmem:[#allocation3 + $0x450] sm:$0xff]  ;;  %v5319_v23 = vpack.c.bf16 %v488_v15, %v482_v14  ;;  %v487_v24 = vld [vmem:[#allocation3 + $0x340] sm:$0xff] }
  0x73   : > { %5306 = vmatpush1.bf16.msra.mxu1 %v5305_v40  ;;  %5242 = vmatprep.subr.bf16.mxu0 %v5241_v41  ;;  %v481_v22 = vld [vmem:[#allocation3 + $0x310] sm:$0xff]  ;;  %v528_v25 = vld [vmem:[#allocation3 + $0x488] sm:$0xff]  ;;  %v534_v26 = vld [vmem:[#allocation3 + $0x4b8] sm:$0xff]  ;;  %v5255_v30 = vpack.c.bf16 %v521_v21, %v515_v20 }
  0x74   : > { %5308 = vmatprep.subr.bf16.mxu1 %v5307_v45  ;;  %v494_v27 = vld [vmem:[#allocation3 + $0x378] sm:$0xff]  ;;  %v500_v28 = vld [vmem:[#allocation3 + $0x3a8] sm:$0xff]  ;;  %v7051_v29 = vld [vmem:[%s7020_s25 + $0x70] sm:$0xff]  ;;  %v5321_v32 = vpack.c.bf16 %v487_v24, %v481_v22  ;;  %v5257_v33 = vpack.c.bf16 %v534_v26, %v528_v25 }
  0x75   : > { %4313 = vmatmul.mubr.msk.f32.gmra.mrb[6].mxu1 %vm643_vm3, %v7045_v16  ;;  %v7054_v31 = vld [vmem:[%s7020_s25 + $0x8] sm:$0xff]  ;;  %v527_v34 = vld [vmem:[#allocation3 + $0x480] sm:$0xff]  ;;  %v533_v35 = vld [vmem:[#allocation3 + $0x4b0] sm:$0xff]  ;;  %v5323_v37 = vpack.c.bf16 %v500_v28, %v494_v27 }
  0x76   : > { %5244 = vmatpush1.bf16.msra.mxu0 %v5243_v51  ;;  %888 = vmatprep.mubr.f32.mxu1 %v8458_v0  ;;  %v493_v36 = vld [vmem:[#allocation3 + $0x370] sm:$0xff]  ;;  %v499_v38 = vld [vmem:[#allocation3 + $0x3a0] sm:$0xff]  ;;  %v540_v39 = vld [vmem:[#allocation3 + $0x4e8] sm:$0xff]  ;;  %v5259_v44 = vpack.c.bf16 %v533_v35, %v527_v34 }
  0x77   : > { %5310 = vmatpush1.bf16.msra.mxu1 %v5309_v54  ;;  %5246 = vmatprep.subr.bf16.mxu0 %v5245_v55  ;;  %v546_v40 = vld [vmem:[#allocation3 + $0x518] sm:$0xff]  ;;  %v512_v42 = vld [vmem:[#allocation3 + $0x408] sm:$0xff]  ;;  %v5325_v45 = vpack.c.bf16 %v499_v38, %v493_v36  ;;  %v539_v47 = vld [vmem:[#allocation3 + $0x4e0] sm:$0xff] }
  0x78   : > { %5312 = vmatprep.subr.bf16.mxu1 %v5311_v59  ;;  %v506_v41 = vld [vmem:[#allocation3 + $0x3d8] sm:$0xff]  ;;  %751 = vmatprep.mubr.f32.mxu0 %v7054_v31  ;;  %v7061_v43 = vld [vmem:[%s7020_s25 + $0x88] sm:$0xff]  ;;  %v5261_v46 = vpack.c.bf16 %v546_v40, %v540_v39  ;;  %v545_v48 = vld [vmem:[#allocation3 + $0x510] sm:$0xff] }
  0x79   : > { %4314 = vmatmul.mubr.msk.f32.gmra.mrb[8].mxu1 %vm643_vm3, %v7051_v29  ;;  %v505_v49 = vld [vmem:[#allocation3 + $0x3d0] sm:$0xff]  ;;  %v5327_v50 = vpack.c.bf16 %v512_v42, %v506_v41  ;;  %v511_v51 = vld [vmem:[#allocation3 + $0x400] sm:$0xff]  ;;  %v552_v53 = vld [vmem:[#allocation3 + $0x548] sm:$0xff]  ;;  %v5263_v59 = vpack.c.bf16 %v545_v48, %v539_v47 }
  0x7a   : > { %5248 = vmatpush1.bf16.msra.mxu0 %v5247_v3  ;;  %894 = vmatprep.mubr.f32.mxu1 %v8458_v0  ;;  %v558_v54 = vld [vmem:[#allocation3 + $0x578] sm:$0xff]  ;;  %v524_v56 = vld [vmem:[#allocation3 + $0x468] sm:$0xff]  ;;  %v7067_v57 = vld [vmem:[%s7020_s25 + $0xa0] sm:$0xff]  ;;  %v5329_v60 = vpack.c.bf16 %v511_v51, %v505_v49 }
  0x7b   : > { %5314 = vmatpush1.bf16.msra.mxu1 %v5313_v5  ;;  %5250 = vmatprep.subr.bf16.mxu0 %v5249_v6  ;;  %v518_v55 = vld [vmem:[#allocation3 + $0x438] sm:$0xff]  ;;  %v5265_v61 = vpack.c.bf16 %v558_v54, %v552_v53  ;;  %v551_v62 = vld [vmem:[#allocation3 + $0x540] sm:$0xff]  ;;  %v557_v63 = vld [vmem:[#allocation3 + $0x570] sm:$0xff] }
  0x7c   : > { %5316 = vmatprep.subr.bf16.mxu1 %v5315_v10  ;;  %v517_v2 = vld [vmem:[#allocation3 + $0x430] sm:$0xff]  ;;  %v5331_v3 = vpack.c.bf16 %v524_v56, %v518_v55  ;;  %v523_v5 = vld [vmem:[#allocation3 + $0x460] sm:$0xff]  ;;  %v564_v6 = vld [vmem:[#allocation3 + $0x5a8] sm:$0xff]  ;;  %v5267_v11 = vpack.c.bf16 %v557_v63, %v551_v62 }
  0x7d   : > { %4315 = vmatmul.mubr.msk.f32.gmra.mrb[10].mxu1 %vm643_vm3, %v7061_v43  ;;  %v570_v7 = vld [vmem:[#allocation3 + $0x5d8] sm:$0xff]  ;;  %v536_v9 = vld [vmem:[#allocation3 + $0x4c8] sm:$0xff]  ;;  %v5333_v12 = vpack.c.bf16 %v523_v5, %v517_v2  ;;  %v563_v14 = vld [vmem:[#allocation3 + $0x5a0] sm:$0xff] }
  0x7e   : > { %5252 = vmatpush1.bf16.msra.mxu0 %v5251_v17  ;;  %900 = vmatprep.mubr.f32.mxu1 %v8458_v0  ;;  %v530_v8 = vld [vmem:[#allocation3 + $0x498] sm:$0xff]  ;;  %v5269_v13 = vpack.c.bf16 %v570_v7, %v564_v6  ;;  %v569_v15 = vld [vmem:[#allocation3 + $0x5d0] sm:$0xff]  ;;  %v388_v20 = vld [vmem:[#allocation3 + $0x28] sm:$0xff] }
  0x7f   : > { %5318 = vmatpush1.bf16.msra.mxu1 %v5317_v18  ;;  %5254 = vmatprep.subr.bf16.mxu0 %v5253_v19  ;;  %v7073_v10 = vld [vmem:[%s7020_s25 + $0xb8] sm:$0xff]  ;;  %v529_v17 = vld [vmem:[#allocation3 + $0x490] sm:$0xff]  ;;  %v5335_v18 = vpack.c.bf16 %v536_v9, %v530_v8  ;;  %v535_v19 = vld [vmem:[#allocation3 + $0x4c0] sm:$0xff]  ;;  %v5271_v24 = vpack.c.bf16 %v569_v15, %v563_v14 }
  0x80   : > { %5320 = vmatprep.subr.bf16.mxu1 %v5319_v23  ;;  %v394_v21 = vld [vmem:[#allocation3 + $0x58] sm:$0xff]  ;;  %v548_v23 = vld [vmem:[#allocation3 + $0x528] sm:$0xff]  ;;  %v5337_v25 = vpack.c.bf16 %v535_v19, %v529_v17  ;;  %v541_v27 = vld [vmem:[#allocation3 + $0x4f0] sm:$0xff] }
  0x81   : > { %4316 = vmatmul.mubr.msk.f32.gmra.mrb[12].mxu1 %vm643_vm3, %v7067_v57  ;;  %v542_v22 = vld [vmem:[#allocation3 + $0x4f8] sm:$0xff]  ;;  %v5365_v26 = vpack.c.bf16 %v394_v21, %v388_v20  ;;  %v387_v28 = vld [vmem:[#allocation3 + $0x20] sm:$0xff]  ;;  %v400_v34 = vld [vmem:[#allocation3 + $0x88] sm:$0xff] }
  0x82   : > { %5256 = vmatpush1.bf16.msra.mxu0 %v5255_v30  ;;  %906 = vmatprep.mubr.f32.mxu1 %v8458_v0  ;;  %v393_v30 = vld [vmem:[#allocation3 + $0x50] sm:$0xff]  ;;  %v406_v35 = vld [vmem:[#allocation3 + $0xb8] sm:$0xff]  ;;  %v7079_v38 = vld [vmem:[%s7020_s25] sm:$0xff] }
  0x83   : > { %5322 = vmatpush1.bf16.msra.mxu1 %v5321_v32  ;;  %5258 = vmatprep.subr.bf16.mxu0 %v5257_v33  ;;  %v5339_v32 = vpack.c.bf16 %v548_v23, %v542_v22  ;;  %v547_v33 = vld [vmem:[#allocation3 + $0x520] sm:$0xff]  ;;  %v554_v36 = vld [vmem:[#allocation3 + $0x558] sm:$0xff]  ;;  %v5367_v39 = vpack.c.bf16 %v393_v30, %v387_v28  ;;  %v5369_v41 = vpack.c.bf16 %v406_v35, %v400_v34  ;;  %v553_v42 = vld [vmem:[#allocation3 + $0x550] sm:$0xff] }
  0x84   : > { %5324 = vmatprep.subr.bf16.mxu1 %v5323_v37  ;;  %v560_v37 = vld [vmem:[#allocation3 + $0x588] sm:$0xff]  ;;  %v5341_v40 = vpack.c.bf16 %v547_v33, %v541_v27  ;;  %v559_v47 = vld [vmem:[#allocation3 + $0x580] sm:$0xff]  ;;  %v418_v49 = vld [vmem:[#allocation3 + $0x118] sm:$0xff] }
  0x85   : > { %4317 = vmatmul.mubr.msk.f32.gmra.mrb[14].mxu1 %vm643_vm3, %v7073_v10  ;;  %v412_v48 = vld [vmem:[#allocation3 + $0xe8] sm:$0xff]  ;;  %v7083_v53 = vld [vmem:[%s7020_s25 + $0x20] sm:$0xff]  ;;  %v565_v55 = vld [vmem:[#allocation3 + $0x5b0] sm:$0xff]  ;;  %v5345_v56 = vpack.c.bf16 %v559_v47, %v553_v42 }
  0x86   : > { %5260 = vmatpush1.bf16.msra.mxu0 %v5259_v44  ;;  %977 = vmatprep.mubr.f32.mxu1 %v7054_v31  ;;  %v399_v44 = vld [vmem:[#allocation3 + $0x80] sm:$0xff]  ;;  %v572_v51 = vld [vmem:[#allocation3 + $0x5e8] sm:$0xff]  ;;  %v417_v62 = vld [vmem:[#allocation3 + $0x110] sm:$0xff] }
  0x87   : > { %5326 = vmatpush1.bf16.msra.mxu1 %v5325_v45  ;;  %5262 = vmatprep.subr.bf16.mxu0 %v5261_v46  ;;  %v405_v45 = vld [vmem:[#allocation3 + $0xb0] sm:$0xff]  ;;  %v5343_v46 = vpack.c.bf16 %v560_v37, %v554_v36  ;;  %v424_v2 = vld [vmem:[#allocation3 + $0x148] sm:$0xff]  ;;  %v7087_v5 = vld [vmem:[%s7020_s25 + $0x18] sm:$0xff] }
  0x88   : > { %5328 = vmatprep.subr.bf16.mxu1 %v5327_v50  ;;  %v566_v50 = vld [vmem:[#allocation3 + $0x5b8] sm:$0xff]  ;;  %v5371_v54 = vpack.c.bf16 %v405_v45, %v399_v44  ;;  %v584_v8 = vld [vmem:[#allocation3 + $0x648] sm:$0xff]  ;;  %v429_v14 = vld [vmem:[#allocation3 + $0x170] sm:$0xff] }
  0x89   : > { %v5347_v63 = vpack.c.bf16 %v572_v51, %v566_v50  ;;  %v7090_v6 = vld [vmem:[%s7020_s25 + $0x38] sm:$0xff]  ;;  %v436_v15 = vld [vmem:[#allocation3 + $0x1a8] sm:$0xff]  ;;  %v7098_v20 = vld [vmem:[%s7020_s25 + $0x50] sm:$0xff] }
  0x8a   : > { %5264 = vmatpush1.bf16.msra.mxu0 %v5263_v59  ;;  %v5373_v59 = vpack.c.bf16 %v418_v49, %v412_v48  ;;  %v578_v7 = vld [vmem:[#allocation3 + $0x618] sm:$0xff]  ;;  %v577_v21 = vld [vmem:[#allocation3 + $0x610] sm:$0xff]  ;;  %v583_v22 = vld [vmem:[#allocation3 + $0x640] sm:$0xff] }
  0x8b   : > { %5330 = vmatpush1.bf16.msra.mxu1 %v5329_v60  ;;  %5266 = vmatprep.subr.bf16.mxu0 %v5265_v61  ;;  %v571_v60 = vld [vmem:[#allocation3 + $0x5e0] sm:$0xff]  ;;  %v442_v17 = vld [vmem:[#allocation3 + $0x1d8] sm:$0xff]  ;;  %v5351_v19 = vpack.c.bf16 %v584_v8, %v578_v7  ;;  %v441_v28 = vld [vmem:[#allocation3 + $0x1d0] sm:$0xff]  ;;  %v5353_v34 = vpack.c.bf16 %v583_v22, %v577_v21 }
  0x8c   : > { %5332 = vmatprep.subr.bf16.mxu1 %v5331_v3  ;;  %v411_v61 = vld [vmem:[#allocation3 + $0xe0] sm:$0xff]  ;;  %v430_v3 = vld [vmem:[#allocation3 + $0x178] sm:$0xff]  ;;  %v448_v30 = vld [vmem:[#allocation3 + $0x208] sm:$0xff] }
  0x8d   : > { %v5375_v9 = vpack.c.bf16 %v417_v62, %v411_v61  ;;  %v435_v27 = vld [vmem:[#allocation3 + $0x1a0] sm:$0xff]  ;;  %v7103_v33 = vld [vmem:[%s7020_s25 + $0x48] sm:$0xff]  ;;  %v589_v36 = vld [vmem:[#allocation3 + $0x670] sm:$0xff] }
  0x8e   : > { %5268 = vmatpush1.bf16.msra.mxu0 %v5267_v11  ;;  %v5349_v11 = vpack.c.bf16 %v571_v60, %v565_v55  ;;  %v595_v37 = vld [vmem:[#allocation3 + $0x6a0] sm:$0xff]  ;;  %v453_v45 = vld [vmem:[#allocation3 + $0x230] sm:$0xff]  ;;  %v460_v47 = vld [vmem:[#allocation3 + $0x268] sm:$0xff] }
  0x8f   : > { %5334 = vmatpush1.bf16.msra.mxu1 %v5333_v12  ;;  %5270 = vmatprep.subr.bf16.mxu0 %v5269_v13  ;;  %v5377_v12 = vpack.c.bf16 %v430_v3, %v424_v2  ;;  %v423_v13 = vld [vmem:[#allocation3 + $0x140] sm:$0xff]  ;;  %v466_v48 = vld [vmem:[#allocation3 + $0x298] sm:$0xff]  ;;  %v5357_v50 = vpack.c.bf16 %v595_v37, %v589_v36  ;;  %v465_v61 = vld [vmem:[#allocation3 + $0x290] sm:$0xff] }
  0x90   : > { %5336 = vmatprep.subr.bf16.mxu1 %v5335_v18  ;;  %v7095_v18 = vld [vmem:[%s7020_s25 + $0x30] sm:$0xff]  ;;  %v5379_v23 = vpack.c.bf16 %v429_v14, %v423_v13  ;;  %v447_v44 = vld [vmem:[#allocation3 + $0x200] sm:$0xff]  ;;  %v478_v2 = vld [vmem:[#allocation3 + $0x2f8] sm:$0xff] }
  0x91   : > { %v7112_v49 = vld [vmem:[%s7020_s25 + $0x60] sm:$0xff]  ;;  %v7122_v3 = vld [vmem:[%s7020_s25 + $0x78] sm:$0xff]  ;;  %v484_v14 = vld [vmem:[#allocation3 + $0x328] sm:$0xff] }
  0x92   : > { %5272 = vmatpush1.bf16.msra.mxu0 %v5271_v24  ;;  %v590_v24 = vld [vmem:[#allocation3 + $0x678] sm:$0xff]  ;;  %v607_v55 = vld [vmem:[#allocation3 + $0x700] sm:$0xf]  ;;  %v508_v36 = vld [vmem:[#allocation3 + $0x3e8] sm:$0xff] }
  0x93   : > { %5338 = vmatpush1.bf16.msra.mxu1 %v5337_v25  ;;  %5366 = vmatprep.subr.bf16.mxu0 %v5365_v26  ;;  %v596_v25 = vld [vmem:[#allocation3 + $0x6a8] sm:$0xff]  ;;  %v5381_v26 = vpack.c.bf16 %v442_v17, %v436_v15  ;;  %v459_v60 = vld [vmem:[#allocation3 + $0x260] sm:$0xff]  ;;  %v7131_v13 = vld [vmem:[%s7020_s25 + $0x98] sm:$0xff] }
  0x94   : > { %5340 = vmatprep.subr.bf16.mxu1 %v5339_v32  ;;  %v454_v32 = vld [vmem:[#allocation3 + $0x238] sm:$0xff]  ;;  %v5355_v35 = vpack.c.bf16 %v596_v25, %v590_v24  ;;  %v7119_v62 = vld [vmem:[%s7020_s25 + $0x80] sm:$0xff]  ;;  %v5391_v8 = vpack.c.bf16 %v465_v61, %v459_v60  ;;  %v7134_v17 = vld [vmem:[%s7020_s25 + $0x90] sm:$0xff] }
  0x95   : > { %752 = vmatmul.mubr.f32.vlgmr.msra.gmra.mrb[0].mxu0 %v7079_v38  ;;  %v5385_v42 = vpack.c.bf16 %v454_v32, %v448_v30  ;;  %v490_v15 = vld [vmem:[#allocation3 + $0x358] sm:$0xff]  ;;  %v489_v24 = vld [vmem:[#allocation3 + $0x350] sm:$0xff]  ;;  %v531_v61 = vld [vmem:[#allocation3 + $0x4a0] sm:$0xff] }
  0x96   : > { %5368 = vmatpush1.bf16.msra.mxu0 %v5367_v39  ;;  %757 = vmatprep.mubr.f32.mxu0 %v7083_v53  ;;  %v5383_v39 = vpack.c.bf16 %v441_v28, %v435_v27  ;;  %v5397_v22 = vpack.c.bf16 %v490_v15, %v484_v14  ;;  %v7144_v25 = vld [vmem:[%s7020_s25 + $0xb0] sm:$0xff]  ;;  %v502_v27 = vld [vmem:[#allocation3 + $0x3b8] sm:$0xff]  ;;  %v7147_v28 = vld [vmem:[%s7020_s25 + $0xa8] sm:$0xff] }
  0x97   : > { %5342 = vmatpush1.bf16.msra.mxu1 %v5341_v40  ;;  %5370 = vmatprep.subr.bf16.mxu0 %v5369_v41  ;;  %v602_v40 = vld [vmem:[#allocation3 + $0x6d8] sm:$0xff]  ;;  %v608_v41 = vld [vmem:[#allocation3 + $0x708] sm:$0xf]  ;;  %v543_v15 = vld [vmem:[#allocation3 + $0x500] sm:$0xff] }
  0x98   : > { %5344 = vmatprep.subr.bf16.mxu1 %v5343_v46  ;;  %v7109_v46 = vld [vmem:[%s7020_s25 + $0x68] sm:$0xff]  ;;  %v5359_v51 = vpack.c.bf16 %v608_v41, %v602_v40  ;;  %v514_v37 = vld [vmem:[#allocation3 + $0x418] sm:$0xff]  ;;  %v507_v41 = vld [vmem:[#allocation3 + $0x3e0] sm:$0xff] }
  0x99   : > { %758 = vmatmul.mubr.f32.gmra.mrb[2].mxu0 %v7087_v5  ;;  %v5405_v40 = vpack.c.bf16 %v514_v37, %v508_v36  ;;  %v1433_v36 = vld [vmem:[%s8448_s3 + $0xa0] sm:$0xff]  ;;  %v568_v37 = vld [vmem:[#allocation3 + $0x5c8] sm:$0xff] }
  0x9a   : > { %5372 = vmatpush1.bf16.msra.mxu0 %v5371_v54  ;;  %763 = vmatprep.mubr.f32.mxu0 %v7090_v6  ;;  %v601_v54 = vld [vmem:[#allocation3 + $0x6d0] sm:$0xff] }
  0x9b   : > { %5346 = vmatpush1.bf16.msra.mxu1 %v5345_v56  ;;  %5374 = vmatprep.subr.bf16.mxu0 %v5373_v59  ;;  %v5387_v56 = vpack.c.bf16 %v453_v45, %v447_v44  ;;  %v5389_v59 = vpack.c.bf16 %v466_v48, %v460_v47  ;;  %v5362_v7 = vpack.c.bf16 %v607_v55, %v601_v54  ;;  %v520_v44 = vld [vmem:[#allocation3 + $0x448] sm:$0xff]  ;;  %v526_v45 = vld [vmem:[#allocation3 + $0x478] sm:$0xff]  ;;  %v519_v48 = vld [vmem:[#allocation3 + $0x440] sm:$0xff] }
  0x9c   : > { %5348 = vmatprep.subr.bf16.mxu1 %v5347_v63  ;;  %v472_v63 = vld [vmem:[#allocation3 + $0x2c8] sm:$0xff] }
  0x9d   : > { %764 = vmatmul.mubr.f32.gmra.mrb[4].mxu0 %v7095_v18  ;;  %v1418_v54 = vld [vmem:[%s8448_s3 + $0x28] sm:$0xff] }
  0x9e   : > { %5376 = vmatpush1.bf16.msra.mxu0 %v5375_v9  ;;  %769 = vmatprep.mubr.f32.mxu0 %v7098_v20  ;;  %v5393_v9 = vpack.c.bf16 %v478_v2, %v472_v63  ;;  %v532_v55 = vld [vmem:[#allocation3 + $0x4a8] sm:$0xff]  ;;  %v537_v63 = vld [vmem:[#allocation3 + $0x4d0] sm:$0xff] }
  0x9f   : > { %5350 = vmatpush1.bf16.msra.mxu1 %v5349_v11  ;;  %5378 = vmatprep.subr.bf16.mxu0 %v5377_v12  ;;  %v471_v11 = vld [vmem:[#allocation3 + $0x2c0] sm:$0xff]  ;;  %v477_v12 = vld [vmem:[#allocation3 + $0x2f0] sm:$0xff] }
  0xa0   : > { %5352 = vmatprep.subr.bf16.mxu1 %v5351_v19  ;;  %v8464_v19 = vmov 0.0|0.0   ;;  %v5395_v21 = vpack.c.bf16 %v477_v12, %v471_v11  ;;  %v550_v11 = vld [vmem:[#allocation3 + $0x538] sm:$0xff]  ;;  %v5415_v12 = vpack.c.bf16 %v537_v63, %v531_v61  ;;  %v592_v63 = vld [vmem:[#allocation3 + $0x688] sm:$0xff] }
  0xa1   : > { %770 = vmatmul.mubr.f32.gmra.mrb[6].mxu0 %v7103_v33 }
  0xa2   : > { %978 = vmatmul.mubr.f32.vlgmr.msra.gmra.mrb[16].mxu1 %v7079_v38  ;;  %5380 = vmatpush1.bf16.msra.mxu0 %v5379_v23  ;;  %v483_v23 = vld [vmem:[#allocation3 + $0x320] sm:$0xff] }
  0xa3   : > { %983 = vmatprep.mubr.f32.mxu1 %v7083_v53  ;;  %5382 = vmatprep.subr.bf16.mxu0 %v5381_v26  ;;  %v496_v26 = vld [vmem:[#allocation3 + $0x388] sm:$0xff]  ;;  %v5399_v30 = vpack.c.bf16 %v489_v24, %v483_v23  ;;  %v1427_v23 = vld [vmem:[%s8448_s3 + $0x70] sm:$0xff] }
  0xa4   : > { %5354 = vmatpush1.bf16.msra.mxu1 %v5353_v34  ;;  %775 = vmatprep.mubr.f32.mxu0 %v7109_v46  ;;  %v5401_v32 = vpack.c.bf16 %v502_v27, %v496_v26  ;;  %v495_v34 = vld [vmem:[#allocation3 + $0x380] sm:$0xff]  ;;  %v556_v24 = vld [vmem:[#allocation3 + $0x568] sm:$0xff]  ;;  %v562_v26 = vld [vmem:[#allocation3 + $0x598] sm:$0xff] }
  0xa5   : > { %5356 = vmatprep.subr.bf16.mxu1 %v5355_v35  ;;  %776 = vmatmul.mubr.f32.gmra.mrb[8].mxu0 %v7112_v49  ;;  %v501_v35 = vld [vmem:[#allocation3 + $0x3b0] sm:$0xff] }
  0xa6   : > { %984 = vmatmul.mubr.f32.gmra.mrb[18].mxu1 %v7087_v5  ;;  %5384 = vmatpush1.bf16.msra.mxu0 %v5383_v39  ;;  %v5403_v39 = vpack.c.bf16 %v501_v35, %v495_v34  ;;  %v561_v34 = vld [vmem:[#allocation3 + $0x590] sm:$0xff]  ;;  %v5421_v35 = vpack.c.bf16 %v562_v26, %v556_v24  ;;  %v1465_v24 = vld [vmem:[#allocation6 + $0x20] sm:$0xff] }
  0xa7   : > { %989 = vmatprep.mubr.f32.mxu1 %v7090_v6  ;;  %5386 = vmatprep.subr.bf16.mxu0 %v5385_v42  ;;  %v513_v42 = vld [vmem:[#allocation3 + $0x410] sm:$0xff] }
  0xa8   : > { %5358 = vmatpush1.bf16.msra.mxu1 %v5357_v50  ;;  %781 = vmatprep.mubr.f32.mxu0 %v7119_v62  ;;  %v5407_v47 = vpack.c.bf16 %v513_v42, %v507_v41  ;;  %v525_v50 = vld [vmem:[#allocation3 + $0x470] sm:$0xff]  ;;  %v567_v42 = vld [vmem:[#allocation3 + $0x5c0] sm:$0xff] }
  0xa9   : > { %5361 = vmatprep.subr.msk.bf16.mxu1 %vm7010_vm2, %v5359_v51  ;;  %782 = vmatmul.mubr.f32.gmra.mrb[10].mxu0 %v7122_v3  ;;  %v1415_v51 = vld [vmem:[%s8448_s3 + $0x10] sm:$0xff] }
  0xaa   : > { %990 = vmatmul.mubr.f32.gmra.mrb[20].mxu1 %v7095_v18  ;;  %5388 = vmatpush1.bf16.msra.mxu0 %v5387_v56  ;;  %v538_v56 = vld [vmem:[#allocation3 + $0x4d8] sm:$0xff]  ;;  %v7166_v60 = vpack.c.bf16 %v1418_v54, %v1415_v51  ;;  %v579_v54 = vld [vmem:[#allocation3 + $0x620] sm:$0xff] }
  0xab   : > { %995 = vmatprep.mubr.f32.mxu1 %v7098_v20  ;;  %5390 = vmatprep.subr.bf16.mxu0 %v5389_v59  ;;  %v5411_v59 = vpack.c.bf16 %v525_v50, %v519_v48  ;;  %v5413_v2 = vpack.c.bf16 %v538_v56, %v532_v55  ;;  %v586_v48 = vld [vmem:[#allocation3 + $0x658] sm:$0xff]  ;;  %v585_v55 = vld [vmem:[#allocation3 + $0x650] sm:$0xff] }
  0xac   : > { %5364 = vmatpush1.bf16.msk.msra.mxu1 %vm7010_vm2, %v5362_v7  ;;  %787 = vmatprep.mubr.f32.mxu0 %v7131_v13  ;;  %8529 = vst [vmem:[#allocation14_spill] sm:$0xff] %v7166_v60  ;;  %v1421_v7 = vld [vmem:[%s8448_s3 + $0x40] sm:$0xff]  ;;  %v5431_v61 = vpack.c.bf16 %v585_v55, %v579_v54  ;;  %v1479_v54 = vld [vmem:[#allocation6 + $0x90] sm:$0xff]  ;;  %v1482_v55 = vld [vmem:[#allocation6 + $0xa8] sm:$0xff] }
  0xad   : > { %5475 = vmatprep.subr.bf16.mxu1 %v8464_v19  ;;  %788 = vmatmul.mubr.f32.gmra.mrb[12].mxu0 %v7134_v17 }
  0xae   : > { %996 = vmatmul.mubr.f32.gmra.mrb[22].mxu1 %v7103_v33  ;;  %5392 = vmatpush1.bf16.msra.mxu0 %v5391_v8  ;;  %v1424_v8 = vld [vmem:[%s8448_s3 + $0x58] sm:$0xff] }
  0xaf   : > { %1001 = vmatprep.mubr.f32.mxu1 %v7109_v46  ;;  %5394 = vmatprep.subr.bf16.mxu0 %v5393_v9  ;;  %v544_v9 = vld [vmem:[#allocation3 + $0x508] sm:$0xff]  ;;  %v7178_v14 = vpack.c.bf16 %v1424_v8, %v1421_v7  ;;  %v1451_v8 = vld [vmem:[%s8448_s3 + $0x130] sm:$0xff] }
  0xb0   : > { %793 = vmatprep.mubr.f32.mxu0 %v7144_v25 }
  0xb1   : > { %794 = vmatmul.mubr.f32.gmra.mrb[14].mxu0 %v7147_v28  ;;  %8530 = vst [vmem:[#allocation15_spill] sm:$0xff] %v7178_v14 }
  0xb2   : > { %1002 = vmatmul.mubr.f32.gmra.mrb[24].mxu1 %v7112_v49  ;;  %5396 = vmatpush1.bf16.msra.mxu0 %v5395_v21  ;;  %v549_v21 = vld [vmem:[#allocation3 + $0x530] sm:$0xff] }
  0xb3   : > { %1007 = vmatprep.mubr.f32.mxu1 %v7119_v62  ;;  %5398 = vmatprep.subr.bf16.mxu0 %v5397_v22  ;;  %v5417_v22 = vpack.c.bf16 %v550_v11, %v544_v9  ;;  %v5419_v27 = vpack.c.bf16 %v549_v21, %v543_v15  ;;  %v591_v11 = vld [vmem:[#allocation3 + $0x680] sm:$0xff]  ;;  %v604_v15 = vld [vmem:[#allocation3 + $0x6e8] sm:$0xff]  ;;  %v610_v21 = vld [vmem:[#allocation3 + $0x718] sm:$0xf] }
  0xb4   : > { %1203 = vmatprep.mubr.f32.mxu0 %v7054_v31  ;;  %v5409_v31 = vpack.c.bf16 %v526_v45, %v520_v44  ;;  %v573_v44 = vld [vmem:[#allocation3 + $0x5f0] sm:$0xff]  ;;  %v5437_v26 = vpack.c.bf16 %v610_v21, %v604_v15  ;;  %v1501_v15 = vld [vmem:[#allocation6 + $0x140] sm:$0xff] }
  0xb5   : > { %v5427_v50 = vpack.c.bf16 %v573_v44, %v567_v42  ;;  %v1467_v44 = vld [vmem:[#allocation6 + $0x30] sm:$0xff] }
  0xb6   : > { %1008 = vmatmul.mubr.f32.gmra.mrb[26].mxu1 %v7122_v3  ;;  %5400 = vmatpush1.bf16.msra.mxu0 %v5399_v30 }
  0xb7   : > { %1013 = vmatprep.mubr.f32.mxu1 %v7131_v13  ;;  %5402 = vmatprep.subr.bf16.mxu0 %v5401_v32  ;;  %v555_v32 = vld [vmem:[#allocation3 + $0x560] sm:$0xff] }
  0xba   : > { %1014 = vmatmul.mubr.f32.gmra.mrb[28].mxu1 %v7134_v17  ;;  %5404 = vmatpush1.bf16.msra.mxu0 %v5403_v39  ;;  %v574_v39 = vld [vmem:[#allocation3 + $0x5f8] sm:$0xff] }
  0xbb   : > { %1019 = vmatprep.mubr.f32.mxu1 %v7144_v25  ;;  %5406 = vmatprep.subr.bf16.mxu0 %v5405_v40  ;;  %v5423_v40 = vpack.c.bf16 %v561_v34, %v555_v32  ;;  %v5425_v45 = vpack.c.bf16 %v574_v39, %v568_v37  ;;  %v1414_v32 = vld [vmem:[%s8448_s3 + $0x8] sm:$0xff]  ;;  %v1417_v34 = vld [vmem:[%s8448_s3 + $0x20] sm:$0xff]  ;;  %v1471_v37 = vld [vmem:[#allocation6 + $0x50] sm:$0xff] }
  0xbc   : > { %v7286_v39 = vpack.c.bf16 %v1417_v34, %v1414_v32  ;;  %v6696_v32 = vld [vmem:[%s7020_s25 + $0x10] sm:$0xff]  ;;  %v1504_v34 = vld [vmem:[#allocation6 + $0x158] sm:$0xff] }
  0xbe   : > { %1020 = vmatmul.mubr.f32.gmra.mrb[30].mxu1 %v7147_v28  ;;  %5408 = vmatpush1.bf16.msra.mxu0 %v5407_v47  ;;  %v1439_v47 = vld [vmem:[%s8448_s3 + $0xd0] sm:$0xff]  ;;  %8538 = vst [vmem:[#allocation23_spill] sm:$0xff] %v7286_v39 }
  0xbf   : > { %1090 = vmatprep.mubr.f32.mxu1 %v8458_v0  ;;  %5410 = vmatprep.subr.bf16.mxu0 %v5409_v31  ;;  %v580_v31 = vld [vmem:[#allocation3 + $0x628] sm:$0xff] }
  0xc0   : > { %v5429_v56 = vpack.c.bf16 %v586_v48, %v580_v31  ;;  %v1480_v31 = vld [vmem:[#allocation6 + $0x98] sm:$0xff]  ;;  %v1483_v48 = vld [vmem:[#allocation6 + $0xb0] sm:$0xff] }
  0xc2   : > { %4320 = vmatmul.mubr.msk.f32.vlgmr.msra.gmra.mrb[16].mxu1 %vm643_vm3, %v7025_v52  ;;  %5412 = vmatpush1.bf16.msra.mxu0 %v5411_v59  ;;  %v1430_v52 = vld [vmem:[%s8448_s3 + $0x88] sm:$0xff]  ;;  %v1445_v59 = vld [vmem:[%s8448_s3 + $0x100] sm:$0xff] }
  0xc3   : > { %5477 = vmatpush3.bf16.msra.mxu1 %v7166_v60  ;;  %1096 = vmatprep.mubr.f32.mxu1 %v8458_v0  ;;  %v7191_v30 = vpack.c.bf16 %v1430_v52, %v1427_v23  ;;  %v1462_v23 = vld [vmem:[#allocation6 + $0x8] sm:$0xff] }
  0xc4   : > { %5478 = vmatprep.subr.bf16.mxu1 %v8464_v19  ;;  %5414 = vmatprep.subr.bf16.mxu0 %v5413_v2  ;;  %v598_v2 = vld [vmem:[#allocation3 + $0x6b8] sm:$0xff] }
  0xc5   : > { %8531 = vst [vmem:[#allocation16_spill] sm:$0xff] %v7191_v30  ;;  %v5433_v9 = vpack.c.bf16 %v598_v2, %v592_v63  ;;  %v1492_v63 = vld [vmem:[#allocation6 + $0xf8] sm:$0xff]  ;;  %v1495_v2 = vld [vmem:[#allocation6 + $0x110] sm:$0xff] }
  0xc6   : > { %4321 = vmatmul.mubr.msk.f32.gmra.mrb[18].mxu1 %vm643_vm3, %v7033_v58  ;;  %5416 = vmatpush1.bf16.msra.mxu0 %v5415_v12  ;;  %v1436_v58 = vld [vmem:[%s8448_s3 + $0xb8] sm:$0xff]  ;;  %v597_v12 = vld [vmem:[#allocation3 + $0x6b0] sm:$0xff] }
  0xc7   : > { %5480 = vmatpush3.bf16.msra.mxu1 %v7178_v14  ;;  %1102 = vmatprep.mubr.f32.mxu1 %v8458_v0  ;;  %v7204_v41 = vpack.c.bf16 %v1436_v58, %v1433_v36  ;;  %v5435_v52 = vpack.c.bf16 %v597_v12, %v591_v11  ;;  %v1468_v58 = vld [vmem:[#allocation6 + $0x38] sm:$0xff]  ;;  %v1423_v11 = vld [vmem:[%s8448_s3 + $0x50] sm:$0xff]  ;;  %v1498_v12 = vld [vmem:[#allocation6 + $0x128] sm:$0xff] }
  0xc8   : > { %5481 = vmatprep.subr.bf16.mxu1 %v8464_v19  ;;  %5418 = vmatprep.subr.bf16.mxu0 %v5417_v22  ;;  %v7300_v42 = vpack.c.bf16 %v1471_v37, %v1468_v58  ;;  %v1503_v37 = vld [vmem:[#allocation6 + $0x150] sm:$0xff] }
  0xc9   : > { %8532 = vst [vmem:[#allocation17_spill] sm:$0xff] %v7204_v41 }
  0xca   : > { %4322 = vmatmul.mubr.msk.f32.gmra.mrb[20].mxu1 %vm643_vm3, %v7039_v4  ;;  %5420 = vmatpush1.bf16.msra.mxu0 %v5419_v27  ;;  %v1442_v4 = vld [vmem:[%s8448_s3 + $0xe8] sm:$0xff]  ;;  %v603_v27 = vld [vmem:[#allocation3 + $0x6e0] sm:$0xff] }
  0xcb   : > { %5483 = vmatpush3.bf16.msra.mxu1 %v7191_v30  ;;  %1108 = vmatprep.mubr.f32.mxu1 %v8458_v0  ;;  %v7217_v51 = vpack.c.bf16 %v1442_v4, %v1439_v47  ;;  %v1473_v4 = vld [vmem:[#allocation6 + $0x60] sm:$0xff] }
  0xcc   : > { %5484 = vmatprep.subr.bf16.mxu1 %v8464_v19  ;;  %5422 = vmatprep.subr.bf16.mxu0 %v5421_v35  ;;  %v7276_v35 = vpack.c.bf16 %v1465_v24, %v1462_v23  ;;  %v1497_v23 = vld [vmem:[#allocation6 + $0x120] sm:$0xff]  ;;  %v7367_v24 = vpack.c.bf16 %v1501_v15, %v1498_v12  ;;  %v1440_v12 = vld [vmem:[%s8448_s3 + $0xd8] sm:$0xff] }
  0xcd   : > { %8533 = vst [vmem:[#allocation18_spill] sm:$0xff] %v7217_v51 }
  0xce   : > { %4323 = vmatmul.mubr.msk.f32.gmra.mrb[22].mxu1 %vm643_vm3, %v7045_v16  ;;  %5424 = vmatpush1.bf16.msra.mxu0 %v5423_v40  ;;  %v1448_v16 = vld [vmem:[%s8448_s3 + $0x118] sm:$0xff]  ;;  %8537 = vst [vmem:[#allocation22_spill] sm:$0xff] %v7276_v35  ;;  %v7295_v40 = vld [vmem:[%s7281_s22] sm:$0xff] }
  0xcf   : > { %5486 = vmatpush3.bf16.msra.mxu1 %v7204_v41  ;;  %1114 = vmatprep.mubr.f32.mxu1 %v8458_v0  ;;  %v7231_v7 = vpack.c.bf16 %v1448_v16, %v1445_v59  ;;  %v1489_v59 = vld [vmem:[#allocation6 + $0xe0] sm:$0xff] }
  0xd0   : > { %5487 = vmatprep.subr.bf16.mxu1 %v8464_v19  ;;  %5426 = vmatprep.subr.bf16.mxu0 %v5425_v45  ;;  %v1470_v45 = vld [vmem:[#allocation6 + $0x48] sm:$0xff]  ;;  %v1485_v16 = vld [vmem:[#allocation6 + $0xc0] sm:$0xff] }
  0xd1   : > { %8534 = vst [vmem:[#allocation19_spill] sm:$0xff] %v7231_v7  ;;  %v7309_v47 = vpack.c.bf16 %v1470_v45, %v1467_v44  ;;  %v1425_v44 = vld [vmem:[%s8448_s3 + $0x60] sm:$0xff]  ;;  %v1428_v45 = vld [vmem:[%s8448_s3 + $0x78] sm:$0xff] }
  0xd2   : > { %4324 = vmatmul.mubr.msk.f32.gmra.mrb[24].mxu1 %vm643_vm3, %v7051_v29  ;;  %5428 = vmatpush1.bf16.msra.mxu0 %v5427_v50  ;;  %v1454_v29 = vld [vmem:[%s8448_s3 + $0x148] sm:$0xff]  ;;  %v7321_v50 = vpack.c.bf16 %v1483_v48, %v1480_v31  ;;  %v7406_v48 = vpack.c.bf16 %v1428_v45, %v1425_v44 }
  0xd3   : > { %5489 = vmatpush3.bf16.msra.mxu1 %v7217_v51  ;;  %1120 = vmatprep.mubr.f32.mxu1 %v8458_v0  ;;  %v7250_v22 = vpack.c.bf16 %v1454_v29, %v1451_v8  ;;  %v1413_v8 = vld [vmem:[%s8448_s3] sm:$0xff]  ;;  %v1416_v29 = vld [vmem:[%s8448_s3 + $0x18] sm:$0xff]  ;;  %v6697_v31 = vld [vmem:[%s7020_s25 + $0x28] sm:$0xff] }
  0xd4   : > { %5490 = vmatprep.subr.bf16.mxu1 %v8464_v19  ;;  %5430 = vmatprep.subr.bf16.mxu0 %v5429_v56  ;;  %v1486_v56 = vld [vmem:[#allocation6 + $0xc8] sm:$0xff]  ;;  %v7353_v21 = vpack.c.bf16 %v1416_v29, %v1413_v8  ;;  %8543 = vst [vmem:[#allocation28_spill] sm:$0xff] %v7406_v48 }
  0xd5   : > { %1204 = vmatmul.mubr.f32.vlgmr.msra.gmra.mrb[16].mxu0 %v7079_v38  ;;  %8535 = vst [vmem:[#allocation20_spill] sm:$0xff] %v7250_v22  ;;  %v1457_v38 = vld [vmem:[%s8448_s3 + $0x160] sm:$0xff]  ;;  %v7432_v8 = vld [vmem:[%s7281_s22 + $0x8] sm:$0xff] }
  0xd6   : > { %4325 = vmatmul.mubr.msk.f32.gmra.mrb[26].mxu1 %vm643_vm3, %v7061_v43  ;;  %5432 = vmatpush1.bf16.msra.mxu0 %v5431_v61  ;;  %v1460_v43 = vld [vmem:[%s8448_s3 + $0x178] sm:$0xff]  ;;  %8539 = vst [vmem:[#allocation24_spill] sm:$0xff] %v7353_v21  ;;  %v1478_v44 = vld [vmem:[#allocation6 + $0x88] sm:$0xff] }
  0xd7   : > { %5492 = vmatpush3.bf16.msra.mxu1 %v7231_v7  ;;  %1126 = vmatprep.mubr.f32.mxu1 %v8458_v0  ;;  %v1488_v61 = vld [vmem:[#allocation6 + $0xd8] sm:$0xff]  ;;  %v1450_v45 = vld [vmem:[%s8448_s3 + $0x128] sm:$0xff] }
  0xd8   : > { %1209 = vmatprep.mubr.f32.mxu0 %v7083_v53  ;;  %5493 = vmatprep.subr.bf16.mxu1 %v8464_v19  ;;  %v609_v53 = vld [vmem:[#allocation3 + $0x710] sm:$0xf] }
  0xd9   : > { %1210 = vmatmul.mubr.f32.gmra.mrb[18].mxu0 %v7087_v5  ;;  %5434 = vmatprep.subr.bf16.mxu0 %v5433_v9  ;;  %v7273_v5 = vpack.c.bf16 %v1460_v43, %v1457_v38  ;;  %v5440_v36 = vpack.c.bf16 %v609_v53, %v603_v27  ;;  %v1494_v9 = vld [vmem:[#allocation6 + $0x108] sm:$0xff]  ;;  %v1429_v53 = vld [vmem:[%s8448_s3 + $0x80] sm:$0xff] }
  0xda   : > { %4326 = vmatmul.mubr.msk.f32.gmra.mrb[28].mxu1 %vm643_vm3, %v7067_v57  ;;  %1215 = vmatprep.mubr.f32.mxu0 %v7090_v6  ;;  %v1461_v57 = vld [vmem:[#allocation6] sm:$0xff]  ;;  %v1464_v6 = vld [vmem:[#allocation6 + $0x18] sm:$0xff]  ;;  %v1426_v27 = vld [vmem:[%s8448_s3 + $0x68] sm:$0xff] }
  0xdb   : > { %5495 = vmatpush3.bf16.msra.mxu1 %v7250_v22  ;;  %1132 = vmatprep.mubr.f32.mxu1 %v8458_v0  ;;  %8536 = vst [vmem:[#allocation21_spill] sm:$0xff] %v7273_v5  ;;  %v7385_v58 = vpack.c.bf16 %v1429_v53, %v1426_v27 }
  0xdc   : > { %5496 = vmatprep.subr.bf16.mxu1 %v8464_v19  ;;  %5436 = vmatpush1.bf16.msra.mxu0 %v5435_v52  ;;  %v1419_v52 = vld [vmem:[%s8448_s3 + $0x30] sm:$0xff] }
  0xdd   : > { %1216 = vmatmul.mubr.f32.gmra.mrb[20].mxu0 %v7095_v18  ;;  %5439 = vmatprep.subr.msk.bf16.mxu0 %vm7010_vm2, %v5437_v26  ;;  %v7297_v18 = vpack.c.bf16 %v1464_v6, %v1461_v57  ;;  %v1500_v26 = vld [vmem:[#allocation6 + $0x138] sm:$0xff]  ;;  %v1507_v57 = vld [vmem:[#allocation6 + $0x170] sm:$0xff]  ;;  %8542 = vst [vmem:[#allocation27_spill] sm:$0xff] %v7385_v58 }
  0xde   : > { %4327 = vmatmul.mubr.msk.f32.gmra.mrb[30].mxu1 %vm643_vm3, %v7073_v10  ;;  %1221 = vmatprep.mubr.f32.mxu0 %v7098_v20  ;;  %v1474_v10 = vld [vmem:[#allocation6 + $0x68] sm:$0xff]  ;;  %v1477_v20 = vld [vmem:[#allocation6 + $0x80] sm:$0xff] }
  0xdf   : > { %5498 = vmatpush3.bf16.msra.mxu1 %v7273_v5  ;;  %4681 = vmatprep.mubr.msk.f32.mxu1 %vm6841_vm4, %v8458_v0  ;;  %v7313_v1 = vpack.c.bf16 %v1477_v20, %v1474_v10  ;;  %v7394_v10 = vpack.c.bf16 %v1507_v57, %v1504_v34  ;;  %v1506_v20 = vld [vmem:[#allocation6 + $0x168] sm:$0xff]  ;;  %v1475_v34 = vld [vmem:[#allocation6 + $0x70] sm:$0xff] }
  0xe0   : > { %5500 = vmatprep.subr.bf16.mxu1 %v7276_v35  ;;  %5442 = vmatpush1.bf16.msk.msra.mxu0 %vm7010_vm2, %v5440_v36  ;;  %v7383_v36 = vpack.c.bf16 %v1500_v26, %v1497_v23  ;;  %v1472_v23 = vld [vmem:[#allocation6 + $0x58] sm:$0xff]  ;;  %v1443_v57 = vld [vmem:[%s8448_s3 + $0xf0] sm:$0xff] }
  0xe1   : > { %1222 = vmatmul.mubr.f32.gmra.mrb[22].mxu0 %v7103_v33  ;;  %5444 = vmatprep.subr.bf16.mxu0 %v7286_v39  ;;  %v1476_v33 = vld [vmem:[#allocation6 + $0x78] sm:$0xff] }
  0xe2   : > { %4682 = vmatmul.mubr.f32.vlgmr.msra.gmra.mrb[32].mxu1 %v7295_v40  ;;  %1227 = vmatprep.mubr.f32.mxu0 %v7109_v46  ;;  %v7318_v46 = vpack.c.bf16 %v1476_v33, %v1473_v4  ;;  %v1432_v4 = vld [vmem:[%s8448_s3 + $0x98] sm:$0xff]  ;;  %v1435_v33 = vld [vmem:[%s8448_s3 + $0xb0] sm:$0xff] }
  0xe3   : > { %5502 = vmatpush1.bf16.msra.mxu1 %v7297_v18  ;;  %1756 = vmatprep.mubr.f32.mxu1 %v8458_v0  ;;  %v6699_v26 = vld [vmem:[%s7020_s25 + $0x58] sm:$0xff] }
  0xe4   : > { %5504 = vmatprep.subr.bf16.mxu1 %v7300_v42 }
  0xe5   : > { %1228 = vmatmul.mubr.f32.gmra.mrb[24].mxu0 %v7112_v49  ;;  %v7326_v49 = vpack.c.bf16 %v1482_v55, %v1479_v54  ;;  %v7410_v54 = vpack.c.bf16 %v1506_v20, %v1503_v37  ;;  %v7412_v55 = vpack.c.bf16 %v1435_v33, %v1432_v4  ;;  %v1446_v37 = vld [vmem:[%s8448_s3 + $0x108] sm:$0xff]  ;;  %v1453_v20 = vld [vmem:[%s8448_s3 + $0x140] sm:$0xff]  ;;  %v6700_v4 = vld [vmem:[%s7020_s25 + $0x70] sm:$0xff] }
  0xe6   : > { %1233 = vmatprep.mubr.f32.mxu0 %v7119_v62  ;;  %v7329_v62 = vpack.c.bf16 %v1489_v59, %v1486_v56  ;;  %v1431_v56 = vld [vmem:[%s8448_s3 + $0x90] sm:$0xff]  ;;  %v1434_v59 = vld [vmem:[%s8448_s3 + $0xa8] sm:$0xff]  ;;  %v7487_v33 = vpack.c.bf16 %v1446_v37, %v1443_v57  ;;  %v6702_v57 = vld [vmem:[%s7020_s25 + $0xa0] sm:$0xff] }
  0xe7   : > { %5506 = vmatpush1.bf16.msra.mxu1 %v7309_v47  ;;  %8544 = vst [vmem:[#allocation29_spill] sm:$0xff] %v7412_v55  ;;  %v7434_v29 = vpack.c.bf16 %v1434_v59, %v1431_v56  ;;  %v7493_v56 = vpack.c.bf16 %v1453_v20, %v1450_v45  ;;  %v1481_v59 = vld [vmem:[#allocation6 + $0xa0] sm:$0xff]  ;;  %v1496_v20 = vld [vmem:[#allocation6 + $0x118] sm:$0xff] }
  0xe8   : > { %5508 = vmatprep.subr.bf16.mxu1 %v7313_v1  ;;  %8549 = vst [vmem:[#allocation34_spill] sm:$0xff] %v7487_v33  ;;  %v1493_v45 = vld [vmem:[#allocation6 + $0x100] sm:$0xff] }
  0xe9   : > { %1234 = vmatmul.mubr.f32.gmra.mrb[26].mxu0 %v7122_v3  ;;  %v7334_v3 = vpack.c.bf16 %v1488_v61, %v1485_v16  ;;  %v1463_v16 = vld [vmem:[#allocation6 + $0x10] sm:$0xff]  ;;  %v1466_v61 = vld [vmem:[#allocation6 + $0x28] sm:$0xff]  ;;  %8545 = vst [vmem:[#allocation30_spill] sm:$0xff] %v7434_v29  ;;  %8550 = vst [vmem:[#allocation35_spill] sm:$0xff] %v7493_v56 }
  0xea   : > { %1239 = vmatprep.mubr.f32.mxu0 %v7131_v13  ;;  %v1491_v13 = vld [vmem:[#allocation6 + $0xf0] sm:$0xff] }
  0xeb   : > { %5510 = vmatpush1.bf16.msra.mxu1 %v7318_v46  ;;  %v7356_v38 = vpack.c.bf16 %v1494_v9, %v1491_v13  ;;  %v1441_v13 = vld [vmem:[%s8448_s3 + $0xe0] sm:$0xff]  ;;  %v7438_v9 = vpack.c.bf16 %v1466_v61, %v1463_v16  ;;  %v1452_v61 = vld [vmem:[%s8448_s3 + $0x138] sm:$0xff] }
  0xec   : > { %5512 = vmatprep.subr.bf16.mxu1 %v7321_v50  ;;  %v1449_v16 = vld [vmem:[%s8448_s3 + $0x120] sm:$0xff] }
  0xed   : > { %1240 = vmatmul.mubr.f32.gmra.mrb[28].mxu0 %v7134_v17  ;;  %v7343_v17 = vpack.c.bf16 %v1495_v2, %v1492_v63  ;;  %v6698_v63 = vld [vmem:[%s7020_s25 + $0x40] sm:$0xff]  ;;  %v1438_v2 = vld [vmem:[%s8448_s3 + $0xc8] sm:$0xff] }
  0xee   : > { %1245 = vmatprep.mubr.f32.mxu0 %v7144_v25  ;;  %v1420_v25 = vld [vmem:[%s8448_s3 + $0x38] sm:$0xff]  ;;  %v7447_v15 = vpack.c.bf16 %v1441_v13, %v1438_v2  ;;  %v1459_v13 = vld [vmem:[%s8448_s3 + $0x170] sm:$0xff] }
  0xef   : > { %5514 = vmatpush1.bf16.msra.mxu1 %v7326_v49  ;;  %v7358_v43 = vpack.c.bf16 %v1423_v11, %v1420_v25  ;;  %v1469_v25 = vld [vmem:[#allocation6 + $0x40] sm:$0xff]  ;;  %v1456_v2 = vld [vmem:[%s8448_s3 + $0x158] sm:$0xff] }
  0xf0   : > { %5516 = vmatprep.subr.bf16.mxu1 %v7329_v62  ;;  %v1437_v11 = vld [vmem:[%s8448_s3 + $0xc0] sm:$0xff]  ;;  %8546 = vst [vmem:[#allocation31_spill] sm:$0xff] %v7447_v15  ;;  %v7463_v53 = vpack.c.bf16 %v1472_v23, %v1469_v25  ;;  %v6701_v25 = vld [vmem:[%s7020_s25 + $0x88] sm:$0xff]  ;;  %v7518_v23 = vpack.c.bf16 %v1459_v13, %v1456_v2  ;;  %v1508_v13 = vld [vmem:[#allocation6 + $0x178] sm:$0xff] }
  0xf1   : > { %1246 = vmatmul.mubr.f32.gmra.mrb[30].mxu0 %v7147_v28  ;;  %8540 = vst [vmem:[#allocation25_spill] sm:$0xff] %v7358_v43  ;;  %v1422_v28 = vld [vmem:[%s8448_s3 + $0x48] sm:$0xff]  ;;  %v7459_v27 = vpack.c.bf16 %v1440_v12, %v1437_v11  ;;  %v7512_v11 = vpack.c.bf16 %v1452_v61, %v1449_v16  ;;  %v1499_v16 = vld [vmem:[#allocation6 + $0x130] sm:$0xff]  ;;  %v1505_v2 = vld [vmem:[#allocation6 + $0x160] sm:$0xff] }
  0xf2   : > { %1316 = vmatprep.mubr.f32.mxu0 %v8458_v0  ;;  %v7379_v6 = vpack.c.bf16 %v1422_v28, %v1419_v52  ;;  %v1444_v52 = vld [vmem:[%s8448_s3 + $0xf8] sm:$0xff]  ;;  %v1447_v28 = vld [vmem:[%s8448_s3 + $0x110] sm:$0xff]  ;;  %8552 = vst [vmem:[#allocation37_spill] sm:$0xff] %v7518_v23  ;;  %v1502_v61 = vld [vmem:[#allocation6 + $0x148] sm:$0xff] }
  0xf3   : > { %5518 = vmatpush1.bf16.msra.mxu1 %v7334_v3  ;;  %8547 = vst [vmem:[#allocation32_spill] sm:$0xff] %v7459_v27  ;;  %8551 = vst [vmem:[#allocation36_spill] sm:$0xff] %v7512_v11 }
  0xf4   : > { %5520 = vmatprep.subr.bf16.mxu1 %v7343_v17  ;;  %8541 = vst [vmem:[#allocation26_spill] sm:$0xff] %v7379_v6 }
  0xf5   : > { %4330 = vmatmul.mubr.msk.f32.vlgmr.msra.gmra.mrb[16].mxu0 %vm643_vm3, %v6696_v32  ;;  %v7465_v32 = vpack.c.bf16 %v1447_v28, %v1444_v52  ;;  %v1455_v52 = vld [vmem:[%s8448_s3 + $0x150] sm:$0xff]  ;;  %v1458_v28 = vld [vmem:[%s8448_s3 + $0x168] sm:$0xff] }
  0xf6   : > { %5446 = vmatpush1.bf16.msra.mxu0 %v7353_v21  ;;  %1322 = vmatprep.mubr.f32.mxu0 %v8458_v0  ;;  %v7531_v37 = vpack.c.bf16 %v1458_v28, %v1455_v52 }
  0xf7   : > { %5522 = vmatpush1.bf16.msra.mxu1 %v7356_v38  ;;  %5448 = vmatprep.subr.bf16.mxu0 %v7358_v43  ;;  %8548 = vst [vmem:[#allocation33_spill] sm:$0xff] %v7465_v32 }
  0xf8   : > { %5524 = vmatprep.subr.bf16.mxu1 %v7367_v24  ;;  %8553 = vst [vmem:[#allocation38_spill] sm:$0xff] %v7531_v37 }
  0xf9   : > { %4331 = vmatmul.mubr.msk.f32.gmra.mrb[18].mxu0 %vm643_vm3, %v6697_v31  ;;  %v7491_v31 = vpack.c.bf16 %v1478_v44, %v1475_v34  ;;  %v1490_v34 = vld [vmem:[#allocation6 + $0xe8] sm:$0xff] }
  0xfa   : > { %5450 = vmatpush1.bf16.msra.mxu0 %v7379_v6  ;;  %1328 = vmatprep.mubr.f32.mxu0 %v8458_v0 }
  0xfb   : > { %5526 = vmatpush1.bf16.msra.mxu1 %v7383_v36  ;;  %5452 = vmatprep.subr.bf16.mxu0 %v7385_v58 }
  0xfc   : > { %5528 = vmatprep.subr.bf16.mxu1 %v7394_v10 }
  0xfd   : > { %4332 = vmatmul.mubr.msk.f32.gmra.mrb[20].mxu0 %vm643_vm3, %v6698_v63  ;;  %v1484_v63 = vld [vmem:[#allocation6 + $0xb8] sm:$0xff] }
  0xfe   : > { %5454 = vmatpush1.bf16.msra.mxu0 %v7406_v48  ;;  %1334 = vmatprep.mubr.f32.mxu0 %v8458_v0  ;;  %v7516_v12 = vpack.c.bf16 %v1484_v63, %v1481_v59  ;;  %v7543_v59 = vpack.c.bf16 %v1496_v20, %v1493_v45  ;;  %v7551_v63 = vpack.c.bf16 %v1502_v61, %v1499_v16 }
  0xff   : > { %5530 = vmatpush1.bf16.msra.mxu1 %v7410_v54  ;;  %5456 = vmatprep.subr.bf16.mxu0 %v7412_v55 }
 0x100   : > { %5531 = vmatprep.subr.bf16.mxu1 %v8464_v19 }
 0x101   : > { %4333 = vmatmul.mubr.msk.f32.gmra.mrb[22].mxu0 %vm643_vm3, %v6699_v26  ;;  %v1487_v26 = vld [vmem:[#allocation6 + $0xd0] sm:$0xff] }
 0x102   : > { %1757 = vmatmul.mubr.f32.vlgmr.msra.gmra.mrb[34].mxu1 %v7432_v8  ;;  %5458 = vmatpush1.bf16.msra.mxu0 %v7434_v29  ;;  %v7535_v44 = vpack.c.bf16 %v1490_v34, %v1487_v26 }
 0x103   : > { %5533 = vmatpush3.bf16.msra.mxu1 %v7438_v9  ;;  %1340 = vmatprep.mubr.f32.mxu0 %v8458_v0 }
 0x104   : > { %5534 = vmatprep.subr.bf16.mxu1 %v8464_v19  ;;  %5460 = vmatprep.subr.bf16.mxu0 %v7447_v15 }
 0x105   : > { %4334 = vmatmul.mubr.msk.f32.gmra.mrb[24].mxu0 %vm643_vm3, %v6700_v4  ;;  %4716 = vmatprep.mubr.msk.f32.mxu1 %vm6841_vm4, %v8458_v0  ;;  %v6703_v4 = vld [vmem:[%s7020_s25 + $0xb8] sm:$0xff]  ;;  %s6760_s25 = scalar_lea.vmem %s8403_s26, 256 }
 0x106   : > { %5462 = vmatpush1.bf16.msra.mxu0 %v7459_v27  ;;  %1346 = vmatprep.mubr.f32.mxu0 %v8458_v0  ;;  %p6761_p1 = scmp.ne.s32.totalorder %s8403_s26, %s6760_s25  ;;  %p6768_p8 = scmp.lt.s32.totalorder %s6766_s29, %s6760_s25 }
 0x107   : > { %5536 = vmatpush3.bf16.msra.mxu1 %v7463_v53  ;;  %5464 = vmatprep.subr.bf16.mxu0 %v7465_v32 }
 0x108   : > { %5537 = vmatprep.subr.bf16.mxu1 %v8464_v19  ;;  %p6762_p3 = pnand %p6761_p1, %p8714_p2  ;;  %p6769_p11 = por %p6768_p8, %p6767_p7 }
 0x109   : > { %4335 = vmatmul.mubr.msk.f32.gmra.mrb[26].mxu0 %vm643_vm3, %v6701_v25  ;;  %v7557_v25 = vpack.c.bf16 %v1508_v13, %v1505_v2 }
 0x10a   : > { %5466 = vmatpush1.bf16.msra.mxu0 %v7487_v33  ;;  %1352 = vmatprep.mubr.f32.mxu0 %v8458_v0  ;;  %p6763_p4 = pneg %p6762_p3 }
 0x10b   : > { %5539 = vmatpush3.bf16.msra.mxu1 %v7491_v31  ;;  %5468 = vmatprep.subr.bf16.mxu0 %v7493_v56  ;;  %8554 = vst [vmem:[#allocation39_spill] sm:$0xff] %v7557_v25 }
 0x10c   : > { %5540 = vmatprep.subr.bf16.mxu1 %v8464_v19  ;;  %p6770_p13 = pnand %p6769_p11, %p6763_p4 }
 0x10d   : > { %4336 = vmatmul.mubr.msk.f32.gmra.mrb[28].mxu0 %vm643_vm3, %v6702_v57 }
 0x10e   : > { %5470 = vmatpush1.bf16.msra.mxu0 %v7512_v11  ;;  %1358 = vmatprep.mubr.f32.mxu0 %v8458_v0 }
 0x10f   : > { %5542 = vmatpush3.bf16.msra.mxu1 %v7516_v12  ;;  %5472 = vmatprep.subr.bf16.mxu0 %v7518_v23 }
 0x110   : > { %5543 = vmatprep.subr.bf16.mxu1 %v8464_v19 }
 0x111   : > { %4337 = vmatmul.mubr.msk.f32.gmra.mrb[30].mxu0 %vm643_vm3, %v6703_v4 }
 0x112   : > { %5474 = vmatpush1.bf16.msra.mxu0 %v7531_v37  ;;  %1615 = vmatprep.mubr.f32.mxu0 %v8458_v0 }
 0x113   : > { %5545 = vmatpush3.bf16.msra.mxu1 %v7535_v44  ;;  %5556 = vmatprep.subr.bf16.mxu0 %v7286_v39 }
 0x114   : > { %5546 = vmatprep.subr.bf16.mxu1 %v8464_v19 }
 0x115   : > { %1616 = vmatmul.mubr.f32.vlgmr.msra.gmra.mrb[32].mxu0 %v7295_v40 }
 0x116   : > { %5558 = vmatpush1.bf16.msra.mxu0 %v7353_v21  ;;  %1945 = vmatprep.mubr.f32.mxu0 %v8458_v0 }
 0x117   : > { %5548 = vmatpush3.bf16.msra.mxu1 %v7543_v59  ;;  %5560 = vmatprep.subr.bf16.mxu0 %v7358_v43 }
 0x118   : > { %5549 = vmatprep.subr.bf16.mxu1 %v8464_v19 }
 0x11a   : > { %5562 = vmatpush1.bf16.msra.mxu0 %v7379_v6 }
 0x11b   : > { %5551 = vmatpush3.bf16.msra.mxu1 %v7551_v63  ;;  %5564 = vmatprep.subr.bf16.mxu0 %v7385_v58 }
 0x11c   : > { %5552 = vmatprep.subr.bf16.mxu1 %v8464_v19 }
 0x11e   : > { %5566 = vmatpush1.bf16.msra.mxu0 %v7406_v48 }
 0x11f   : > { %5554 = vmatpush3.bf16.msra.mxu1 %v7557_v25  ;;  %5568 = vmatprep.subr.bf16.mxu0 %v7412_v55  ;;  %v7626_v55 = vld [vmem:[%s8449_s4] sm:$0x7] }
 0x120   : > { %5587 = vmatprep.subr.bf16.mxu1 %v8464_v19 }
 0x122   : > { %4717 = vmatmul.mubr.f32.vlgmr.msra.gmra.mrb[36].mxu1 %v7432_v8  ;;  %5570 = vmatpush1.bf16.msra.mxu0 %v7434_v29 }
 0x123   : > { %5589 = vmatpush3.bf16.msra.mxu1 %v7166_v60  ;;  %5572 = vmatprep.subr.bf16.mxu0 %v7447_v15 }
 0x124   : > { %5590 = vmatprep.subr.bf16.mxu1 %v8464_v19  ;;  %4751 = vmatprep.mubr.msk.f32.mxu1 %vm6841_vm4, %v8458_v0  ;;  %v613_v0 = vlaneseq }
 0x126   : > { %5574 = vmatpush1.bf16.msra.mxu0 %v7459_v27 }
 0x127   : > { %5592 = vmatpush3.bf16.msra.mxu1 %v7178_v14  ;;  %5576 = vmatprep.subr.bf16.mxu0 %v7465_v32 }
 0x128   : > { %5593 = vmatprep.subr.bf16.mxu1 %v8464_v19 }
 0x12a   : > { %5578 = vmatpush1.bf16.msra.mxu0 %v7487_v33 }
 0x12b   : > { %5595 = vmatpush3.bf16.msra.mxu1 %v7191_v30  ;;  %5580 = vmatprep.subr.bf16.mxu0 %v7493_v56 }
 0x12c   : > { %5596 = vmatprep.subr.bf16.mxu1 %v8464_v19 }
 0x12e   : > { %5582 = vmatpush1.bf16.msra.mxu0 %v7512_v11  ;;  %v7610_v11 = vld [vmem:[%s8447_s2] sm:$0x3f] }
 0x12f   : > { %5598 = vmatpush3.bf16.msra.mxu1 %v7204_v41  ;;  %5584 = vmatprep.subr.bf16.mxu0 %v7518_v23 }
 0x130   : > { %5599 = vmatprep.subr.bf16.mxu1 %v8464_v19 }
 0x132   : > { %5586 = vmatpush1.bf16.msra.mxu0 %v7531_v37 }
 0x133   : > { %5601 = vmatpush3.bf16.msra.mxu1 %v7217_v51  ;;  %5643 = vmatprep.subr.bf16.mxu0 %v8464_v19 }
 0x134   : > { %5602 = vmatprep.subr.bf16.mxu1 %v8464_v19 }
 0x135   : > { %v866_v52 = vpop.f32.mrb[0].mxu1 }
 0x136   : > { %v868_v28 = vpop.f32.mrb[1].mxu1 }
 0x137   : > { %5604 = vmatpush3.bf16.msra.mxu1 %v7231_v7 }
 0x138   : > { %5605 = vmatprep.subr.bf16.mxu1 %v8464_v19 }
 0x13b   : > { %5607 = vmatpush3.bf16.msra.mxu1 %v7250_v22 }
 0x13c   : > { %5608 = vmatprep.subr.bf16.mxu1 %v8464_v19  ;;  %v7598_v19 = vshrl.u32 %v613_v0, 7 }
 0x13e   : > { %v7605_v22 = vsub.s32 0, %v7598_v19  ;;  %v7613_v56 = vsub.s32 1, %v7598_v19 }
 0x13f   : > { %5610 = vmatpush3.bf16.msra.mxu1 %v7273_v5 }
 0x140   : > { %5612 = vmatprep.subr.bf16.mxu1 %v7276_v35  ;;  %v872_v26 = vpop.f32.mrb[2].mxu1  ;;  %v616_v7 = vrot.slane %v7610_v11, %v7605_v22  ;;  %v620_v0 = vrot.slane %v7610_v11, %v7613_v56  ;;  %v7630_v6 = vrot.slane %v7626_v55, %v7605_v22 }
 0x141   : > { %v874_v34 = vpop.f32.mrb[3].mxu1 }
 0x144   : > { %v878_v57 = vpop.f32.mrb[4].mxu1 }
 0x145   : > { %v880_v45 = vpop.f32.mrb[5].mxu1 }
 0x148   : > { %v884_v20 = vpop.f32.mrb[6].mxu1 }
 0x149   : > { %v886_v4 = vpop.f32.mrb[7].mxu1 }
 0x14c   : > { %v890_v16 = vpop.f32.mrb[8].mxu1 }
 0x14d   : > { %v892_v61 = vpop.f32.mrb[9].mxu1 }
 0x150   : > { %v896_v2 = vpop.f32.mrb[10].mxu1 }
 0x151   : > { %v898_v13 = vpop.f32.mrb[11].mxu1 }
 0x154   : > { %v7594_v37 = vpop.f32.mrb[12].mxu1 }
 0x155   : > { %v7596_v23 = vpop.f32.mrb[13].mxu1 }
 0x158   : > { %v7600_v5 = vpop.f32.mrb[14].mxu1 }
 0x159   : > { %v7602_v35 = vpop.f32.mrb[15].mxu1 }
 0x168   : > { %v753_v33 = vpop.f32.mrb[0].mxu0 }
 0x169   : > { %v754_v32 = vadd.f32 %v753_v33, %v616_v7  ;;  %v755_v51 = vpop.f32.mrb[1].mxu0 }
 0x16a   : > { %v756_v27 = vadd.f32 %v755_v51, %v620_v0 }
 0x16b   : > { %v7619_v15 = vadd.f32 %v866_v52, %v754_v32 }
 0x16c   : > { %v7621_v41 = vadd.f32 %v868_v28, %v756_v27  ;;  %v759_v29 = vpop.f32.mrb[2].mxu0  ;;  %v7634_v27 = vrot.slane %v7626_v55, %v7613_v56 }
 0x16d   : > { %v760_v30 = vadd.f32 %v759_v29, %v616_v7  ;;  %v761_v48 = vpop.f32.mrb[3].mxu0 }
 0x16e   : > { %v762_v58 = vadd.f32 %v761_v48, %v620_v0 }
 0x16f   : > { %v873_v14 = vadd.f32 %v872_v26, %v760_v30 }
 0x170   : > { %v875_v33 = vadd.f32 %v874_v34, %v762_v58  ;;  %v765_v51 = vpop.f32.mrb[4].mxu0 }
 0x171   : > { %v766_v32 = vadd.f32 %v765_v51, %v616_v7  ;;  %v767_v52 = vpop.f32.mrb[5].mxu0  ;;  %v7637_v28 = vadd.f32 %v7630_v6, %v873_v14 }
 0x172   : > { %v768_v43 = vadd.f32 %v767_v52, %v620_v0  ;;  %v7640_v29 = vadd.f32 %v7634_v27, %v875_v33 }
 0x173   : > { %8555 = vst [vmem:[#allocation40_spill] sm:$0xff] %v7637_v28  ;;  %v879_v30 = vadd.f32 %v878_v57, %v766_v32 }
 0x174   : > { %v881_v48 = vadd.f32 %v880_v45, %v768_v43  ;;  %v771_v26 = vpop.f32.mrb[6].mxu0 }
 0x175   : > { %v772_v60 = vadd.f32 %v771_v26, %v616_v7  ;;  %v773_v21 = vpop.f32.mrb[7].mxu0  ;;  %v7643_v58 = vadd.f32 %v7630_v6, %v879_v30 }
 0x176   : > { %v774_v34 = vadd.f32 %v773_v21, %v620_v0  ;;  %v7646_v39 = vadd.f32 %v7634_v27, %v881_v48 }
 0x177   : > { %8556 = vst [vmem:[#allocation41_spill] sm:$0xff] %v7643_v58  ;;  %v885_v51 = vadd.f32 %v884_v20, %v772_v60 }
 0x178   : > { %8557 = vst [vmem:[#allocation42_spill] sm:$0xff] %v7646_v39  ;;  %v887_v25 = vadd.f32 %v886_v4, %v774_v34  ;;  %v777_v14 = vpop.f32.mrb[8].mxu0 }
 0x179   : > { %v778_v28 = vadd.f32 %v777_v14, %v616_v7  ;;  %v779_v52 = vpop.f32.mrb[9].mxu0  ;;  %v7649_v33 = vadd.f32 %v7630_v6, %v885_v51 }
 0x17a   : > { %v780_v57 = vadd.f32 %v779_v52, %v620_v0  ;;  %v7652_v43 = vadd.f32 %v7634_v27, %v887_v25  ;;  %v8621_v58 = vld [vmem:[#allocation40_spill] sm:$0xff] }
 0x17b   : > { %8558 = vst [vmem:[#allocation43_spill] sm:$0xff] %v7649_v33  ;;  %v891_v45 = vadd.f32 %v890_v16, %v778_v28 }
 0x17c   : > { %8559 = vst [vmem:[#allocation44_spill] sm:$0xff] %v7652_v43  ;;  %v893_v32 = vadd.f32 %v892_v61, %v780_v57  ;;  %v783_v30 = vpop.f32.mrb[10].mxu0 }
 0x17d   : > { %v784_v26 = vadd.f32 %v783_v30, %v616_v7  ;;  %v785_v21 = vpop.f32.mrb[11].mxu0  ;;  %v7655_v48 = vadd.f32 %v7630_v6, %v891_v45 }
 0x17e   : > { %v786_v60 = vadd.f32 %v785_v21, %v620_v0  ;;  %v7658_v20 = vadd.f32 %v7634_v27, %v893_v32 }
 0x17f   : > { %8560 = vst [vmem:[#allocation45_spill] sm:$0xff] %v7655_v48  ;;  %v897_v4 = vadd.f32 %v896_v2, %v784_v26 }
 0x180   : > { %8561 = vst [vmem:[#allocation46_spill] sm:$0xff] %v7658_v20  ;;  %v899_v34 = vadd.f32 %v898_v13, %v786_v60  ;;  %v789_v51 = vpop.f32.mrb[12].mxu0 }
 0x181   : > { %v790_v14 = vadd.f32 %v789_v51, %v616_v7  ;;  %v791_v52 = vpop.f32.mrb[13].mxu0  ;;  %v7661_v25 = vadd.f32 %v7630_v6, %v897_v4 }
 0x182   : > { %v792_v16 = vadd.f32 %v791_v52, %v620_v0  ;;  %v7664_v61 = vadd.f32 %v7634_v27, %v899_v34  ;;  %v7685_v34 = vsub.s32 2, %v7598_v19 }
 0x183   : > { %8562 = vst [vmem:[#allocation47_spill] sm:$0xff] %v7661_v25  ;;  %v903_v28 = vadd.f32 %v7594_v37, %v790_v14 }
 0x184   : > { %8563 = vst [vmem:[#allocation48_spill] sm:$0xff] %v7664_v61  ;;  %v905_v57 = vadd.f32 %v7596_v23, %v792_v16  ;;  %v795_v45 = vpop.f32.mrb[14].mxu0 }
 0x185   : > { %v796_v30 = vadd.f32 %v795_v45, %v616_v7  ;;  %v797_v32 = vpop.f32.mrb[15].mxu0  ;;  %v7669_v2 = vadd.f32 %v7630_v6, %v903_v28  ;;  %v627_v7 = vsub.s32 3, %v7598_v19 }
 0x186   : > { %v798_v13 = vadd.f32 %v797_v32, %v620_v0  ;;  %v7672_v26 = vadd.f32 %v7634_v27, %v905_v57 }
 0x187   : > { %8564 = vst [vmem:[#allocation49_spill] sm:$0xff] %v7669_v2  ;;  %v909_v21 = vadd.f32 %v7600_v5, %v796_v30  ;;  %v628_v23 = vrot.slane %v7610_v11, %v627_v7  ;;  %v7693_v5 = vrot.slane %v7610_v11, %v7685_v34 }
 0x188   : > { %8565 = vst [vmem:[#allocation50_spill] sm:$0xff] %v7672_v26  ;;  %v911_v60 = vadd.f32 %v7602_v35, %v798_v13 }
 0x189   : > { %v7677_v4 = vadd.f32 %v7630_v6, %v909_v21 }
 0x18a   : > { %v7680_v37 = vadd.f32 %v7634_v27, %v911_v60 }
 0x18b   : > { %8566 = vst [vmem:[#allocation51_spill] sm:$0xff] %v7677_v4 }
 0x18c   : > { %8567 = vst [vmem:[#allocation52_spill] sm:$0xff] %v7680_v37 }
 0x195   : > { %v7687_v0 = vpop.f32.mrb[16].mxu1 }
 0x196   : > { %v1094_v51 = vpop.f32.mrb[17].mxu1 }
 0x197   : > { %v7689_v14 = vadd.f32 %v1094_v51, %v628_v23 }
 0x199   : > { %8568 = vst [vmem:[#allocation53_spill] sm:$0xff] %v7689_v14  ;;  %v1098_v35 = vpop.f32.mrb[18].mxu1 }
 0x19a   : > { %v7696_v52 = vadd.f32 %v1098_v35, %v7693_v5  ;;  %v1100_v16 = vpop.f32.mrb[19].mxu1 }
 0x19b   : > { %v7698_v28 = vadd.f32 %v1100_v16, %v628_v23 }
 0x19d   : > { %8569 = vst [vmem:[#allocation54_spill] sm:$0xff] %v7698_v28  ;;  %v1104_v57 = vpop.f32.mrb[20].mxu1 }
 0x19e   : > { %v7701_v45 = vadd.f32 %v1104_v57, %v7693_v5  ;;  %v1106_v30 = vpop.f32.mrb[21].mxu1 }
 0x19f   : > { %v7703_v32 = vadd.f32 %v1106_v30, %v628_v23 }
 0x1a0   : > { %8570 = vst [vmem:[#allocation55_spill] sm:$0xff] %v7701_v45 }
 0x1a1   : > { %8571 = vst [vmem:[#allocation56_spill] sm:$0xff] %v7703_v32  ;;  %v1110_v13 = vpop.f32.mrb[22].mxu1 }
 0x1a2   : > { %v7706_v21 = vadd.f32 %v1110_v13, %v7693_v5  ;;  %v1112_v60 = vpop.f32.mrb[23].mxu1 }
 0x1a3   : > { %v7708_v7 = vadd.f32 %v1112_v60, %v628_v23 }
 0x1a4   : > { %8572 = vst [vmem:[#allocation57_spill] sm:$0xff] %v7706_v21 }
 0x1a5   : > { %8573 = vst [vmem:[#allocation58_spill] sm:$0xff] %v7708_v7  ;;  %v1116_v51 = vpop.f32.mrb[24].mxu1 }
 0x1a6   : > { %v7711_v35 = vadd.f32 %v1116_v51, %v7693_v5  ;;  %v1118_v16 = vpop.f32.mrb[25].mxu1 }
 0x1a7   : > { %v7713_v14 = vadd.f32 %v1118_v16, %v628_v23 }
 0x1a8   : > { %8574 = vst [vmem:[#allocation59_spill] sm:$0xff] %v7711_v35 }
 0x1a9   : > { %8575 = vst [vmem:[#allocation60_spill] sm:$0xff] %v7713_v14  ;;  %v1122_v37 = vpop.f32.mrb[26].mxu1 }
 0x1aa   : > { %v7716_v57 = vadd.f32 %v1122_v37, %v7693_v5  ;;  %v1124_v30 = vpop.f32.mrb[27].mxu1  ;;  %v631_v37 = vsub.s32 4, %v7598_v19 }
 0x1ab   : > { %v7718_v4 = vadd.f32 %v1124_v30, %v628_v23  ;;  %v635_v30 = vsub.s32 5, %v7598_v19  ;;  %v1526_v19 = vld [vmem:[%s8451_s6] sm:$0x7] }
 0x1ac   : > { %8576 = vst [vmem:[#allocation61_spill] sm:$0xff] %v7716_v57  ;;  %v632_v57 = vrot.slane %v7610_v11, %v631_v37 }
 0x1ad   : > { %8577 = vst [vmem:[#allocation62_spill] sm:$0xff] %v7718_v4  ;;  %v1128_v28 = vpop.f32.mrb[28].mxu1  ;;  %v8620_v4 = vld [vmem:[#allocation22_spill] sm:$0xff] }
 0x1ae   : > { %v7721_v13 = vadd.f32 %v1128_v28, %v7693_v5  ;;  %v1130_v60 = vpop.f32.mrb[29].mxu1  ;;  %v7734_v28 = vrot.slane %v7610_v11, %v635_v30 }
 0x1af   : > { %v7723_v26 = vadd.f32 %v1130_v60, %v628_v23 }
 0x1b0   : > { %8578 = vst [vmem:[#allocation63_spill] sm:$0xff] %v7721_v13 }
 0x1b1   : > { %v1134_v2 = vpop.f32.mrb[30].mxu1 }
 0x1b2   : > { %v7726_v51 = vadd.f32 %v1134_v2, %v7693_v5  ;;  %v1136_v16 = vpop.f32.mrb[31].mxu1 }
 0x1b4   : > { %8579 = vst [vmem:[#allocation64_spill] sm:$0xff] %v7726_v51 }
 0x1b5   : > { %v7728_v32 = vpop.f32.mrb[32].mxu1 }
 0x1b6   : > { %v4683_v61 = vpop.f32.mrb[33].mxu1 }
 0x1c8   : > { %v1318_v13 = vpop.f32.mrb[16].mxu0 }
 0x1c9   : > { %v7736_v60 = vadd.f32 %v1318_v13, %v632_v57  ;;  %v1320_v25 = vpop.f32.mrb[17].mxu0 }
 0x1ca   : > { %v7739_v2 = vadd.f32 %v1320_v25, %v7734_v28  ;;  %v7755_v25 = vrot.slane %v1526_v19, %v7605_v22 }
 0x1cb   : > { %8580 = vst [vmem:[#allocation65_spill] sm:$0xff] %v7736_v60 }
 0x1cc   : > { %8581 = vst [vmem:[#allocation66_spill] sm:$0xff] %v7739_v2  ;;  %v1324_v51 = vpop.f32.mrb[18].mxu0 }
 0x1cd   : > { %v7741_v7 = vadd.f32 %v1324_v51, %v632_v57  ;;  %v1326_v61 = vpop.f32.mrb[19].mxu0 }
 0x1ce   : > { %v7744_v35 = vadd.f32 %v1326_v61, %v7734_v28 }
 0x1cf   : > { %8582 = vst [vmem:[#allocation67_spill] sm:$0xff] %v7741_v7 }
 0x1d0   : > { %8583 = vst [vmem:[#allocation68_spill] sm:$0xff] %v7744_v35  ;;  %v1330_v11 = vpop.f32.mrb[20].mxu0  ;;  %v6418_v35 = vadd.f32 %v1136_v16, %v628_v23 }
 0x1d1   : > { %v7749_v37 = vadd.f32 %v1330_v11, %v632_v57  ;;  %v1332_v13 = vpop.f32.mrb[21].mxu0 }
 0x1d2   : > { %v7752_v30 = vadd.f32 %v1332_v13, %v7734_v28 }
 0x1d3   : > { %8584 = vst [vmem:[#allocation69_spill] sm:$0xff] %v7749_v37 }
 0x1d4   : > { %8585 = vst [vmem:[#allocation70_spill] sm:$0xff] %v7752_v30  ;;  %v1336_v51 = vpop.f32.mrb[22].mxu0 }
 0x1d5   : > { %v1758_v2 = vpop.f32.mrb[34].mxu1  ;;  %v7757_v60 = vadd.f32 %v1336_v51, %v632_v57  ;;  %v1338_v61 = vpop.f32.mrb[23].mxu0 }
 0x1d6   : > { %v1759_v7 = vadd.f32 %v1758_v2, %v7755_v25  ;;  %v7761_v20 = vadd.f32 %v1338_v61, %v7734_v28  ;;  %v1760_v11 = vpop.f32.mrb[35].mxu1  ;;  %v7774_v2 = vrot.slane %v1526_v19, %v7613_v56 }
 0x1d7   : > { %8586 = vst [vmem:[#allocation71_spill] sm:$0xff] %v7757_v60 }
 0x1d8   : > { %8587 = vst [vmem:[#allocation72_spill] sm:$0xff] %v7761_v20  ;;  %v1854_v37 = vadd.f32 %v6418_v35, %v1759_v7  ;;  %v1342_v48 = vpop.f32.mrb[24].mxu0  ;;  %v1761_v61 = vadd.f32 %v1760_v11, %v7774_v2  ;;  %v7787_v11 = vrot.slane %v1526_v19, %v7685_v34  ;;  %v7793_v19 = vrot.slane %v7626_v55, %v7685_v34 }
 0x1d9   : > { %v7763_v14 = vadd.f32 %v1342_v48, %v632_v57  ;;  %v1344_v13 = vpop.f32.mrb[25].mxu0 }
 0x1da   : > { %v4340_v30 = vmul.f32 -1.442695, %v1854_v37  ;;  %v7766_v22 = vadd.f32 %v1344_v13, %v7734_v28  ;;  %8592 = vst [vmem:[#allocation77_spill] sm:$0xff] %v7793_v19 }
 0x1db   : > { %8588 = vst [vmem:[#allocation73_spill] sm:$0xff] %v7763_v14 }
 0x1dc   : > { %8589 = vst [vmem:[#allocation74_spill] sm:$0xff] %v7766_v22  ;;  %6536 = vpow2.f32 %v4340_v30  ;;  %v1348_v51 = vpop.f32.mrb[26].mxu0 }
 0x1dd   : > { %v7768_v60 = vadd.f32 %v1348_v51, %v632_v57  ;;  %v1350_v23 = vpop.f32.mrb[27].mxu0 }
 0x1de   : > { %v7771_v16 = vadd.f32 %v1350_v23, %v7734_v28  ;;  %v6341_v23 = vadd.f32 %v7630_v6, %v7619_v15 }
 0x1df   : > { %8590 = vst [vmem:[#allocation75_spill] sm:$0xff] %v7768_v60  ;;  %v8619_v60 = vld [vmem:[#allocation21_spill] sm:$0xff] }
 0x1e0   : > { %8591 = vst [vmem:[#allocation76_spill] sm:$0xff] %v7771_v16  ;;  %v1354_v7 = vpop.f32.mrb[28].mxu0 }
 0x1e1   : > { %v7776_v35 = vadd.f32 %v1354_v7, %v632_v57  ;;  %v1356_v48 = vpop.f32.mrb[29].mxu0  ;;  %v6345_v7 = vadd.f32 %v7634_v27, %v7621_v41 }
 0x1e2   : > { %v7779_v37 = vadd.f32 %v1356_v48, %v7734_v28 }
 0x1e4   : > { %v1360_v30 = vpop.f32.mrb[30].mxu0 }
 0x1e5   : > { %v6433_v13 = vadd.f32 %v1360_v30, %v632_v57  ;;  %v1362_v51 = vpop.f32.mrb[31].mxu0 }
 0x1e6   : > { %v6537_v20 = vpop.eup %6536 }
 0x1e7   : > { %v1861_v22 = vadd.f32 %v6433_v13, %v1761_v61  ;;  %v1858_v14 = vadd.f32 1.0, %v6537_v20 }
 0x1e8   : > { %v1617_v56 = vpop.f32.mrb[32].mxu0 }
 0x1e9   : > { %v4341_v21 = vmul.f32 -1.442695, %v1861_v22  ;;  %v6342_v43 = vadd.f32 %v6341_v23, %v1617_v56  ;;  %v1619_v33 = vpop.f32.mrb[33].mxu0  ;;  %v1689_v23 = vadd.f32 %v7728_v32, %v7793_v19 }
 0x1ea   : > { %v6346_v48 = vadd.f32 %v6345_v7, %v1619_v33  ;;  %v6434_v33 = vadd.f32 %v1362_v51, %v7734_v28  ;;  %v6403_v28 = vadd.f32 %v7687_v0, %v7693_v5  ;;  %v8594_v0 = vmov 0.0   ;;  %v8596_v5 = vld [vmem:[#allocation23_spill] sm:$0xff] }
 0x1eb   : > { %6538 = vpow2.f32 %v4341_v21  ;;  %v4338_v16 = vmul.f32 -1.442695, %v6342_v43 }
 0x1ec   : > { %6540 = vrcp.f32 %v1858_v14  ;;  %v4339_v57 = vmul.f32 -1.442695, %v6346_v48 }
 0x1ed   : > { %6542 = vpow2.f32 %v4338_v16 }
 0x1ee   : > { %6544 = vpow2.f32 %v4339_v57 }
 0x1f5   : > { %v6539_v61 = vpop.eup %6538  ;;  %v1829_v6 = vpop.f32.mrb[36].mxu1 }
 0x1f6   : > { %v6541_v15 = vpop.eup %6540  ;;  %v1865_v20 = vadd.f32 1.0, %v6539_v61  ;;  %v1830_v30 = vadd.f32 %v1829_v6, %v7787_v11  ;;  %v4718_v41 = vpop.f32.mrb[37].mxu1 }
 0x1f7   : > { %v6543_v27 = vpop.eup %6542 }
 0x1f8   : > { %6546 = vrcp.f32 %v1865_v20  ;;  %v1837_v21 = vadd.f32 1.0, %v6543_v27  ;;  %v1868_v43 = vmul.f32 %v6541_v15, %v1830_v30  ;;  %v6545_v22 = vpop.eup %6544  ;;  %v8597_v27 = vld [vmem:[#allocation24_spill] sm:$0xff] }
 0x1f9   : > { %v1844_v16 = vadd.f32 1.0, %v6545_v22  ;;  %v8602_v22 = vld [vmem:[#allocation27_spill] sm:$0xff] }
 0x1fa   : > { %6548 = vrcp.f32 %v1837_v21  ;;  %v1869_v14 = vadd.f32 %v6434_v33, %v1868_v43  ;;  %v8598_v33 = vld [vmem:[#allocation14_spill] sm:$0xff]  ;;  %v8599_v21 = vld [vmem:[#allocation25_spill] sm:$0xff] }
 0x1fb   : > { %v8600_v43 = vld [vmem:[#allocation26_spill] sm:$0xff] }
 0x1fc   : > { %6550 = vtanh.f32 %v1869_v14  ;;  %v8601_v14 = vld [vmem:[#allocation15_spill] sm:$0xff] }
 0x1fd   : > { %6552 = vrcp.f32 %v1844_v16  ;;  %v8603_v16 = vld [vmem:[#allocation28_spill] sm:$0xff] }
 0x202   : > { %v6547_v13 = vpop.eup %6546 }
 0x203   : > { %v1871_v56 = vsub.f32 1.0, %v6547_v13  ;;  %v1873_v6 = vmul.f32 %v6547_v13, %v7432_v8  ;;  %v8593_v8 = vmov 0.0|0.0   ;;  %v8604_v13 = vld [vmem:[#allocation16_spill] sm:$0xff] }
 0x204   : > { %v6549_v7 = vpop.eup %6548 }
 0x205   : > { %v1847_v51 = vmul.f32 %v6549_v7, %v1689_v23  ;;  %v8605_v23 = vld [vmem:[#allocation29_spill] sm:$0xff] }
 0x206   : > { %v6551_v48 = vpop.eup %6550  ;;  %v8607_v7 = vld [vmem:[#allocation17_spill] sm:$0xff] }
 0x207   : > { %v1848_v57 = vadd.f32 %v6403_v28, %v1847_v51  ;;  %v1872_v61 = vmul.f32 %v6551_v48, %v1871_v56  ;;  %v6553_v34 = vpop.eup %6552  ;;  %v8606_v56 = vld [vmem:[#allocation30_spill] sm:$0xff]  ;;  %v8608_v28 = vld [vmem:[#allocation31_spill] sm:$0xff]  ;;  %v8609_v51 = vld [vmem:[#allocation32_spill] sm:$0xff] }
 0x208   : > { %v1850_v15 = vsub.f32 1.0, %v6553_v34  ;;  %v1852_v32 = vmul.f32 %v6553_v34, %v7295_v40  ;;  %v8595_v40 = vld [vmem:[#allocation39_spill] sm:$0xff]  ;;  %v8610_v48 = vld [vmem:[#allocation18_spill] sm:$0xff] }
 0x209   : > { %6554 = vtanh.f32 %v1848_v57  ;;  %v7800_v55 = vadd.f32 %v1873_v6, %v1872_v61  ;;  %v8611_v57 = vld [vmem:[#allocation33_spill] sm:$0xff]  ;;  %v8612_v61 = vld [vmem:[#allocation34_spill] sm:$0xff]  ;;  %v8613_v6 = vld [vmem:[#allocation19_spill] sm:$0xff] }
 0x20a   : > { %v8614_v34 = vld [vmem:[#allocation35_spill] sm:$0xff] }
 0x213   : > { %v6555_v20 = vpop.eup %6554 }
 0x214   : > { %v1851_v30 = vmul.f32 %v6555_v20, %v1850_v15  ;;  %v8615_v15 = vld [vmem:[#allocation36_spill] sm:$0xff] }
 0x215   : > { %v8616_v20 = vld [vmem:[#allocation20_spill] sm:$0xff] }
 0x216   : > { %v7803_v41 = vadd.f32 %v1852_v32, %v1851_v30  ;;  %v8617_v30 = vld [vmem:[#allocation37_spill] sm:$0xff]  ;;  %v8618_v32 = vld [vmem:[#allocation38_spill] sm:$0xff] }
 0x218   : > { %1946 = vmatmul.mubr.f32.vlgmr.msra.gmra.mrb[34].mxu0 %v7803_v41  ;;  %4752 = vmatmul.mubr.f32.vlgmr.msra.gmra.mrb[38].mxu1 %v7803_v41 }
 0x219   : > { %5614 = vmatpush1.bf16.msra.mxu1 %v7297_v18  ;;  %5645 = vmatpush3.bf16.msra.mxu0 %v7438_v9 }
 0x21a   : > { %5616 = vmatprep.subr.bf16.mxu1 %v7300_v42  ;;  %5646 = vmatprep.subr.bf16.mxu0 %v8593_v8 }
 0x21b   : > { %2086 = vmatprep.mubr.f32.mxu1 %v8594_v0  ;;  %4786 = vmatprep.mubr.msk.f32.mxu0 %vm6841_vm4, %v8594_v0 }
 0x21d   : > { %5618 = vmatpush1.bf16.msra.mxu1 %v7309_v47  ;;  %5648 = vmatpush3.bf16.msra.mxu0 %v7463_v53 }
 0x21e   : > { %5620 = vmatprep.subr.bf16.mxu1 %v7313_v1  ;;  %5649 = vmatprep.subr.bf16.mxu0 %v8593_v8 }
 0x221   : > { %5622 = vmatpush1.bf16.msra.mxu1 %v7318_v46  ;;  %5651 = vmatpush3.bf16.msra.mxu0 %v7491_v31 }
 0x222   : > { %5624 = vmatprep.subr.bf16.mxu1 %v7321_v50  ;;  %5652 = vmatprep.subr.bf16.mxu0 %v8593_v8 }
 0x225   : > { %5626 = vmatpush1.bf16.msra.mxu1 %v7326_v49  ;;  %5654 = vmatpush3.bf16.msra.mxu0 %v7516_v12 }
 0x226   : > { %5628 = vmatprep.subr.bf16.mxu1 %v7329_v62  ;;  %5655 = vmatprep.subr.bf16.mxu0 %v8593_v8 }
 0x229   : > { %5630 = vmatpush1.bf16.msra.mxu1 %v7334_v3  ;;  %5657 = vmatpush3.bf16.msra.mxu0 %v7535_v44 }
 0x22a   : > { %5632 = vmatprep.subr.bf16.mxu1 %v7343_v17  ;;  %5658 = vmatprep.subr.bf16.mxu0 %v8593_v8 }
 0x22d   : > { %5634 = vmatpush1.bf16.msra.mxu1 %v7356_v38  ;;  %5660 = vmatpush3.bf16.msra.mxu0 %v7543_v59 }
 0x22e   : > { %5636 = vmatprep.subr.bf16.mxu1 %v7367_v24  ;;  %5661 = vmatprep.subr.bf16.mxu0 %v8593_v8 }
 0x231   : > { %5638 = vmatpush1.bf16.msra.mxu1 %v7383_v36  ;;  %5663 = vmatpush3.bf16.msra.mxu0 %v7551_v63 }
 0x232   : > { %5640 = vmatprep.subr.bf16.mxu1 %v7394_v10  ;;  %5664 = vmatprep.subr.bf16.mxu0 %v8593_v8 }
 0x235   : > { %5642 = vmatpush1.bf16.msra.mxu1 %v7410_v54  ;;  %5666 = vmatpush3.bf16.msra.mxu0 %v8595_v40 }
 0x236   : > { %5668 = vmatprep.subr.bf16.mxu0 %v8596_v5  ;;  %5699 = vmatprep.subr.bf16.mxu1 %v8593_v8 }
 0x238   : > { %2087 = vmatmul.mubr.f32.vlgmr.msra.gmra.mrb[40].mxu1 %v7800_v55  ;;  %4787 = vmatmul.mubr.f32.vlgmr.msra.gmra.mrb[36].mxu0 %v7800_v55 }
 0x239   : > { %5670 = vmatpush1.bf16.msra.mxu0 %v8597_v27  ;;  %5701 = vmatpush3.bf16.msra.mxu1 %v8598_v33 }
 0x23a   : > { %5672 = vmatprep.subr.bf16.mxu0 %v8599_v21  ;;  %5702 = vmatprep.subr.bf16.mxu1 %v8593_v8 }
 0x23b   : > { %2275 = vmatprep.mubr.f32.mxu0 %v8594_v0  ;;  %4821 = vmatprep.mubr.msk.f32.mxu1 %vm6841_vm4, %v8594_v0 }
 0x23d   : > { %5674 = vmatpush1.bf16.msra.mxu0 %v8600_v43  ;;  %5704 = vmatpush3.bf16.msra.mxu1 %v8601_v14 }
 0x23e   : > { %5676 = vmatprep.subr.bf16.mxu0 %v8602_v22  ;;  %5705 = vmatprep.subr.bf16.mxu1 %v8593_v8 }
 0x241   : > { %5678 = vmatpush1.bf16.msra.mxu0 %v8603_v16  ;;  %5707 = vmatpush3.bf16.msra.mxu1 %v8604_v13 }
 0x242   : > { %5680 = vmatprep.subr.bf16.mxu0 %v8605_v23  ;;  %5708 = vmatprep.subr.bf16.mxu1 %v8593_v8 }
 0x245   : > { %5682 = vmatpush1.bf16.msra.mxu0 %v8606_v56  ;;  %5710 = vmatpush3.bf16.msra.mxu1 %v8607_v7 }
 0x246   : > { %5684 = vmatprep.subr.bf16.mxu0 %v8608_v28  ;;  %5711 = vmatprep.subr.bf16.mxu1 %v8593_v8 }
 0x249   : > { %5686 = vmatpush1.bf16.msra.mxu0 %v8609_v51  ;;  %5713 = vmatpush3.bf16.msra.mxu1 %v8610_v48 }
 0x24a   : > { %5688 = vmatprep.subr.bf16.mxu0 %v8611_v57  ;;  %5714 = vmatprep.subr.bf16.mxu1 %v8593_v8 }
 0x24d   : > { %5690 = vmatpush1.bf16.msra.mxu0 %v8612_v61  ;;  %5716 = vmatpush3.bf16.msra.mxu1 %v8613_v6 }
 0x24e   : > { %5692 = vmatprep.subr.bf16.mxu0 %v8614_v34  ;;  %5717 = vmatprep.subr.bf16.mxu1 %v8593_v8 }
 0x251   : > { %5694 = vmatpush1.bf16.msra.mxu0 %v8615_v15  ;;  %5719 = vmatpush3.bf16.msra.mxu1 %v8616_v20 }
 0x252   : > { %5696 = vmatprep.subr.bf16.mxu0 %v8617_v30  ;;  %5720 = vmatprep.subr.bf16.mxu1 %v8593_v8 }
 0x255   : > { %5698 = vmatpush1.bf16.msra.mxu0 %v8618_v32  ;;  %5722 = vmatpush3.bf16.msra.mxu1 %v8619_v60 }
 0x256   : > { %5724 = vmatprep.subr.bf16.mxu1 %v8620_v4  ;;  %5755 = vmatprep.subr.bf16.mxu0 %v8593_v8 }
 0x2eb   : > { %v1947_v45 = vpop.f32.mrb[34].mxu0  ;;  %v2018_v39 = vpop.f32.mrb[38].mxu1 }
 0x2ec   : > { %v6350_v34 = vadd.f32 %v8621_v58, %v1947_v45  ;;  %v1949_v6 = vpop.f32.mrb[35].mxu0  ;;  %v4753_v15 = vpop.f32.mrb[39].mxu1  ;;  %v2019_v4 = vadd.f32 %v2018_v39, %v7793_v19 }
 0x2ed   : > { %v6354_v20 = vadd.f32 %v7640_v29, %v1949_v6 }
 0x2ee   : > { %v4342_v61 = vmul.f32 -1.442695, %v6350_v34 }
 0x2ef   : > { %v4343_v30 = vmul.f32 -1.442695, %v6354_v20 }
 0x2f0   : > { %6556 = vpow2.f32 %v4342_v61 }
 0x2f1   : > { %6558 = vpow2.f32 %v4343_v30 }
 0x2fa   : > { %v6557_v57 = vpop.eup %6556 }
 0x2fb   : > { %v2167_v32 = vadd.f32 1.0, %v6557_v57  ;;  %v6559_v60 = vpop.eup %6558 }
 0x2fc   : > { %v2174_v48 = vadd.f32 1.0, %v6559_v60 }
 0x2fd   : > { %6560 = vrcp.f32 %v2167_v32 }
 0x2fe   : > { %6562 = vrcp.f32 %v2174_v48 }
 0x307   : > { %v6561_v51 = vpop.eup %6560 }
 0x308   : > { %v2177_v28 = vmul.f32 %v6561_v51, %v2019_v4  ;;  %v6563_v39 = vpop.eup %6562 }
 0x309   : > { %v2180_v51 = vsub.f32 1.0, %v6563_v39 }
 0x30a   : > { %v2178_v58 = vadd.f32 %v7696_v52, %v2177_v28  ;;  %v2182_v28 = vmul.f32 %v6563_v39, %v7803_v41  ;;  %v8624_v39 = vld [vmem:[#allocation18_spill] sm:$0xff] }
 0x30b   : > { %v2088_v45 = vpop.f32.mrb[40].mxu1  ;;  %v2159_v15 = vpop.f32.mrb[36].mxu0 }
 0x30c   : > { %6564 = vtanh.f32 %v2178_v58  ;;  %v2089_v29 = vadd.f32 %v2088_v45, %v7755_v25  ;;  %v2090_v61 = vpop.f32.mrb[41].mxu1  ;;  %v4788_v6 = vpop.f32.mrb[37].mxu0  ;;  %v2160_v58 = vadd.f32 %v2159_v15, %v7787_v11 }
 0x30d   : > { %v2091_v34 = vadd.f32 %v2090_v61, %v7774_v2 }
 0x30e   : > { %v2184_v57 = vadd.f32 %v7723_v26, %v2089_v29 }
 0x30f   : > { %v2191_v60 = vadd.f32 %v7776_v35, %v2091_v34 }
 0x310   : > { %v4344_v20 = vmul.f32 -1.442695, %v2184_v57 }
 0x311   : > { %v4345_v4 = vmul.f32 -1.442695, %v2191_v60 }
 0x312   : > { %6566 = vpow2.f32 %v4344_v20  ;;  %v8623_v20 = vld [vmem:[#allocation32_spill] sm:$0xff] }
 0x313   : > { %6568 = vpow2.f32 %v4345_v4  ;;  %v8625_v4 = vld [vmem:[#allocation33_spill] sm:$0xff] }
 0x316   : > { %v6565_v48 = vpop.eup %6564 }
 0x317   : > { %v2181_v52 = vmul.f32 %v6565_v48, %v2180_v51  ;;  %v8626_v51 = vld [vmem:[#allocation34_spill] sm:$0xff]  ;;  %v8627_v48 = vld [vmem:[#allocation19_spill] sm:$0xff] }
 0x319   : > { %v7888_v30 = vadd.f32 %v2182_v28, %v2181_v52  ;;  %v8628_v52 = vld [vmem:[#allocation35_spill] sm:$0xff]  ;;  %v8629_v28 = vld [vmem:[#allocation36_spill] sm:$0xff] }
 0x31b   : > { %2276 = vmatmul.mubr.f32.vlgmr.msra.gmra.mrb[38].mxu0 %v7888_v30  ;;  %4822 = vmatmul.mubr.f32.vlgmr.msra.gmra.mrb[42].mxu1 %v7888_v30 }
 0x31c   : > { %v6567_v32 = vpop.eup %6566  ;;  %5726 = vmatpush1.bf16.msra.mxu1 %v7297_v18  ;;  %5757 = vmatpush3.bf16.msra.mxu0 %v7438_v9 }
 0x31d   : > { %v2188_v26 = vadd.f32 1.0, %v6567_v32  ;;  %5728 = vmatprep.subr.bf16.mxu1 %v7300_v42  ;;  %5758 = vmatprep.subr.bf16.mxu0 %v8593_v8  ;;  %v6569_v35 = vpop.eup %6568  ;;  %v8630_v32 = vld [vmem:[#allocation20_spill] sm:$0xff] }
 0x31e   : > { %2416 = vmatprep.mubr.f32.mxu1 %v8594_v0  ;;  %4856 = vmatprep.mubr.msk.f32.mxu0 %vm6841_vm4, %v8594_v0  ;;  %v2195_v41 = vadd.f32 1.0, %v6569_v35  ;;  %v8632_v35 = vld [vmem:[#allocation38_spill] sm:$0xff] }
 0x31f   : > { %6570 = vrcp.f32 %v2188_v26  ;;  %v8631_v26 = vld [vmem:[#allocation37_spill] sm:$0xff] }
 0x320   : > { %5730 = vmatpush1.bf16.msra.mxu1 %v7309_v47  ;;  %5760 = vmatpush3.bf16.msra.mxu0 %v7463_v53  ;;  %6572 = vrcp.f32 %v2195_v41  ;;  %v8633_v41 = vld [vmem:[#allocation21_spill] sm:$0xff] }
 0x321   : > { %5732 = vmatprep.subr.bf16.mxu1 %v7313_v1  ;;  %5761 = vmatprep.subr.bf16.mxu0 %v8593_v8 }
 0x324   : > { %5734 = vmatpush1.bf16.msra.mxu1 %v7318_v46  ;;  %5763 = vmatpush3.bf16.msra.mxu0 %v7491_v31 }
 0x325   : > { %5736 = vmatprep.subr.bf16.mxu1 %v7321_v50  ;;  %5764 = vmatprep.subr.bf16.mxu0 %v8593_v8 }
 0x328   : > { %5738 = vmatpush1.bf16.msra.mxu1 %v7326_v49  ;;  %5766 = vmatpush3.bf16.msra.mxu0 %v7516_v12 }
 0x329   : > { %v6571_v45 = vpop.eup %6570  ;;  %5740 = vmatprep.subr.bf16.mxu1 %v7329_v62  ;;  %5767 = vmatprep.subr.bf16.mxu0 %v8593_v8 }
 0x32a   : > { %v2198_v29 = vmul.f32 %v6571_v45, %v2160_v58  ;;  %v6573_v15 = vpop.eup %6572  ;;  %v8634_v58 = vld [vmem:[#allocation22_spill] sm:$0xff] }
 0x32b   : > { %v2203_v57 = vmul.f32 %v6573_v15, %v7800_v55  ;;  %v8622_v55 = vld [vmem:[#allocation31_spill] sm:$0xff] }
 0x32c   : > { %v2199_v61 = vadd.f32 %v7779_v37, %v2198_v29  ;;  %5742 = vmatpush1.bf16.msra.mxu1 %v7334_v3  ;;  %5769 = vmatpush3.bf16.msra.mxu0 %v7535_v44  ;;  %v2201_v37 = vsub.f32 1.0, %v6573_v15 }
 0x32d   : > { %5744 = vmatprep.subr.bf16.mxu1 %v7343_v17  ;;  %5770 = vmatprep.subr.bf16.mxu0 %v8593_v8 }
 0x32e   : > { %6574 = vtanh.f32 %v2199_v61  ;;  %v8635_v61 = vld [vmem:[#allocation41_spill] sm:$0xff] }
 0x330   : > { %5746 = vmatpush1.bf16.msra.mxu1 %v7356_v38  ;;  %5772 = vmatpush3.bf16.msra.mxu0 %v7543_v59 }
 0x331   : > { %5748 = vmatprep.subr.bf16.mxu1 %v7367_v24  ;;  %5773 = vmatprep.subr.bf16.mxu0 %v8593_v8 }
 0x334   : > { %5750 = vmatpush1.bf16.msra.mxu1 %v7383_v36  ;;  %5775 = vmatpush3.bf16.msra.mxu0 %v7551_v63 }
 0x335   : > { %5752 = vmatprep.subr.bf16.mxu1 %v7394_v10  ;;  %5776 = vmatprep.subr.bf16.mxu0 %v8593_v8 }
 0x338   : > { %v6575_v6 = vpop.eup %6574  ;;  %5754 = vmatpush1.bf16.msra.mxu1 %v7410_v54  ;;  %5778 = vmatpush3.bf16.msra.mxu0 %v8595_v40 }
 0x339   : > { %v2202_v34 = vmul.f32 %v6575_v6, %v2201_v37  ;;  %5780 = vmatprep.subr.bf16.mxu0 %v8596_v5  ;;  %5811 = vmatprep.subr.bf16.mxu1 %v8593_v8 }
 0x33b   : > { %v7930_v60 = vadd.f32 %v2203_v57, %v2202_v34  ;;  %v8636_v34 = vld [vmem:[#allocation42_spill] sm:$0xff] }
 0x33d   : > { %2417 = vmatmul.mubr.f32.vlgmr.msra.gmra.mrb[44].mxu1 %v7930_v60  ;;  %4857 = vmatmul.mubr.f32.vlgmr.msra.gmra.mrb[40].mxu0 %v7930_v60 }
 0x33e   : > { %5782 = vmatpush1.bf16.msra.mxu0 %v8597_v27  ;;  %5813 = vmatpush3.bf16.msra.mxu1 %v8598_v33 }
 0x33f   : > { %5784 = vmatprep.subr.bf16.mxu0 %v8599_v21  ;;  %5814 = vmatprep.subr.bf16.mxu1 %v8593_v8 }
 0x340   : > { %2605 = vmatprep.mubr.f32.mxu0 %v8594_v0  ;;  %4891 = vmatprep.mubr.msk.f32.mxu1 %vm6841_vm4, %v8594_v0 }
 0x342   : > { %5786 = vmatpush1.bf16.msra.mxu0 %v8600_v43  ;;  %5816 = vmatpush3.bf16.msra.mxu1 %v8601_v14 }
 0x343   : > { %5788 = vmatprep.subr.bf16.mxu0 %v8602_v22  ;;  %5817 = vmatprep.subr.bf16.mxu1 %v8593_v8 }
 0x346   : > { %5790 = vmatpush1.bf16.msra.mxu0 %v8603_v16  ;;  %5819 = vmatpush3.bf16.msra.mxu1 %v8604_v13 }
 0x347   : > { %5792 = vmatprep.subr.bf16.mxu0 %v8605_v23  ;;  %5820 = vmatprep.subr.bf16.mxu1 %v8593_v8 }
 0x34a   : > { %5794 = vmatpush1.bf16.msra.mxu0 %v8606_v56  ;;  %5822 = vmatpush3.bf16.msra.mxu1 %v8607_v7 }
 0x34b   : > { %5796 = vmatprep.subr.bf16.mxu0 %v8622_v55  ;;  %5823 = vmatprep.subr.bf16.mxu1 %v8593_v8 }
 0x34e   : > { %5798 = vmatpush1.bf16.msra.mxu0 %v8623_v20  ;;  %5825 = vmatpush3.bf16.msra.mxu1 %v8624_v39 }
 0x34f   : > { %5800 = vmatprep.subr.bf16.mxu0 %v8625_v4  ;;  %5826 = vmatprep.subr.bf16.mxu1 %v8593_v8  ;;  %v8637_v4 = vld [vmem:[#allocation55_spill] sm:$0xff] }
 0x352   : > { %5802 = vmatpush1.bf16.msra.mxu0 %v8626_v51  ;;  %5828 = vmatpush3.bf16.msra.mxu1 %v8627_v48 }
 0x353   : > { %5804 = vmatprep.subr.bf16.mxu0 %v8628_v52  ;;  %5829 = vmatprep.subr.bf16.mxu1 %v8593_v8 }
 0x356   : > { %5806 = vmatpush1.bf16.msra.mxu0 %v8629_v28  ;;  %5831 = vmatpush3.bf16.msra.mxu1 %v8630_v32 }
 0x357   : > { %5808 = vmatprep.subr.bf16.mxu0 %v8631_v26  ;;  %5832 = vmatprep.subr.bf16.mxu1 %v8593_v8 }
 0x35a   : > { %5810 = vmatpush1.bf16.msra.mxu0 %v8632_v35  ;;  %5834 = vmatpush3.bf16.msra.mxu1 %v8633_v41 }
 0x35b   : > { %5836 = vmatprep.subr.bf16.mxu1 %v8634_v58  ;;  %5867 = vmatprep.subr.bf16.mxu0 %v8593_v8 }
 0x3ee   : > { %v2277_v45 = vpop.f32.mrb[38].mxu0  ;;  %v2348_v29 = vpop.f32.mrb[42].mxu1 }
 0x3ef   : > { %v6358_v15 = vadd.f32 %v8635_v61, %v2277_v45  ;;  %v2279_v37 = vpop.f32.mrb[39].mxu0  ;;  %v4823_v6 = vpop.f32.mrb[43].mxu1  ;;  %v2349_v58 = vadd.f32 %v2348_v29, %v7793_v19 }
 0x3f0   : > { %v6362_v57 = vadd.f32 %v8636_v34, %v2279_v37  ;;  %v8639_v34 = vld [vmem:[#allocation75_spill] sm:$0xff] }
 0x3f1   : > { %v4346_v32 = vmul.f32 -1.442695, %v6358_v15 }
 0x3f2   : > { %v4347_v26 = vmul.f32 -1.442695, %v6362_v57 }
 0x3f3   : > { %6576 = vpow2.f32 %v4346_v32 }
 0x3f4   : > { %6578 = vpow2.f32 %v4347_v26 }
 0x3fd   : > { %v6577_v28 = vpop.eup %6576 }
 0x3fe   : > { %v2497_v35 = vadd.f32 1.0, %v6577_v28  ;;  %v6579_v41 = vpop.eup %6578  ;;  %v8638_v28 = vld [vmem:[#allocation62_spill] sm:$0xff] }
 0x3ff   : > { %v2504_v52 = vadd.f32 1.0, %v6579_v41 }
 0x400   : > { %6580 = vrcp.f32 %v2497_v35 }
 0x401   : > { %6582 = vrcp.f32 %v2504_v52 }
 0x40a   : > { %v6581_v48 = vpop.eup %6580 }
 0x40b   : > { %v2507_v51 = vmul.f32 %v6581_v48, %v2349_v58  ;;  %v6583_v57 = vpop.eup %6582 }
 0x40c   : > { %v2510_v48 = vsub.f32 1.0, %v6583_v57 }
 0x40d   : > { %v2508_v45 = vadd.f32 %v8637_v4, %v2507_v51  ;;  %v2512_v51 = vmul.f32 %v6583_v57, %v7888_v30 }
 0x40f   : > { %6584 = vtanh.f32 %v2508_v45 }
 0x410   : > { %v2418_v61 = vpop.f32.mrb[44].mxu1  ;;  %v2489_v6 = vpop.f32.mrb[40].mxu0 }
 0x411   : > { %v2419_v15 = vadd.f32 %v2418_v61, %v7755_v25  ;;  %v2420_v32 = vpop.f32.mrb[45].mxu1  ;;  %v4858_v37 = vpop.f32.mrb[41].mxu0 }
 0x412   : > { %v2421_v26 = vadd.f32 %v2420_v32, %v7774_v2  ;;  %v2490_v37 = vadd.f32 %v2489_v6, %v7787_v11 }
 0x413   : > { %v2514_v35 = vadd.f32 %v8638_v28, %v2419_v15 }
 0x414   : > { %v2521_v41 = vadd.f32 %v8639_v34, %v2421_v26 }
 0x415   : > { %v4348_v29 = vmul.f32 -1.442695, %v2514_v35  ;;  %v8640_v35 = vld [vmem:[#allocation76_spill] sm:$0xff] }
 0x416   : > { %v4349_v58 = vmul.f32 -1.442695, %v2521_v41 }
 0x417   : > { %6586 = vpow2.f32 %v4348_v29 }
 0x418   : > { %6588 = vpow2.f32 %v4349_v58  ;;  %v8642_v58 = vld [vmem:[#allocation34_spill] sm:$0xff] }
 0x419   : > { %v6585_v52 = vpop.eup %6584 }
 0x41a   : > { %v2511_v4 = vmul.f32 %v6585_v52, %v2510_v48 }
 0x41c   : > { %v7978_v45 = vadd.f32 %v2512_v51, %v2511_v4  ;;  %v8643_v4 = vld [vmem:[#allocation19_spill] sm:$0xff] }
 0x41d   : > { %v8644_v51 = vld [vmem:[#allocation35_spill] sm:$0xff] }
 0x41e   : > { %2606 = vmatmul.mubr.f32.vlgmr.msra.gmra.mrb[42].mxu0 %v7978_v45  ;;  %4892 = vmatmul.mubr.f32.vlgmr.msra.gmra.mrb[46].mxu1 %v7978_v45 }
 0x41f   : > { %5838 = vmatpush1.bf16.msra.mxu1 %v7297_v18  ;;  %5869 = vmatpush3.bf16.msra.mxu0 %v7438_v9 }
 0x420   : > { %5840 = vmatprep.subr.bf16.mxu1 %v7300_v42  ;;  %5870 = vmatprep.subr.bf16.mxu0 %v8593_v8 }
 0x421   : > { %v6587_v61 = vpop.eup %6586  ;;  %2746 = vmatprep.mubr.f32.mxu1 %v8594_v0  ;;  %4926 = vmatprep.mubr.msk.f32.mxu0 %vm6841_vm4, %v8594_v0 }
 0x422   : > { %v2518_v30 = vadd.f32 1.0, %v6587_v61  ;;  %v6589_v15 = vpop.eup %6588  ;;  %v8645_v61 = vld [vmem:[#allocation36_spill] sm:$0xff] }
 0x423   : > { %5842 = vmatpush1.bf16.msra.mxu1 %v7309_v47  ;;  %5872 = vmatpush3.bf16.msra.mxu0 %v7463_v53  ;;  %v2525_v32 = vadd.f32 1.0, %v6589_v15  ;;  %v8647_v15 = vld [vmem:[#allocation37_spill] sm:$0xff] }
 0x424   : > { %6590 = vrcp.f32 %v2518_v30  ;;  %5844 = vmatprep.subr.bf16.mxu1 %v7313_v1  ;;  %5873 = vmatprep.subr.bf16.mxu0 %v8593_v8  ;;  %v8646_v30 = vld [vmem:[#allocation20_spill] sm:$0xff] }
 0x425   : > { %6592 = vrcp.f32 %v2525_v32  ;;  %v8648_v32 = vld [vmem:[#allocation38_spill] sm:$0xff] }
 0x427   : > { %5846 = vmatpush1.bf16.msra.mxu1 %v7318_v46  ;;  %5875 = vmatpush3.bf16.msra.mxu0 %v7491_v31 }
 0x428   : > { %5848 = vmatprep.subr.bf16.mxu1 %v7321_v50  ;;  %5876 = vmatprep.subr.bf16.mxu0 %v8593_v8 }
 0x42b   : > { %5850 = vmatpush1.bf16.msra.mxu1 %v7326_v49  ;;  %5878 = vmatpush3.bf16.msra.mxu0 %v7516_v12 }
 0x42c   : > { %5852 = vmatprep.subr.bf16.mxu1 %v7329_v62  ;;  %5879 = vmatprep.subr.bf16.mxu0 %v8593_v8 }
 0x42e   : > { %v6591_v26 = vpop.eup %6590 }
 0x42f   : > { %v2528_v28 = vmul.f32 %v6591_v26, %v2490_v37  ;;  %5854 = vmatpush1.bf16.msra.mxu1 %v7334_v3  ;;  %5881 = vmatpush3.bf16.msra.mxu0 %v7535_v44  ;;  %v6593_v6 = vpop.eup %6592  ;;  %v8649_v37 = vld [vmem:[#allocation21_spill] sm:$0xff]  ;;  %v8650_v26 = vld [vmem:[#allocation22_spill] sm:$0xff] }
 0x430   : > { %5856 = vmatprep.subr.bf16.mxu1 %v7343_v17  ;;  %5882 = vmatprep.subr.bf16.mxu0 %v8593_v8  ;;  %v2531_v41 = vsub.f32 1.0, %v6593_v6  ;;  %v2533_v48 = vmul.f32 %v6593_v6, %v7930_v60  ;;  %v8641_v60 = vld [vmem:[#allocation33_spill] sm:$0xff] }
 0x431   : > { %v2529_v34 = vadd.f32 %v8640_v35, %v2528_v28 }
 0x433   : > { %6594 = vtanh.f32 %v2529_v34  ;;  %5858 = vmatpush1.bf16.msra.mxu1 %v7356_v38  ;;  %5884 = vmatpush3.bf16.msra.mxu0 %v7543_v59  ;;  %v8651_v34 = vld [vmem:[#allocation43_spill] sm:$0xff] }
 0x434   : > { %5860 = vmatprep.subr.bf16.mxu1 %v7367_v24  ;;  %5885 = vmatprep.subr.bf16.mxu0 %v8593_v8 }
 0x437   : > { %5862 = vmatpush1.bf16.msra.mxu1 %v7383_v36  ;;  %5887 = vmatpush3.bf16.msra.mxu0 %v7551_v63 }
 0x438   : > { %5864 = vmatprep.subr.bf16.mxu1 %v7394_v10  ;;  %5888 = vmatprep.subr.bf16.mxu0 %v8593_v8 }
 0x43b   : > { %5866 = vmatpush1.bf16.msra.mxu1 %v7410_v54  ;;  %5890 = vmatpush3.bf16.msra.mxu0 %v8595_v40 }
 0x43c   : > { %5892 = vmatprep.subr.bf16.mxu0 %v8596_v5  ;;  %5923 = vmatprep.subr.bf16.mxu1 %v8593_v8 }
 0x43d   : > { %v6595_v57 = vpop.eup %6594 }
 0x43e   : > { %v2532_v29 = vmul.f32 %v6595_v57, %v2531_v41 }
 0x440   : > { %v8020_v52 = vadd.f32 %v2533_v48, %v2532_v29  ;;  %v8652_v29 = vld [vmem:[#allocation44_spill] sm:$0xff] }
 0x442   : > { %2747 = vmatmul.mubr.f32.vlgmr.msra.gmra.mrb[48].mxu1 %v8020_v52  ;;  %4927 = vmatmul.mubr.f32.vlgmr.msra.gmra.mrb[44].mxu0 %v8020_v52 }
 0x443   : > { %5894 = vmatpush1.bf16.msra.mxu0 %v8597_v27  ;;  %5925 = vmatpush3.bf16.msra.mxu1 %v8598_v33 }
 0x444   : > { %5896 = vmatprep.subr.bf16.mxu0 %v8599_v21  ;;  %5926 = vmatprep.subr.bf16.mxu1 %v8593_v8 }
 0x445   : > { %2935 = vmatprep.mubr.f32.mxu0 %v8594_v0  ;;  %4961 = vmatprep.mubr.msk.f32.mxu1 %vm6841_vm4, %v8594_v0 }
 0x447   : > { %5898 = vmatpush1.bf16.msra.mxu0 %v8600_v43  ;;  %5928 = vmatpush3.bf16.msra.mxu1 %v8601_v14 }
 0x448   : > { %5900 = vmatprep.subr.bf16.mxu0 %v8602_v22  ;;  %5929 = vmatprep.subr.bf16.mxu1 %v8593_v8 }
 0x44b   : > { %5902 = vmatpush1.bf16.msra.mxu0 %v8603_v16  ;;  %5931 = vmatpush3.bf16.msra.mxu1 %v8604_v13 }
 0x44c   : > { %5904 = vmatprep.subr.bf16.mxu0 %v8605_v23  ;;  %5932 = vmatprep.subr.bf16.mxu1 %v8593_v8 }
 0x44f   : > { %5906 = vmatpush1.bf16.msra.mxu0 %v8606_v56  ;;  %5934 = vmatpush3.bf16.msra.mxu1 %v8607_v7 }
 0x450   : > { %5908 = vmatprep.subr.bf16.mxu0 %v8622_v55  ;;  %5935 = vmatprep.subr.bf16.mxu1 %v8593_v8 }
 0x453   : > { %5910 = vmatpush1.bf16.msra.mxu0 %v8623_v20  ;;  %5937 = vmatpush3.bf16.msra.mxu1 %v8624_v39 }
 0x454   : > { %5912 = vmatprep.subr.bf16.mxu0 %v8641_v60  ;;  %5938 = vmatprep.subr.bf16.mxu1 %v8593_v8  ;;  %v8653_v60 = vld [vmem:[#allocation57_spill] sm:$0xff] }
 0x457   : > { %5914 = vmatpush1.bf16.msra.mxu0 %v8642_v58  ;;  %5940 = vmatpush3.bf16.msra.mxu1 %v8643_v4 }
 0x458   : > { %5916 = vmatprep.subr.bf16.mxu0 %v8644_v51  ;;  %5941 = vmatprep.subr.bf16.mxu1 %v8593_v8 }
 0x45b   : > { %5918 = vmatpush1.bf16.msra.mxu0 %v8645_v61  ;;  %5943 = vmatpush3.bf16.msra.mxu1 %v8646_v30 }
 0x45c   : > { %5920 = vmatprep.subr.bf16.mxu0 %v8647_v15  ;;  %5944 = vmatprep.subr.bf16.mxu1 %v8593_v8 }
 0x45f   : > { %5922 = vmatpush1.bf16.msra.mxu0 %v8648_v32  ;;  %5946 = vmatpush3.bf16.msra.mxu1 %v8649_v37 }
 0x460   : > { %5948 = vmatprep.subr.bf16.mxu1 %v8650_v26  ;;  %5979 = vmatprep.subr.bf16.mxu0 %v8593_v8 }
 0x4f1   : > { %v2607_v28 = vpop.f32.mrb[42].mxu0  ;;  %v2678_v35 = vpop.f32.mrb[46].mxu1 }
 0x4f2   : > { %v6366_v6 = vadd.f32 %v8651_v34, %v2607_v28  ;;  %v2609_v41 = vpop.f32.mrb[43].mxu0  ;;  %v4893_v57 = vpop.f32.mrb[47].mxu1  ;;  %v2679_v26 = vadd.f32 %v2678_v35, %v7793_v19 }
 0x4f3   : > { %v6370_v48 = vadd.f32 %v8652_v29, %v2609_v41 }
 0x4f4   : > { %v4350_v30 = vmul.f32 -1.442695, %v6366_v6 }
 0x4f5   : > { %v4351_v15 = vmul.f32 -1.442695, %v6370_v48 }
 0x4f6   : > { %6596 = vpow2.f32 %v4350_v30 }
 0x4f7   : > { %6598 = vpow2.f32 %v4351_v15 }
 0x500   : > { %v6597_v61 = vpop.eup %6596 }
 0x501   : > { %v2827_v32 = vadd.f32 1.0, %v6597_v61  ;;  %v6599_v37 = vpop.eup %6598 }
 0x502   : > { %v2834_v51 = vadd.f32 1.0, %v6599_v37  ;;  %v8655_v37 = vld [vmem:[#allocation73_spill] sm:$0xff] }
 0x503   : > { %6600 = vrcp.f32 %v2827_v32  ;;  %v8654_v32 = vld [vmem:[#allocation60_spill] sm:$0xff] }
 0x504   : > { %6602 = vrcp.f32 %v2834_v51 }
 0x50d   : > { %v6601_v4 = vpop.eup %6600 }
 0x50e   : > { %v2837_v58 = vmul.f32 %v6601_v4, %v2679_v26  ;;  %v6603_v61 = vpop.eup %6602 }
 0x50f   : > { %v2840_v19 = vsub.f32 1.0, %v6603_v61 }
 0x510   : > { %v2838_v28 = vadd.f32 %v8653_v60, %v2837_v58  ;;  %v2842_v60 = vmul.f32 %v6603_v61, %v7978_v45 }
 0x512   : > { %6604 = vtanh.f32 %v2838_v28 }
 0x515   : > { %v2748_v34 = vpop.f32.mrb[48].mxu1  ;;  %v2819_v57 = vpop.f32.mrb[44].mxu0 }
 0x516   : > { %v2749_v6 = vadd.f32 %v2748_v34, %v7755_v25  ;;  %v2750_v30 = vpop.f32.mrb[49].mxu1  ;;  %v4928_v41 = vpop.f32.mrb[45].mxu0 }
 0x517   : > { %v2751_v15 = vadd.f32 %v2750_v30, %v7774_v2 }
 0x518   : > { %v2844_v29 = vadd.f32 %v8654_v32, %v2749_v6  ;;  %v2820_v6 = vadd.f32 %v2819_v57, %v7787_v11 }
 0x519   : > { %v2851_v48 = vadd.f32 %v8655_v37, %v2751_v15  ;;  %v8656_v15 = vld [vmem:[#allocation74_spill] sm:$0xff] }
 0x51a   : > { %v4352_v35 = vmul.f32 -1.442695, %v2844_v29 }
 0x51b   : > { %v4353_v58 = vmul.f32 -1.442695, %v2851_v48 }
 0x51c   : > { %v6605_v4 = vpop.eup %6604  ;;  %6606 = vpow2.f32 %v4352_v35 }
 0x51d   : > { %v2841_v51 = vmul.f32 %v6605_v4, %v2840_v19  ;;  %6608 = vpow2.f32 %v4353_v58  ;;  %v8658_v4 = vld [vmem:[#allocation34_spill] sm:$0xff]  ;;  %v8661_v58 = vld [vmem:[#allocation36_spill] sm:$0xff] }
 0x51f   : > { %v8068_v26 = vadd.f32 %v2842_v60, %v2841_v51  ;;  %v8659_v51 = vld [vmem:[#allocation19_spill] sm:$0xff] }
 0x520   : > { %v8660_v60 = vld [vmem:[#allocation35_spill] sm:$0xff] }
 0x521   : > { %2936 = vmatmul.mubr.f32.vlgmr.msra.gmra.mrb[46].mxu0 %v8068_v26  ;;  %4962 = vmatmul.mubr.f32.vlgmr.msra.gmra.mrb[50].mxu1 %v8068_v26 }
 0x522   : > { %5950 = vmatpush1.bf16.msra.mxu1 %v7297_v18  ;;  %5981 = vmatpush3.bf16.msra.mxu0 %v7438_v9 }
 0x523   : > { %5952 = vmatprep.subr.bf16.mxu1 %v7300_v42  ;;  %5982 = vmatprep.subr.bf16.mxu0 %v8593_v8 }
 0x524   : > { %3076 = vmatprep.mubr.f32.mxu1 %v8594_v0  ;;  %4996 = vmatprep.mubr.msk.f32.mxu0 %vm6841_vm4, %v8594_v0 }
 0x526   : > { %v6607_v19 = vpop.eup %6606  ;;  %5954 = vmatpush1.bf16.msra.mxu1 %v7309_v47  ;;  %5984 = vmatpush3.bf16.msra.mxu0 %v7463_v53 }
 0x527   : > { %v2848_v45 = vadd.f32 1.0, %v6607_v19  ;;  %5956 = vmatprep.subr.bf16.mxu1 %v7313_v1  ;;  %5985 = vmatprep.subr.bf16.mxu0 %v8593_v8  ;;  %v6609_v28 = vpop.eup %6608  ;;  %v8662_v19 = vld [vmem:[#allocation20_spill] sm:$0xff] }
 0x528   : > { %v2855_v34 = vadd.f32 1.0, %v6609_v28  ;;  %v8664_v28 = vld [vmem:[#allocation38_spill] sm:$0xff] }
 0x529   : > { %6610 = vrcp.f32 %v2848_v45  ;;  %v8663_v45 = vld [vmem:[#allocation37_spill] sm:$0xff] }
 0x52a   : > { %5958 = vmatpush1.bf16.msra.mxu1 %v7318_v46  ;;  %5987 = vmatpush3.bf16.msra.mxu0 %v7491_v31  ;;  %6612 = vrcp.f32 %v2855_v34  ;;  %v8665_v34 = vld [vmem:[#allocation21_spill] sm:$0xff] }
 0x52b   : > { %5960 = vmatprep.subr.bf16.mxu1 %v7321_v50  ;;  %5988 = vmatprep.subr.bf16.mxu0 %v8593_v8 }
 0x52e   : > { %5962 = vmatpush1.bf16.msra.mxu1 %v7326_v49  ;;  %5990 = vmatpush3.bf16.msra.mxu0 %v7516_v12 }
 0x52f   : > { %5964 = vmatprep.subr.bf16.mxu1 %v7329_v62  ;;  %5991 = vmatprep.subr.bf16.mxu0 %v8593_v8 }
 0x532   : > { %5966 = vmatpush1.bf16.msra.mxu1 %v7334_v3  ;;  %5993 = vmatpush3.bf16.msra.mxu0 %v7535_v44 }
 0x533   : > { %v6611_v30 = vpop.eup %6610  ;;  %5968 = vmatprep.subr.bf16.mxu1 %v7343_v17  ;;  %5994 = vmatprep.subr.bf16.mxu0 %v8593_v8 }
 0x534   : > { %v2858_v41 = vmul.f32 %v6611_v30, %v2820_v6  ;;  %v6613_v57 = vpop.eup %6612  ;;  %v8666_v6 = vld [vmem:[#allocation22_spill] sm:$0xff] }
 0x535   : > { %v2861_v32 = vsub.f32 1.0, %v6613_v57  ;;  %v2863_v48 = vmul.f32 %v6613_v57, %v8020_v52  ;;  %v8657_v52 = vld [vmem:[#allocation33_spill] sm:$0xff] }
 0x536   : > { %v2859_v61 = vadd.f32 %v8656_v15, %v2858_v41  ;;  %5970 = vmatpush1.bf16.msra.mxu1 %v7356_v38  ;;  %5996 = vmatpush3.bf16.msra.mxu0 %v7543_v59  ;;  %v8667_v15 = vld [vmem:[#allocation45_spill] sm:$0xff] }
 0x537   : > { %5972 = vmatprep.subr.bf16.mxu1 %v7367_v24  ;;  %5997 = vmatprep.subr.bf16.mxu0 %v8593_v8 }
 0x538   : > { %6614 = vtanh.f32 %v2859_v61 }
 0x53a   : > { %5974 = vmatpush1.bf16.msra.mxu1 %v7383_v36  ;;  %5999 = vmatpush3.bf16.msra.mxu0 %v7551_v63 }
 0x53b   : > { %5976 = vmatprep.subr.bf16.mxu1 %v7394_v10  ;;  %6000 = vmatprep.subr.bf16.mxu0 %v8593_v8 }
 0x53e   : > { %5978 = vmatpush1.bf16.msra.mxu1 %v7410_v54  ;;  %6002 = vmatpush3.bf16.msra.mxu0 %v8595_v40 }
 0x53f   : > { %6004 = vmatprep.subr.bf16.mxu0 %v8596_v5  ;;  %6035 = vmatprep.subr.bf16.mxu1 %v8593_v8 }
 0x542   : > { %v6615_v29 = vpop.eup %6614 }
 0x543   : > { %v2862_v37 = vmul.f32 %v6615_v29, %v2861_v32  ;;  %v8668_v29 = vld [vmem:[#allocation46_spill] sm:$0xff] }
 0x545   : > { %v8110_v35 = vadd.f32 %v2863_v48, %v2862_v37 }
 0x547   : > { %3077 = vmatmul.mubr.f32.vlgmr.msra.gmra.mrb[52].mxu1 %v8110_v35  ;;  %4997 = vmatmul.mubr.f32.vlgmr.msra.gmra.mrb[48].mxu0 %v8110_v35 }
 0x548   : > { %6006 = vmatpush1.bf16.msra.mxu0 %v8597_v27  ;;  %6037 = vmatpush3.bf16.msra.mxu1 %v8598_v33 }
 0x549   : > { %6008 = vmatprep.subr.bf16.mxu0 %v8599_v21  ;;  %6038 = vmatprep.subr.bf16.mxu1 %v8593_v8 }
 0x54a   : > { %3265 = vmatprep.mubr.f32.mxu0 %v8594_v0  ;;  %5031 = vmatprep.mubr.msk.f32.mxu1 %vm6841_vm4, %v8594_v0 }
 0x54c   : > { %6010 = vmatpush1.bf16.msra.mxu0 %v8600_v43  ;;  %6040 = vmatpush3.bf16.msra.mxu1 %v8601_v14 }
 0x54d   : > { %6012 = vmatprep.subr.bf16.mxu0 %v8602_v22  ;;  %6041 = vmatprep.subr.bf16.mxu1 %v8593_v8 }
 0x550   : > { %6014 = vmatpush1.bf16.msra.mxu0 %v8603_v16  ;;  %6043 = vmatpush3.bf16.msra.mxu1 %v8604_v13 }
 0x551   : > { %6016 = vmatprep.subr.bf16.mxu0 %v8605_v23  ;;  %6044 = vmatprep.subr.bf16.mxu1 %v8593_v8 }
 0x554   : > { %6018 = vmatpush1.bf16.msra.mxu0 %v8606_v56  ;;  %6046 = vmatpush3.bf16.msra.mxu1 %v8607_v7 }
 0x555   : > { %6020 = vmatprep.subr.bf16.mxu0 %v8622_v55  ;;  %6047 = vmatprep.subr.bf16.mxu1 %v8593_v8 }
 0x558   : > { %6022 = vmatpush1.bf16.msra.mxu0 %v8623_v20  ;;  %6049 = vmatpush3.bf16.msra.mxu1 %v8624_v39 }
 0x559   : > { %6024 = vmatprep.subr.bf16.mxu0 %v8657_v52  ;;  %6050 = vmatprep.subr.bf16.mxu1 %v8593_v8  ;;  %v8670_v52 = vld [vmem:[#allocation59_spill] sm:$0xff] }
 0x55c   : > { %6026 = vmatpush1.bf16.msra.mxu0 %v8658_v4  ;;  %6052 = vmatpush3.bf16.msra.mxu1 %v8659_v51 }
 0x55d   : > { %6028 = vmatprep.subr.bf16.mxu0 %v8660_v60  ;;  %6053 = vmatprep.subr.bf16.mxu1 %v8593_v8 }
 0x560   : > { %6030 = vmatpush1.bf16.msra.mxu0 %v8661_v58  ;;  %6055 = vmatpush3.bf16.msra.mxu1 %v8662_v19 }
 0x561   : > { %6032 = vmatprep.subr.bf16.mxu0 %v8663_v45  ;;  %6056 = vmatprep.subr.bf16.mxu1 %v8593_v8 }
 0x564   : > { %6034 = vmatpush1.bf16.msra.mxu0 %v8664_v28  ;;  %6058 = vmatpush3.bf16.msra.mxu1 %v8665_v34 }
 0x565   : > { %6060 = vmatprep.subr.bf16.mxu1 %v8666_v6  ;;  %6091 = vmatprep.subr.bf16.mxu0 %v8593_v8  ;;  %v8669_v6 = vld [vmem:[#allocation77_spill] sm:$0xff] }
 0x5f4   : > { %v2937_v30 = vpop.f32.mrb[46].mxu0  ;;  %v3008_v41 = vpop.f32.mrb[50].mxu1 }
 0x5f5   : > { %v6374_v61 = vadd.f32 %v8667_v15, %v2937_v30  ;;  %v2939_v57 = vpop.f32.mrb[47].mxu0  ;;  %v4963_v32 = vpop.f32.mrb[51].mxu1  ;;  %v3009_v60 = vadd.f32 %v3008_v41, %v8669_v6 }
 0x5f6   : > { %v6378_v37 = vadd.f32 %v8668_v29, %v2939_v57 }
 0x5f7   : > { %v4354_v48 = vmul.f32 -1.442695, %v6374_v61 }
 0x5f8   : > { %v4355_v45 = vmul.f32 -1.442695, %v6378_v37 }
 0x5f9   : > { %6616 = vpow2.f32 %v4354_v48 }
 0x5fa   : > { %6618 = vpow2.f32 %v4355_v45 }
 0x603   : > { %v6617_v19 = vpop.eup %6616 }
 0x604   : > { %v3157_v28 = vadd.f32 1.0, %v6617_v19  ;;  %v6619_v34 = vpop.eup %6618 }
 0x605   : > { %v3164_v58 = vadd.f32 1.0, %v6619_v34  ;;  %v8672_v34 = vld [vmem:[#allocation71_spill] sm:$0xff] }
 0x606   : > { %6620 = vrcp.f32 %v3157_v28  ;;  %v8671_v28 = vld [vmem:[#allocation58_spill] sm:$0xff] }
 0x607   : > { %6622 = vrcp.f32 %v3164_v58 }
 0x610   : > { %v6621_v51 = vpop.eup %6620 }
 0x611   : > { %v3167_v4 = vmul.f32 %v6621_v51, %v3009_v60  ;;  %v6623_v57 = vpop.eup %6622 }
 0x612   : > { %v3170_v41 = vsub.f32 1.0, %v6623_v57 }
 0x613   : > { %v3168_v30 = vadd.f32 %v8670_v52, %v3167_v4  ;;  %v3172_v52 = vmul.f32 %v6623_v57, %v8068_v26 }
 0x615   : > { %6624 = vtanh.f32 %v3168_v30 }
 0x61a   : > { %v3078_v15 = vpop.f32.mrb[52].mxu1  ;;  %v3149_v32 = vpop.f32.mrb[48].mxu0 }
 0x61b   : > { %v3079_v61 = vadd.f32 %v3078_v15, %v7755_v25  ;;  %v3080_v29 = vpop.f32.mrb[53].mxu1  ;;  %v4998_v45 = vpop.f32.mrb[49].mxu0  ;;  %v3150_v57 = vadd.f32 %v3149_v32, %v7787_v11 }
 0x61c   : > { %v3081_v19 = vadd.f32 %v3080_v29, %v7774_v2  ;;  %v8673_v45 = vld [vmem:[#allocation72_spill] sm:$0xff] }
 0x61d   : > { %v3174_v37 = vadd.f32 %v8671_v28, %v3079_v61 }
 0x61e   : > { %v3181_v48 = vadd.f32 %v8672_v34, %v3081_v19 }
 0x61f   : > { %v6625_v6 = vpop.eup %6624  ;;  %v4356_v51 = vmul.f32 -1.442695, %v3174_v37 }
 0x620   : > { %v3171_v60 = vmul.f32 %v6625_v6, %v3170_v41  ;;  %v4357_v58 = vmul.f32 -1.442695, %v3181_v48 }
 0x621   : > { %6626 = vpow2.f32 %v4356_v51  ;;  %v8675_v51 = vld [vmem:[#allocation34_spill] sm:$0xff] }
 0x622   : > { %v8158_v4 = vadd.f32 %v3172_v52, %v3171_v60  ;;  %6628 = vpow2.f32 %v4357_v58  ;;  %v8676_v60 = vld [vmem:[#allocation19_spill] sm:$0xff]  ;;  %v8678_v58 = vld [vmem:[#allocation36_spill] sm:$0xff] }
 0x623   : > { %v8677_v52 = vld [vmem:[#allocation35_spill] sm:$0xff] }
 0x624   : > { %3266 = vmatmul.mubr.f32.vlgmr.msra.gmra.mrb[50].mxu0 %v8158_v4  ;;  %5032 = vmatmul.mubr.f32.vlgmr.msra.gmra.mrb[54].mxu1 %v8158_v4 }
 0x625   : > { %6062 = vmatpush1.bf16.msra.mxu1 %v7297_v18  ;;  %6093 = vmatpush3.bf16.msra.mxu0 %v7438_v9 }
 0x626   : > { %6064 = vmatprep.subr.bf16.mxu1 %v7300_v42  ;;  %6094 = vmatprep.subr.bf16.mxu0 %v8593_v8 }
 0x627   : > { %3406 = vmatprep.mubr.f32.mxu1 %v8594_v0  ;;  %5066 = vmatprep.mubr.msk.f32.mxu0 %vm6841_vm4, %v8594_v0 }
 0x629   : > { %6066 = vmatpush1.bf16.msra.mxu1 %v7309_v47  ;;  %6096 = vmatpush3.bf16.msra.mxu0 %v7463_v53 }
 0x62a   : > { %6068 = vmatprep.subr.bf16.mxu1 %v7313_v1  ;;  %6097 = vmatprep.subr.bf16.mxu0 %v8593_v8 }
 0x62b   : > { %v6627_v26 = vpop.eup %6626 }
 0x62c   : > { %v3178_v6 = vadd.f32 1.0, %v6627_v26  ;;  %v6629_v30 = vpop.eup %6628  ;;  %v8679_v26 = vld [vmem:[#allocation20_spill] sm:$0xff] }
 0x62d   : > { %6070 = vmatpush1.bf16.msra.mxu1 %v7318_v46  ;;  %6099 = vmatpush3.bf16.msra.mxu0 %v7491_v31  ;;  %v3185_v15 = vadd.f32 1.0, %v6629_v30  ;;  %v8681_v30 = vld [vmem:[#allocation38_spill] sm:$0xff] }
 0x62e   : > { %6630 = vrcp.f32 %v3178_v6  ;;  %6072 = vmatprep.subr.bf16.mxu1 %v7321_v50  ;;  %6100 = vmatprep.subr.bf16.mxu0 %v8593_v8  ;;  %v8680_v6 = vld [vmem:[#allocation37_spill] sm:$0xff] }
 0x62f   : > { %6632 = vrcp.f32 %v3185_v15  ;;  %v8682_v15 = vld [vmem:[#allocation21_spill] sm:$0xff] }
 0x631   : > { %6074 = vmatpush1.bf16.msra.mxu1 %v7326_v49  ;;  %6102 = vmatpush3.bf16.msra.mxu0 %v7516_v12 }
 0x632   : > { %6076 = vmatprep.subr.bf16.mxu1 %v7329_v62  ;;  %6103 = vmatprep.subr.bf16.mxu0 %v8593_v8 }
 0x635   : > { %6078 = vmatpush1.bf16.msra.mxu1 %v7334_v3  ;;  %6105 = vmatpush3.bf16.msra.mxu0 %v7535_v44 }
 0x636   : > { %6080 = vmatprep.subr.bf16.mxu1 %v7343_v17  ;;  %6106 = vmatprep.subr.bf16.mxu0 %v8593_v8 }
 0x638   : > { %v6631_v61 = vpop.eup %6630 }
 0x639   : > { %v3188_v29 = vmul.f32 %v6631_v61, %v3150_v57  ;;  %6082 = vmatpush1.bf16.msra.mxu1 %v7356_v38  ;;  %6108 = vmatpush3.bf16.msra.mxu0 %v7543_v59  ;;  %v6633_v32 = vpop.eup %6632  ;;  %v8683_v57 = vld [vmem:[#allocation22_spill] sm:$0xff] }
 0x63a   : > { %6084 = vmatprep.subr.bf16.mxu1 %v7367_v24  ;;  %6109 = vmatprep.subr.bf16.mxu0 %v8593_v8  ;;  %v3191_v28 = vsub.f32 1.0, %v6633_v32  ;;  %v3193_v48 = vmul.f32 %v6633_v32, %v8110_v35  ;;  %v8674_v35 = vld [vmem:[#allocation33_spill] sm:$0xff] }
 0x63b   : > { %v3189_v19 = vadd.f32 %v8673_v45, %v3188_v29  ;;  %v8684_v45 = vld [vmem:[#allocation47_spill] sm:$0xff] }
 0x63d   : > { %6634 = vtanh.f32 %v3189_v19  ;;  %6086 = vmatpush1.bf16.msra.mxu1 %v7383_v36  ;;  %6111 = vmatpush3.bf16.msra.mxu0 %v7551_v63 }
 0x63e   : > { %6088 = vmatprep.subr.bf16.mxu1 %v7394_v10  ;;  %6112 = vmatprep.subr.bf16.mxu0 %v8593_v8 }
 0x641   : > { %6090 = vmatpush1.bf16.msra.mxu1 %v7410_v54  ;;  %6114 = vmatpush3.bf16.msra.mxu0 %v8595_v40 }
 0x642   : > { %6116 = vmatprep.subr.bf16.mxu0 %v8596_v5  ;;  %6147 = vmatprep.subr.bf16.mxu1 %v8593_v8 }
 0x647   : > { %v6635_v37 = vpop.eup %6634 }
 0x648   : > { %v3192_v34 = vmul.f32 %v6635_v37, %v3191_v28  ;;  %v8685_v37 = vld [vmem:[#allocation48_spill] sm:$0xff] }
 0x64a   : > { %v8200_v41 = vadd.f32 %v3193_v48, %v3192_v34 }
 0x64c   : > { %3407 = vmatmul.mubr.f32.vlgmr.msra.gmra.mrb[56].mxu1 %v8200_v41  ;;  %5067 = vmatmul.mubr.f32.vlgmr.msra.gmra.mrb[52].mxu0 %v8200_v41 }
 0x64d   : > { %6118 = vmatpush1.bf16.msra.mxu0 %v8597_v27  ;;  %6149 = vmatpush3.bf16.msra.mxu1 %v8598_v33 }
 0x64e   : > { %6120 = vmatprep.subr.bf16.mxu0 %v8599_v21  ;;  %6150 = vmatprep.subr.bf16.mxu1 %v8593_v8 }
 0x64f   : > { %3595 = vmatprep.mubr.f32.mxu0 %v8594_v0  ;;  %5101 = vmatprep.mubr.msk.f32.mxu1 %vm6841_vm4, %v8594_v0 }
 0x651   : > { %6122 = vmatpush1.bf16.msra.mxu0 %v8600_v43  ;;  %6152 = vmatpush3.bf16.msra.mxu1 %v8601_v14 }
 0x652   : > { %6124 = vmatprep.subr.bf16.mxu0 %v8602_v22  ;;  %6153 = vmatprep.subr.bf16.mxu1 %v8593_v8 }
 0x655   : > { %6126 = vmatpush1.bf16.msra.mxu0 %v8603_v16  ;;  %6155 = vmatpush3.bf16.msra.mxu1 %v8604_v13 }
 0x656   : > { %6128 = vmatprep.subr.bf16.mxu0 %v8605_v23  ;;  %6156 = vmatprep.subr.bf16.mxu1 %v8593_v8 }
 0x659   : > { %6130 = vmatpush1.bf16.msra.mxu0 %v8606_v56  ;;  %6158 = vmatpush3.bf16.msra.mxu1 %v8607_v7 }
 0x65a   : > { %6132 = vmatprep.subr.bf16.mxu0 %v8622_v55  ;;  %6159 = vmatprep.subr.bf16.mxu1 %v8593_v8 }
 0x65d   : > { %6134 = vmatpush1.bf16.msra.mxu0 %v8623_v20  ;;  %6161 = vmatpush3.bf16.msra.mxu1 %v8624_v39 }
 0x65e   : > { %6136 = vmatprep.subr.bf16.mxu0 %v8674_v35  ;;  %6162 = vmatprep.subr.bf16.mxu1 %v8593_v8  ;;  %v8687_v35 = vld [vmem:[#allocation61_spill] sm:$0xff] }
 0x661   : > { %6138 = vmatpush1.bf16.msra.mxu0 %v8675_v51  ;;  %6164 = vmatpush3.bf16.msra.mxu1 %v8676_v60 }
 0x662   : > { %6140 = vmatprep.subr.bf16.mxu0 %v8677_v52  ;;  %6165 = vmatprep.subr.bf16.mxu1 %v8593_v8 }
 0x665   : > { %6142 = vmatpush1.bf16.msra.mxu0 %v8678_v58  ;;  %6167 = vmatpush3.bf16.msra.mxu1 %v8679_v26 }
 0x666   : > { %6144 = vmatprep.subr.bf16.mxu0 %v8680_v6  ;;  %6168 = vmatprep.subr.bf16.mxu1 %v8593_v8 }
 0x669   : > { %6146 = vmatpush1.bf16.msra.mxu0 %v8681_v30  ;;  %6170 = vmatpush3.bf16.msra.mxu1 %v8682_v15 }
 0x66a   : > { %6172 = vmatprep.subr.bf16.mxu1 %v8683_v57  ;;  %6203 = vmatprep.subr.bf16.mxu0 %v8593_v8  ;;  %v8686_v57 = vld [vmem:[#allocation77_spill] sm:$0xff] }
 0x6f7   : > { %v3267_v61 = vpop.f32.mrb[50].mxu0  ;;  %v3338_v29 = vpop.f32.mrb[54].mxu1 }
 0x6f8   : > { %v6382_v19 = vadd.f32 %v8684_v45, %v3267_v61  ;;  %v3269_v32 = vpop.f32.mrb[51].mxu0  ;;  %v5033_v28 = vpop.f32.mrb[55].mxu1  ;;  %v3339_v52 = vadd.f32 %v3338_v29, %v8686_v57  ;;  %v8689_v29 = vld [vmem:[#allocation69_spill] sm:$0xff] }
 0x6f9   : > { %v6386_v34 = vadd.f32 %v8685_v37, %v3269_v32 }
 0x6fa   : > { %v4358_v48 = vmul.f32 -1.442695, %v6382_v19 }
 0x6fb   : > { %v4359_v6 = vmul.f32 -1.442695, %v6386_v34 }
 0x6fc   : > { %6636 = vpow2.f32 %v4358_v48 }
 0x6fd   : > { %6638 = vpow2.f32 %v4359_v6 }
 0x706   : > { %v6637_v26 = vpop.eup %6636 }
 0x707   : > { %v3487_v30 = vadd.f32 1.0, %v6637_v26  ;;  %v6639_v15 = vpop.eup %6638 }
 0x708   : > { %v3494_v58 = vadd.f32 1.0, %v6639_v15  ;;  %v8688_v15 = vld [vmem:[#allocation56_spill] sm:$0xff] }
 0x709   : > { %6640 = vrcp.f32 %v3487_v30 }
 0x70a   : > { %6642 = vrcp.f32 %v3494_v58 }
 0x713   : > { %v6641_v60 = vpop.eup %6640 }
 0x714   : > { %v3497_v51 = vmul.f32 %v6641_v60, %v3339_v52  ;;  %v6643_v45 = vpop.eup %6642 }
 0x715   : > { %v3500_v30 = vsub.f32 1.0, %v6643_v45  ;;  %v3502_v52 = vmul.f32 %v6643_v45, %v8158_v4 }
 0x716   : > { %v3498_v61 = vadd.f32 %v8687_v35, %v3497_v51 }
 0x718   : > { %6644 = vtanh.f32 %v3498_v61 }
 0x71f   : > { %v3408_v28 = vpop.f32.mrb[56].mxu1  ;;  %v3479_v32 = vpop.f32.mrb[52].mxu0 }
 0x720   : > { %v3409_v19 = vadd.f32 %v3408_v28, %v7755_v25  ;;  %v3410_v37 = vpop.f32.mrb[57].mxu1  ;;  %v5068_v6 = vpop.f32.mrb[53].mxu0  ;;  %v3480_v28 = vadd.f32 %v3479_v32, %v7787_v11 }
 0x721   : > { %v3411_v26 = vadd.f32 %v3410_v37, %v7774_v2  ;;  %v8690_v6 = vld [vmem:[#allocation70_spill] sm:$0xff] }
 0x722   : > { %v6645_v34 = vpop.eup %6644  ;;  %v3504_v48 = vadd.f32 %v8688_v15, %v3409_v19 }
 0x723   : > { %v3511_v57 = vadd.f32 %v8689_v29, %v3411_v26  ;;  %v3501_v60 = vmul.f32 %v6645_v34, %v3500_v30 }
 0x724   : > { %v4360_v35 = vmul.f32 -1.442695, %v3504_v48 }
 0x725   : > { %v8248_v51 = vadd.f32 %v3502_v52, %v3501_v60  ;;  %v4361_v58 = vmul.f32 -1.442695, %v3511_v57  ;;  %v8702_v60 = vld [vmem:[#allocation50_spill] sm:$0xff] }
 0x726   : > { %6646 = vpow2.f32 %v4360_v35 }
 0x727   : > { %3596 = vmatmul.mubr.f32.vlgmr.msra.gmra.mrb[54].mxu0 %v8248_v51  ;;  %5102 = vmatmul.mubr.f32.vlgmr.msra.gmra.mrb[58].mxu1 %v8248_v51  ;;  %6648 = vpow2.f32 %v4361_v58 }
 0x728   : > { %6174 = vmatpush1.bf16.msra.mxu1 %v7297_v18  ;;  %6205 = vmatpush3.bf16.msra.mxu0 %v7438_v9 }
 0x729   : > { %6176 = vmatprep.subr.bf16.mxu1 %v7300_v42  ;;  %6206 = vmatprep.subr.bf16.mxu0 %v8593_v8 }
 0x72a   : > { %3736 = vmatprep.mubr.f32.mxu1 %v8594_v0  ;;  %5136 = vmatprep.mubr.msk.f32.mxu0 %vm6841_vm4, %v8594_v0 }
 0x72c   : > { %6178 = vmatpush1.bf16.msra.mxu1 %v7309_v47  ;;  %6208 = vmatpush3.bf16.msra.mxu0 %v7463_v53 }
 0x72d   : > { %6180 = vmatprep.subr.bf16.mxu1 %v7313_v1  ;;  %6209 = vmatprep.subr.bf16.mxu0 %v8593_v8 }
 0x730   : > { %v6647_v4 = vpop.eup %6646  ;;  %6182 = vmatpush1.bf16.msra.mxu1 %v7318_v46  ;;  %6211 = vmatpush3.bf16.msra.mxu0 %v7491_v31 }
 0x731   : > { %v3508_v57 = vadd.f32 1.0, %v6647_v4  ;;  %6184 = vmatprep.subr.bf16.mxu1 %v7321_v50  ;;  %6212 = vmatprep.subr.bf16.mxu0 %v8593_v8  ;;  %v6649_v61 = vpop.eup %6648 }
 0x732   : > { %v3515_v45 = vadd.f32 1.0, %v6649_v61 }
 0x733   : > { %6650 = vrcp.f32 %v3508_v57 }
 0x734   : > { %6186 = vmatpush1.bf16.msra.mxu1 %v7326_v49  ;;  %6214 = vmatpush3.bf16.msra.mxu0 %v7516_v12  ;;  %6652 = vrcp.f32 %v3515_v45 }
 0x735   : > { %6188 = vmatprep.subr.bf16.mxu1 %v7329_v62  ;;  %6215 = vmatprep.subr.bf16.mxu0 %v8593_v8 }
 0x738   : > { %6190 = vmatpush1.bf16.msra.mxu1 %v7334_v3  ;;  %6217 = vmatpush3.bf16.msra.mxu0 %v7535_v44 }
 0x739   : > { %6192 = vmatprep.subr.bf16.mxu1 %v7343_v17  ;;  %6218 = vmatprep.subr.bf16.mxu0 %v8593_v8 }
 0x73c   : > { %6194 = vmatpush1.bf16.msra.mxu1 %v7356_v38  ;;  %6220 = vmatpush3.bf16.msra.mxu0 %v7543_v59 }
 0x73d   : > { %v6651_v19 = vpop.eup %6650  ;;  %6196 = vmatprep.subr.bf16.mxu1 %v7367_v24  ;;  %6221 = vmatprep.subr.bf16.mxu0 %v8593_v8 }
 0x73e   : > { %v3518_v37 = vmul.f32 %v6651_v19, %v3480_v28  ;;  %v6653_v32 = vpop.eup %6652  ;;  %v8703_v28 = vld [vmem:[#allocation77_spill] sm:$0xff] }
 0x73f   : > { %v3521_v30 = vsub.f32 1.0, %v6653_v32  ;;  %v3523_v48 = vmul.f32 %v6653_v32, %v8200_v41 }
 0x740   : > { %v3519_v26 = vadd.f32 %v8690_v6, %v3518_v37  ;;  %6198 = vmatpush1.bf16.msra.mxu1 %v7383_v36  ;;  %6223 = vmatpush3.bf16.msra.mxu0 %v7551_v63 }
 0x741   : > { %6200 = vmatprep.subr.bf16.mxu1 %v7394_v10  ;;  %6224 = vmatprep.subr.bf16.mxu0 %v8593_v8 }
 0x742   : > { %6654 = vtanh.f32 %v3519_v26  ;;  %v8704_v26 = vld [vmem:[#allocation63_spill] sm:$0xff] }
 0x744   : > { %6202 = vmatpush1.bf16.msra.mxu1 %v7410_v54  ;;  %6226 = vmatpush3.bf16.msra.mxu0 %v8595_v40 }
 0x745   : > { %6228 = vmatprep.subr.bf16.mxu0 %v8596_v5  ;;  %6259 = vmatprep.subr.bf16.mxu1 %v8593_v8  ;;  %v8691_v5 = vld [vmem:[#allocation33_spill] sm:$0xff] }
 0x74c   : > { %v6655_v34 = vpop.eup %6654 }
 0x74d   : > { %v3522_v15 = vmul.f32 %v6655_v34, %v3521_v30 }
 0x74f   : > { %v8290_v29 = vadd.f32 %v3523_v48, %v3522_v15 }
 0x751   : > { %3737 = vmatmul.mubr.f32.vlgmr.msra.gmra.mrb[60].mxu1 %v8290_v29  ;;  %5137 = vmatmul.mubr.f32.vlgmr.msra.gmra.mrb[56].mxu0 %v8290_v29 }
 0x752   : > { %6230 = vmatpush1.bf16.msra.mxu0 %v8597_v27  ;;  %6261 = vmatpush3.bf16.msra.mxu1 %v8598_v33  ;;  %v8692_v27 = vld [vmem:[#allocation34_spill] sm:$0xff]  ;;  %v8693_v33 = vld [vmem:[#allocation19_spill] sm:$0xff] }
 0x753   : > { %6232 = vmatprep.subr.bf16.mxu0 %v8599_v21  ;;  %6262 = vmatprep.subr.bf16.mxu1 %v8593_v8  ;;  %v8694_v21 = vld [vmem:[#allocation35_spill] sm:$0xff] }
 0x754   : > { %3925 = vmatprep.mubr.f32.mxu0 %v8594_v0  ;;  %5171 = vmatprep.mubr.msk.f32.mxu1 %vm6841_vm4, %v8594_v0 }
 0x756   : > { %6234 = vmatpush1.bf16.msra.mxu0 %v8600_v43  ;;  %6264 = vmatpush3.bf16.msra.mxu1 %v8601_v14  ;;  %v8695_v43 = vld [vmem:[#allocation36_spill] sm:$0xff] }
 0x757   : > { %6236 = vmatprep.subr.bf16.mxu0 %v8602_v22  ;;  %6265 = vmatprep.subr.bf16.mxu1 %v8593_v8  ;;  %v8696_v14 = vld [vmem:[#allocation20_spill] sm:$0xff]  ;;  %v8697_v22 = vld [vmem:[#allocation37_spill] sm:$0xff] }
 0x75a   : > { %6238 = vmatpush1.bf16.msra.mxu0 %v8603_v16  ;;  %6267 = vmatpush3.bf16.msra.mxu1 %v8604_v13  ;;  %v8698_v16 = vld [vmem:[#allocation38_spill] sm:$0xff]  ;;  %v8699_v13 = vld [vmem:[#allocation21_spill] sm:$0xff] }
 0x75b   : > { %6240 = vmatprep.subr.bf16.mxu0 %v8605_v23  ;;  %6268 = vmatprep.subr.bf16.mxu1 %v8593_v8  ;;  %v8700_v23 = vld [vmem:[#allocation22_spill] sm:$0xff] }
 0x75e   : > { %6242 = vmatpush1.bf16.msra.mxu0 %v8606_v56  ;;  %6270 = vmatpush3.bf16.msra.mxu1 %v8607_v7 }
 0x75f   : > { %6244 = vmatprep.subr.bf16.mxu0 %v8622_v55  ;;  %6271 = vmatprep.subr.bf16.mxu1 %v8593_v8  ;;  %v8701_v55 = vld [vmem:[#allocation49_spill] sm:$0xff] }
 0x762   : > { %6246 = vmatpush1.bf16.msra.mxu0 %v8623_v20  ;;  %6273 = vmatpush3.bf16.msra.mxu1 %v8624_v39 }
 0x763   : > { %6248 = vmatprep.subr.bf16.mxu0 %v8691_v5  ;;  %6274 = vmatprep.subr.bf16.mxu1 %v8593_v8 }
 0x766   : > { %6250 = vmatpush1.bf16.msra.mxu0 %v8692_v27  ;;  %6276 = vmatpush3.bf16.msra.mxu1 %v8693_v33 }
 0x767   : > { %6252 = vmatprep.subr.bf16.mxu0 %v8694_v21  ;;  %6277 = vmatprep.subr.bf16.mxu1 %v8593_v8 }
 0x76a   : > { %6254 = vmatpush1.bf16.msra.mxu0 %v8695_v43  ;;  %6279 = vmatpush3.bf16.msra.mxu1 %v8696_v14 }
 0x76b   : > { %6256 = vmatprep.subr.bf16.mxu0 %v8697_v22  ;;  %6280 = vmatprep.subr.bf16.mxu1 %v8593_v8 }
 0x76e   : > { %6258 = vmatpush1.bf16.msra.mxu0 %v8698_v16  ;;  %6282 = vmatpush3.bf16.msra.mxu1 %v8699_v13  ;;  %v8705_v16 = vld [vmem:[#allocation54_spill] sm:$0xff] }
 0x76f   : > { %6284 = vmatprep.subr.bf16.mxu1 %v8700_v23  ;;  %6315 = vmatprep.subr.bf16.mxu0 %v8593_v8  ;;  %v8706_v23 = vld [vmem:[#allocation67_spill] sm:$0xff] }
 0x7fa   : > { %v3597_v56 = vpop.f32.mrb[54].mxu0  ;;  %v3668_v7 = vpop.f32.mrb[58].mxu1 }
 0x7fb   : > { %v6390_v20 = vadd.f32 %v8701_v55, %v3597_v56  ;;  %v3599_v39 = vpop.f32.mrb[55].mxu0  ;;  %v5103_v41 = vpop.f32.mrb[59].mxu1  ;;  %v3669_v19 = vadd.f32 %v3668_v7, %v8703_v28 }
 0x7fc   : > { %v6394_v52 = vadd.f32 %v8702_v60, %v3599_v39 }
 0x7fd   : > { %v4362_v35 = vmul.f32 -1.442695, %v6390_v20 }
 0x7fe   : > { %v4363_v58 = vmul.f32 -1.442695, %v6394_v52 }
 0x7ff   : > { %6656 = vpow2.f32 %v4362_v35 }
 0x800   : > { %6658 = vpow2.f32 %v4363_v58  ;;  %v8710_v58 = vld [vmem:[#allocation64_spill] sm:$0xff] }
 0x809   : > { %v6657_v4 = vpop.eup %6656 }
 0x80a   : > { %v3817_v57 = vadd.f32 1.0, %v6657_v4  ;;  %v6659_v61 = vpop.eup %6658 }
 0x80b   : > { %v3824_v45 = vadd.f32 1.0, %v6659_v61 }
 0x80c   : > { %6660 = vrcp.f32 %v3817_v57 }
 0x80d   : > { %6662 = vrcp.f32 %v3824_v45 }
 0x816   : > { %v6661_v37 = vpop.eup %6660 }
 0x817   : > { %v3827_v6 = vmul.f32 %v6661_v37, %v3669_v19  ;;  %v6663_v30 = vpop.eup %6662 }
 0x818   : > { %v3830_v48 = vsub.f32 1.0, %v6663_v30  ;;  %v3832_v22 = vmul.f32 %v6663_v30, %v8248_v51 }
 0x819   : > { %v3828_v32 = vadd.f32 %v8704_v26, %v3827_v6 }
 0x81b   : > { %6664 = vtanh.f32 %v3828_v32 }
 0x824   : > { %v3738_v34 = vpop.f32.mrb[60].mxu1  ;;  %v3809_v15 = vpop.f32.mrb[56].mxu0 }
 0x825   : > { %v6665_v5 = vpop.eup %6664  ;;  %v3739_v27 = vadd.f32 %v3738_v34, %v7755_v25  ;;  %v3740_v33 = vpop.f32.mrb[61].mxu1 }
 0x826   : > { %v5138_v21 = vpop.f32.mrb[57].mxu0  ;;  %v3741_v43 = vadd.f32 %v3740_v33, %v7774_v2  ;;  %v3831_v14 = vmul.f32 %v6665_v5, %v3830_v48  ;;  %v8711_v48 = vld [vmem:[#allocation53_spill] sm:$0xff] }
 0x827   : > { %v3834_v13 = vadd.f32 %v8705_v16, %v3739_v27  ;;  %v8712_v27 = vld [vmem:[#allocation65_spill] sm:$0xff] }
 0x828   : > { %v3841_v56 = vadd.f32 %v8706_v23, %v3741_v43  ;;  %v8338_v7 = vadd.f32 %v3832_v22, %v3831_v14 }
 0x829   : > { %v4364_v55 = vmul.f32 -1.442695, %v3834_v13 }
 0x82a   : > { %3926 = vmatmul.mubr.f32.vlgmr.msra.gmra.mrb[58].mxu0 %v8338_v7  ;;  %5172 = vmatmul.mubr.f32.vlgmr.msra.gmra.mrb[62].mxu1 %v8338_v7  ;;  %v4365_v51 = vmul.f32 -1.442695, %v3841_v56  ;;  %v8713_v56 = vld [vmem:[#allocation66_spill] sm:$0xff] }
 0x82b   : > { %6666 = vpow2.f32 %v4364_v55  ;;  %6286 = vmatpush1.bf16.msra.mxu1 %v7297_v18  ;;  %6317 = vmatpush3.bf16.msra.mxu0 %v7438_v9 }
 0x82c   : > { %6288 = vmatprep.subr.bf16.mxu1 %v7300_v42  ;;  %6318 = vmatprep.subr.bf16.mxu0 %v8593_v8  ;;  %6668 = vpow2.f32 %v4365_v51 }
 0x82d   : > { %4066 = vmatprep.mubr.f32.mxu1 %v8594_v0  ;;  %5206 = vmatprep.mubr.msk.f32.mxu0 %vm6841_vm4, %v8594_v0 }
 0x82f   : > { %6290 = vmatpush1.bf16.msra.mxu1 %v7309_v47  ;;  %6320 = vmatpush3.bf16.msra.mxu0 %v7463_v53 }
 0x830   : > { %6292 = vmatprep.subr.bf16.mxu1 %v7313_v1  ;;  %6321 = vmatprep.subr.bf16.mxu0 %v8593_v8 }
 0x833   : > { %6294 = vmatpush1.bf16.msra.mxu1 %v7318_v46  ;;  %6323 = vmatpush3.bf16.msra.mxu0 %v7491_v31  ;;  %v3810_v46 = vadd.f32 %v3809_v15, %v7787_v11 }
 0x834   : > { %6296 = vmatprep.subr.bf16.mxu1 %v7321_v50  ;;  %6324 = vmatprep.subr.bf16.mxu0 %v8593_v8 }
 0x835   : > { %v6667_v18 = vpop.eup %6666 }
 0x836   : > { %v3838_v42 = vadd.f32 1.0, %v6667_v18  ;;  %v6669_v47 = vpop.eup %6668 }
 0x837   : > { %6298 = vmatpush1.bf16.msra.mxu1 %v7326_v49  ;;  %6326 = vmatpush3.bf16.msra.mxu0 %v7516_v12  ;;  %v3845_v1 = vadd.f32 1.0, %v6669_v47  ;;  %v8708_v12 = vld [vmem:[#allocation51_spill] sm:$0xff] }
 0x838   : > { %6670 = vrcp.f32 %v3838_v42  ;;  %6300 = vmatprep.subr.bf16.mxu1 %v7329_v62  ;;  %6327 = vmatprep.subr.bf16.mxu0 %v8593_v8  ;;  %v8707_v62 = vld [vmem:[#allocation68_spill] sm:$0xff] }
 0x839   : > { %6672 = vrcp.f32 %v3845_v1 }
 0x83b   : > { %6302 = vmatpush1.bf16.msra.mxu1 %v7334_v3  ;;  %6329 = vmatpush3.bf16.msra.mxu0 %v7535_v44 }
 0x83c   : > { %6304 = vmatprep.subr.bf16.mxu1 %v7343_v17  ;;  %6330 = vmatprep.subr.bf16.mxu0 %v8593_v8 }
 0x83f   : > { %6306 = vmatpush1.bf16.msra.mxu1 %v7356_v38  ;;  %6332 = vmatpush3.bf16.msra.mxu0 %v7543_v59 }
 0x840   : > { %6308 = vmatprep.subr.bf16.mxu1 %v7367_v24  ;;  %6333 = vmatprep.subr.bf16.mxu0 %v8593_v8 }
 0x842   : > { %v6671_v50 = vpop.eup %6670 }
 0x843   : > { %v3848_v49 = vmul.f32 %v6671_v50, %v3810_v46  ;;  %6310 = vmatpush1.bf16.msra.mxu1 %v7383_v36  ;;  %6335 = vmatpush3.bf16.msra.mxu0 %v7551_v63  ;;  %v6673_v17 = vpop.eup %6672  ;;  %v8709_v63 = vld [vmem:[#allocation52_spill] sm:$0xff] }
 0x844   : > { %6312 = vmatprep.subr.bf16.mxu1 %v7394_v10  ;;  %6336 = vmatprep.subr.bf16.mxu0 %v8593_v8  ;;  %v3851_v38 = vsub.f32 1.0, %v6673_v17  ;;  %v3853_v53 = vmul.f32 %v6673_v17, %v8290_v29 }
 0x845   : > { %v3849_v3 = vadd.f32 %v8707_v62, %v3848_v49 }
 0x847   : > { %6674 = vtanh.f32 %v3849_v3  ;;  %6314 = vmatpush1.bf16.msra.mxu1 %v7410_v54  ;;  %6338 = vmatpush3.bf16.msra.mxu0 %v8595_v40 }
 0x851   : > { %v6675_v24 = vpop.eup %6674 }
 0x852   : > { %v3852_v9 = vmul.f32 %v6675_v24, %v3851_v38 }
 0x854   : > { %v8378_v36 = vadd.f32 %v3853_v53, %v3852_v9 }
 0x856   : > { %4067 = vmatmul.mubr.f32.vlgmr.msra.gmra.mrb[64].mxu1 %v8378_v36  ;;  %5207 = vmatmul.mubr.f32.vlgmr.msra.gmra.mrb[60].mxu0 %v8378_v36 }
 0x8fd   : > { %v3927_v10 = vpop.f32.mrb[58].mxu0  ;;  %v3998_v31 = vpop.f32.mrb[62].mxu1 }
 0x8fe   : > { %v6398_v44 = vadd.f32 %v8708_v12, %v3927_v10  ;;  %v3929_v59 = vpop.f32.mrb[59].mxu0  ;;  %v5173_v54 = vpop.f32.mrb[63].mxu1  ;;  %v3999_v60 = vadd.f32 %v3998_v31, %v8703_v28 }
 0x8ff   : > { %v6402_v8 = vadd.f32 %v8709_v63, %v3929_v59 }
 0x900   : > { %v4366_v0 = vmul.f32 -1.442695, %v6398_v44 }
 0x901   : > { %v4367_v40 = vmul.f32 -1.442695, %v6402_v8 }
 0x902   : > { %6676 = vpow2.f32 %v4366_v0 }
 0x903   : > { %6678 = vpow2.f32 %v4367_v40 }
 0x90c   : > { %v6677_v29 = vpop.eup %6676 }
 0x90d   : > { %v4147_v20 = vadd.f32 1.0, %v6677_v29  ;;  %v6679_v39 = vpop.eup %6678 }
 0x90e   : > { %v4154_v41 = vadd.f32 1.0, %v6679_v39 }
 0x90f   : > { %6680 = vrcp.f32 %v4147_v20 }
 0x910   : > { %6682 = vrcp.f32 %v4154_v41 }
 0x919   : > { %v6681_v52 = vpop.eup %6680 }
 0x91a   : > { %v4157_v35 = vmul.f32 %v6681_v52, %v3999_v60  ;;  %v6683_v57 = vpop.eup %6682 }
 0x91b   : > { %v4160_v61 = vsub.f32 1.0, %v6683_v57  ;;  %v4162_v26 = vmul.f32 %v6683_v57, %v8338_v7 }
 0x91c   : > { %v4158_v4 = vadd.f32 %v8710_v58, %v4157_v35 }
 0x91e   : > { %6684 = vtanh.f32 %v4158_v4 }
 0x928   : > { %v6685_v45 = vpop.eup %6684 }
 0x929   : > { %v4068_v19 = vpop.f32.mrb[64].mxu1  ;;  %v4139_v37 = vpop.f32.mrb[60].mxu0  ;;  %v4161_v6 = vmul.f32 %v6685_v45, %v4160_v61 }
 0x92a   : > { %v4069_v32 = vadd.f32 %v4068_v19, %v7755_v25  ;;  %v4070_v28 = vpop.f32.mrb[65].mxu1  ;;  %v5208_v30 = vpop.f32.mrb[61].mxu0  ;;  %v4140_v13 = vadd.f32 %v4139_v37, %v7787_v11 }
 0x92b   : > { %v4071_v34 = vadd.f32 %v4070_v28, %v7774_v2  ;;  %v4163_v15 = vadd.f32 %v4162_v26, %v4161_v6 }
 0x92c   : > { %v4164_v5 = vadd.f32 %v8711_v48, %v4069_v32 }
 0x92d   : > { %v4171_v33 = vadd.f32 %v8712_v27, %v4071_v34  ;;  %4185 = vst [vmem:[%s346_s17] sm:$0xff] %v4163_v15 }
 0x92e   : > { %v4368_v21 = vmul.f32 -1.442695, %v4164_v5 }
 0x92f   : > { %v4369_v43 = vmul.f32 -1.442695, %v4171_v33 }
 0x930   : > { %6686 = vpow2.f32 %v4368_v21 }
 0x931   : > { %6688 = vpow2.f32 %v4369_v43 }
 0x93a   : > { %v6687_v14 = vpop.eup %6686 }
 0x93b   : > { %v4168_v22 = vadd.f32 1.0, %v6687_v14  ;;  %v6689_v25 = vpop.eup %6688 }
 0x93c   : > { %v4175_v16 = vadd.f32 1.0, %v6689_v25 }
 0x93d   : > { %6690 = vrcp.f32 %v4168_v22 }
 0x93e   : > { %6692 = vrcp.f32 %v4175_v16 }
 0x947   : > { %v6691_v2 = vpop.eup %6690 }
 0x948   : > { %v4178_v23 = vmul.f32 %v6691_v2, %v4140_v13  ;;  %v6693_v55 = vpop.eup %6692 }
 0x949   : > { %v4181_v51 = vsub.f32 1.0, %v6693_v55  ;;  %v4183_v47 = vmul.f32 %v6693_v55, %v8378_v36 }
 0x94a   : > { %v4179_v7 = vadd.f32 %v8713_v56, %v4178_v23 }
 0x94c   : > { %6694 = vtanh.f32 %v4179_v7 }
 0x956   : > { %v6695_v18 = vpop.eup %6694 }
 0x957   : > { %v4182_v42 = vmul.f32 %v6695_v18, %v4181_v51 }
 0x959   : > { %v4184_v1 = vadd.f32 %v4183_v47, %v4182_v42 }
 0x95b   : > { %4186 = vst [vmem:[%s346_s17 + $0x8] sm:$0xff] %v4184_v1 }
 0x95c   : > { %6773 = shalt.err (!%p6770_p13)
}
 0x95d   : > { %s6774_s14 = scalar_lea.hbm %s8401_s13, 256  ;;  %s6778_s23 = scalar_lea.hbm %s8453_s8, 512 }
 0x95e   : > { %p6775_p0 = scmp.ne.s32.totalorder %s8401_s13, %s6774_s14  ;;  %p6779_p9 = scmp.lt.u32.totalorder %s8401_s13, %s8453_s8 }
 0x95f   : > { %p6780_p12 = scmp.lt.u32.totalorder %s6778_s23, %s6774_s14  ;;  %p6782_p1 = scmp.lt.u32.totalorder %s6774_s14, %s8401_s13 }
 0x960   : > { %p6776_p5 = pnand %p6775_p0, %p8714_p2 }
 0x961   : > { %p6781_p10 = por %p6780_p12, %p6779_p9 }
 0x962   : > { %p6777_p6 = pneg %p6776_p5 }
 0x963   : > { %p6783_p3 = por %p6782_p1, %p6781_p10 }
 0x965   : > { %p6784_p4 = pnand %p6783_p3, %p6777_p6 }
 0x967   : > { %6787 = shalt.err (!%p6784_p4)
}
 0x968   : > { %6476 = dma.vmem_to_hbm [thread:$0]  (%p8714_p2), %s8403_s26, 256, %s8401_s13, %s4188_s18  }
 0x969 PF: > { %p6493_p7 = scmp.ge.s32.totalorder %s6830_s30, 2  ;;  %s4214_s24 = sand.u32 1, %s6818_s27  }
 0x96a   : > { %p8715_p8 = scmp.ne.s32.totalorder %s8519_s16, 0  ;;  %s4215_s10 = scalar_lea.sflag [#allocation5], %s4214_s24 }
 0x96c   : > { %p6486_p11 = pnand %p6493_p7, %p8715_p8 }
 0x96e   : > { %6813 = dma.done.wait (!%p6486_p11), %s4215_s10, 256  }
 0x96f   : > { %6815 = vsyncadd (!%p6486_p11), %s4215_s10, 4294967040  ;;  %s8716_s12 = sld [smem:[#allocation12_spill]]  ;;  %s8717_s29 = sld [smem:[#allocation13_spill]] }
 0x970   : > { %p20_p13 = scmp.ge.s32.totalorder %s6913_s11, 4   ;;  %s8718_s27 = smov %s6822_s28 }
 0x971   : > { %s8720_s30 = smov %s6913_s11 }
 0x972   :  { %22 = sbr.rel (!%p20_p13) target bundleno = 5 (0x5), region = 99 }
 0x975   : > { %s8719_s28 = smov %s8716_s12 }
 0x979   :  { %4220 = vsyncpa [#allocation4], 1 }
 0x97a   :  { %4222 = vsyncpa [#allocation4 + $0x1], 1 }
 0x97b   :  { %4223 = vsyncpa [#allocation7], 1 }
 0x97c   :  { %4224 = vsyncpa [#allocation5], 1 }
 0x97d   :  { %4226 = vsyncpa [#allocation5 + $0x1], 1 }

</bundles_post_ra>
